<compile_context>
chip_gen: v6e
topology: v6e:2x2x1
jax: 0.10.0
libtpu: 0.0.40
codegen_flags: <defaults>
</compile_context>

<pallas_src>
import functools
import math

import jax
import jax.numpy as jnp
from jax.experimental import pallas as pl
from jax.experimental.pallas import tpu as pltpu

LEAKY_SLOPE = 0.02
BN_EPS = 1e-5


# ----------------------------- Pallas kernel -----------------------------

def _fused_stage_kernel(xph_ref, w_ref, b_ref, o_ref, px_ref, *,
                        cin, nphase, nkp, ktaps, patch_w, odd_off,
                        pool_half, out_len, pad_e_right, apply_act):
    """One full network stage for a single batch element.

    xph_ref : (nphase*cin, m_ph)  phase-decomposed zero-padded input
                                  xph[r*cin + c, m] = x_pad[c, nphase*m + r]
    w_ref   : (cout, ktaps*cin)   conv weight, k-major / cin-minor, BN folded
    b_ref   : (cout, 1)           per-channel shift (conv bias + BN folded)
    o_ref   : (cout, out_len)     stage output (pool output, or conv output)
    px_ref  : (nkp*cin, patch_w)  scratch: im2col patches, k'-major
    """
    xv = xph_ref[...]

    # Build the im2col matrix with contiguous lane slices only:
    #   px[(k', c), i] = x_pad[c, nphase*i + k']
    #                  = xph[(k' % nphase)*cin + c, i + k' // nphase]
    for kp in range(nkp):
        r = kp % nphase
        j = kp // nphase
        px_ref[kp * cin:(kp + 1) * cin, :] = xv[r * cin:(r + 1) * cin,
                                                j:j + patch_w]

    w = w_ref[...]
    b = b_ref[...]

    def conv_at(koff):
        # Conv outputs at one output parity: contract rows k' = koff..koff+K-1.
        p = px_ref[koff * cin:(koff + ktaps) * cin, :]
        y = jnp.dot(w, p, preferred_element_type=jnp.float32) + b
        if apply_act:
            y = jnp.where(y >= 0.0, y, LEAKY_SLOPE * y)
        return y

    if pool_half is None:                      # stage without a following pool
        o_ref[...] = conv_at(0)[:, :out_len].astype(o_ref.dtype)
        return

    # Even / odd conv-output phases (the following MaxPool has stride 2).
    ev = conv_at(0)                            # conv_out[2*i]
    od = conv_at(odd_off)                      # conv_out[2*i + 1]
    neg = jnp.full((ev.shape[0], 1), -jnp.inf, dtype=jnp.float32)
    if pad_e_right:
        ev = jnp.concatenate([ev, neg], axis=1)   # pool right pad (-inf)
    od = jnp.concatenate([neg, od], axis=1)       # pool left pad (-inf)

    def running_max(v):
        # After the loop: v[:, i] = max(v_in[:, i : i + pool_half])
        win = 1
        while win < pool_half:
            v = jnp.maximum(v[:, :-win], v[:, win:])
            win *= 2
        return v

    pooled = jnp.maximum(running_max(ev)[:, :out_len],
                         running_max(od)[:, :out_len])
    o_ref[...] = pooled.astype(o_ref.dtype)


# ------------------------------- wrapper ---------------------------------

def fused_stage(x, w, b, *, stride, pool_win=None, apply_act=True,
                conv_pad=1, pool_stride=2, pool_pad=1):
    """x: (N, cin, L) f32;  w: (cout, cin, K) (BN already folded);  b: (cout,)."""
    N, cin, L = x.shape
    cout, _, K = w.shape
    Lc = (L + 2 * conv_pad - K) // stride + 1

    if pool_win is None:
        nphase = stride
        nkp = K
        patch_w = Lc
        out_len = Lc
        odd_off = 0
        pool_half = None
        pad_e_right = 0
    else:
        assert pool_stride == 2 and pool_pad == 1
        pool_half = pool_win // 2
        assert pool_half & (pool_half - 1) == 0, "pool window/2 must be pow2"
        nphase = 2 * stride
        nkp = K + stride
        odd_off = stride
        patch_w = (Lc + 1) // 2
        out_len = (Lc + 2 * pool_pad - pool_win) // pool_stride + 1
        # Static safety checks for the even/odd pool decomposition:
        assert out_len + pool_half - 3 <= (Lc - 2) // 2            # odd phase
        pad_e_right = max(0, out_len + pool_half - 1 - patch_w)    # even phase
        assert pad_e_right in (0, 1)
        if pad_e_right:
            assert Lc % 2 == 0   # the extra -inf column is exactly the pool pad

    m_ph = patch_w + (nkp - 1) // nphase
    right_pad = nphase * m_ph - L - conv_pad
    assert right_pad >= conv_pad     # the conv's real right zero-pad is included

    # Phase-decompose the zero-padded input: a cheap, same-size relayout in XLA.
    xp = jnp.pad(x, ((0, 0), (0, 0), (conv_pad, right_pad)))
    xph = xp.reshape(N, cin, m_ph, nphase)
    xph = jnp.transpose(xph, (0, 3, 1, 2)).reshape(N, nphase * cin, m_ph)
    xph = xph.astype(jnp.float32)

    # Conv weights flattened k-major / cin-minor (matches the im2col rows).
    w_flat = jnp.transpose(w, (0, 2, 1)).reshape(cout, K * cin)
    w_flat = w_flat.astype(jnp.float32)
    b_col = b.reshape(cout, 1).astype(jnp.float32)

    kernel = functools.partial(
        _fused_stage_kernel, cin=cin, nphase=nphase, nkp=nkp, ktaps=K,
        patch_w=patch_w, odd_off=odd_off, pool_half=pool_half,
        out_len=out_len, pad_e_right=pad_e_right, apply_act=apply_act)

    return pl.pallas_call(
        kernel,
        out_shape=jax.ShapeDtypeStruct((N, cout, out_len), jnp.float32),
        grid=(N,),
        in_specs=[
            pl.BlockSpec((None, nphase * cin, m_ph), lambda n: (n, 0, 0)),
            pl.BlockSpec((cout, K * cin), lambda n: (0, 0)),
            pl.BlockSpec((cout, 1), lambda n: (0, 0)),
        ],
        out_specs=pl.BlockSpec((None, cout, out_len), lambda n: (n, 0, 0)),
        scratch_shapes=[pltpu.VMEM((nkp * cin, patch_w), jnp.float32)],
        compiler_params=pltpu.CompilerParams(
            dimension_semantics=("parallel",)),
    )(xph, w_flat, b_col)


def fold_bn(w, b, gamma, beta, mean, var):
    """Fold eval-mode BatchNorm into the conv weight / bias."""
    scale = gamma / jnp.sqrt(var + BN_EPS)
    return w * scale[:, None, None], (b - mean) * scale + beta


# --------------------------- parameter init ------------------------------

def _xavier_uniform(key, shape):  # shape = (C_out, C_in, K)
    fan_in = shape[1] * shape[2]
    fan_out = shape[0] * shape[2]
    bound = math.sqrt(6.0 / (fan_in + fan_out))
    return jax.random.uniform(key, shape, jnp.float32, -bound, bound)


def _bias_init(key, shape, fan_in):
    bound = 1.0 / math.sqrt(fan_in)
    return jax.random.uniform(key, shape, jnp.float32, -bound, bound)


def init_params(key):
    k = jax.random.split(key, 6)
    p = {}
    # conv1: Conv1d(1, 16, kernel=64, stride=3, padding=1), xavier_uniform
    p["w1"] = _xavier_uniform(k[0], (16, 1, 64))
    p["b1"] = _bias_init(k[1], (16,), 1 * 64)
    p["g1"] = jnp.ones((16,), jnp.float32)
    p["be1"] = jnp.zeros((16,), jnp.float32)
    p["m1"] = jnp.zeros((16,), jnp.float32)
    p["v1"] = jnp.ones((16,), jnp.float32)
    # conv2: Conv1d(16, 32, kernel=32, stride=2, padding=1), xavier_uniform
    p["w2"] = _xavier_uniform(k[2], (32, 16, 32))
    p["b2"] = _bias_init(k[3], (32,), 16 * 32)
    p["g2"] = jnp.ones((32,), jnp.float32)
    p["be2"] = jnp.zeros((32,), jnp.float32)
    p["m2"] = jnp.zeros((32,), jnp.float32)
    p["v2"] = jnp.ones((32,), jnp.float32)
    # conv3: Conv1d(32, 128, kernel=32, stride=2, padding=1)
    p["w3"] = _xavier_uniform(k[4], (128, 32, 32))
    p["b3"] = _bias_init(k[5], (128,), 32 * 32)
    return p


# ----------------------------- forward pass ------------------------------

def downsample_fft_full(params, x):
    # x: (N, 1, L)
    w1, b1 = fold_bn(params["w1"], params["b1"], params["g1"], params["be1"],
                     params["m1"], params["v1"])
    w2, b2 = fold_bn(params["w2"], params["b2"], params["g2"], params["be2"],
                     params["m2"], params["v2"])

    # stage 1: conv1(1->16, K=64, S=3, pad=1) + BN + LeakyReLU + pool(64, 2, 1)
    x = fused_stage(x, w1, b1, stride=3, pool_win=64)
    # dropout(0.15): identity in inference.  TODO(synk): training-mode dropout.

    # stage 2: conv2(16->32, K=32, S=2, pad=1) + BN + LeakyReLU + pool(32, 2, 1)
    x = fused_stage(x, w2, b2, stride=2, pool_win=32)
    # dropout(0.15): identity in inference.

    # stage 3: conv3(32->128, K=32, S=2, pad=1), no BN / activation / pool
    x = fused_stage(x, params["w3"], params["b3"], stride=2, pool_win=None,
                    apply_act=False)
    return x


if __name__ == "__main__":
    key = jax.random.PRNGKey(0)
    kx, kp = jax.random.split(key)
    params = init_params(kp)

    L = 2048                      # smallest round length that survives 5 downsamples
    x = jax.random.normal(kx, (2, 1, L), dtype=jnp.float32)

    fwd = jax.jit(functools.partial(downsample_fft_full, params))
    y = jax.block_until_ready(fwd(x))

    # expected: conv1 -> 663, pool1 -> 301, conv2 -> 136, pool2 -> 54, conv3 -> 13
    assert y.shape == (2, 128, 13), y.shape
    assert bool(jnp.all(jnp.isfinite(y)))
    print("KERNEL_OK")
</pallas_src>

<mosaic_0001>
module attributes {stable_mosaic.version = 11 : i64} {
  func.func @_fused_stage_kernel(%arg0: i32, %arg1: memref<1x6x343xf32, #tpu.memory_space<vmem>>, %arg2: memref<16x64xf32, #tpu.memory_space<vmem>>, %arg3: memref<16x1xf32, #tpu.memory_space<vmem>>, %arg4: memref<1x16x301xf32, #tpu.memory_space<vmem>>, %arg5: memref<67x332xf32, #tpu.memory_space<vmem>>) attributes {dimension_semantics = [#tpu.dimension_semantics<parallel>], iteration_bounds = array<i64: 2>, scalar_prefetch = 0 : i64, scratch_operands = 1 : i64, tpu.core_type = #tpu.core_type<tc>, window_params = [{transform_indices = @transform_0, window_bounds = array<i64: 1, 6, 343>}, {pipeline_mode = #tpu.pipeline_mode<synchronous>, transform_indices = @transform_1, window_bounds = array<i64: 16, 64>}, {pipeline_mode = #tpu.pipeline_mode<synchronous>, transform_indices = @transform_2, window_bounds = array<i64: 16, 1>}, {transform_indices = @transform_3, window_bounds = array<i64: 1, 16, 301>}]} {
    %c0 = arith.constant 0 : index
    %c0_0 = arith.constant 0 : index
    %c0_1 = arith.constant 0 : index
    %0 = vector.load %arg1[%c0, %c0_0, %c0_1] : memref<1x6x343xf32, #tpu.memory_space<vmem>>, vector<1x6x343xf32>
    %1 = vector.shape_cast %0 : vector<1x6x343xf32> to vector<6x343xf32>
    %2 = vector.extract_strided_slice %1 {offsets = [0, 0], sizes = [1, 332], strides = [1, 1]} : vector<6x343xf32> to vector<1x332xf32>
    %c0_2 = arith.constant 0 : index
    %c0_3 = arith.constant 0 : index
    %3 = vector.load %arg5[%c0_2, %c0_3] : memref<67x332xf32, #tpu.memory_space<vmem>>, vector<1x332xf32>
    tpu.vector_store %arg5[%c0_2, %c0_3], %2 {strides = array<i32>} : memref<67x332xf32, #tpu.memory_space<vmem>>, vector<1x332xf32>,
    %4 = vector.extract_strided_slice %1 {offsets = [1, 0], sizes = [1, 332], strides = [1, 1]} : vector<6x343xf32> to vector<1x332xf32>
    %c1 = arith.constant 1 : index
    %c0_4 = arith.constant 0 : index
    %5 = vector.load %arg5[%c1, %c0_4] : memref<67x332xf32, #tpu.memory_space<vmem>>, vector<1x332xf32>
    tpu.vector_store %arg5[%c1, %c0_4], %4 {strides = array<i32>} : memref<67x332xf32, #tpu.memory_space<vmem>>, vector<1x332xf32>,
    %6 = vector.extract_strided_slice %1 {offsets = [2, 0], sizes = [1, 332], strides = [1, 1]} : vector<6x343xf32> to vector<1x332xf32>
    %c2 = arith.constant 2 : index
    %c0_5 = arith.constant 0 : index
    %7 = vector.load %arg5[%c2, %c0_5] : memref<67x332xf32, #tpu.memory_space<vmem>>, vector<1x332xf32>
    tpu.vector_store %arg5[%c2, %c0_5], %6 {strides = array<i32>} : memref<67x332xf32, #tpu.memory_space<vmem>>, vector<1x332xf32>,
    %8 = vector.extract_strided_slice %1 {offsets = [3, 0], sizes = [1, 332], strides = [1, 1]} : vector<6x343xf32> to vector<1x332xf32>
    %c3 = arith.constant 3 : index
    %c0_6 = arith.constant 0 : index
    %9 = vector.load %arg5[%c3, %c0_6] : memref<67x332xf32, #tpu.memory_space<vmem>>, vector<1x332xf32>
    tpu.vector_store %arg5[%c3, %c0_6], %8 {strides = array<i32>} : memref<67x332xf32, #tpu.memory_space<vmem>>, vector<1x332xf32>,
    %10 = vector.extract_strided_slice %1 {offsets = [4, 0], sizes = [1, 332], strides = [1, 1]} : vector<6x343xf32> to vector<1x332xf32>
    %c4 = arith.constant 4 : index
    %c0_7 = arith.constant 0 : index
    %11 = vector.load %arg5[%c4, %c0_7] : memref<67x332xf32, #tpu.memory_space<vmem>>, vector<1x332xf32>
    tpu.vector_store %arg5[%c4, %c0_7], %10 {strides = array<i32>} : memref<67x332xf32, #tpu.memory_space<vmem>>, vector<1x332xf32>,
    %12 = vector.extract_strided_slice %1 {offsets = [5, 0], sizes = [1, 332], strides = [1, 1]} : vector<6x343xf32> to vector<1x332xf32>
    %c5 = arith.constant 5 : index
    %c0_8 = arith.constant 0 : index
    %13 = vector.load %arg5[%c5, %c0_8] : memref<67x332xf32, #tpu.memory_space<vmem>>, vector<1x332xf32>
    tpu.vector_store %arg5[%c5, %c0_8], %12 {strides = array<i32>} : memref<67x332xf32, #tpu.memory_space<vmem>>, vector<1x332xf32>,
    %14 = vector.extract_strided_slice %1 {offsets = [0, 1], sizes = [1, 332], strides = [1, 1]} : vector<6x343xf32> to vector<1x332xf32>
    %c6 = arith.constant 6 : index
    %c0_9 = arith.constant 0 : index
    %15 = vector.load %arg5[%c6, %c0_9] : memref<67x332xf32, #tpu.memory_space<vmem>>, vector<1x332xf32>
    tpu.vector_store %arg5[%c6, %c0_9], %14 {strides = array<i32>} : memref<67x332xf32, #tpu.memory_space<vmem>>, vector<1x332xf32>,
    %16 = vector.extract_strided_slice %1 {offsets = [1, 1], sizes = [1, 332], strides = [1, 1]} : vector<6x343xf32> to vector<1x332xf32>
    %c7 = arith.constant 7 : index
    %c0_10 = arith.constant 0 : index
    %17 = vector.load %arg5[%c7, %c0_10] : memref<67x332xf32, #tpu.memory_space<vmem>>, vector<1x332xf32>
    tpu.vector_store %arg5[%c7, %c0_10], %16 {strides = array<i32>} : memref<67x332xf32, #tpu.memory_space<vmem>>, vector<1x332xf32>,
    %18 = vector.extract_strided_slice %1 {offsets = [2, 1], sizes = [1, 332], strides = [1, 1]} : vector<6x343xf32> to vector<1x332xf32>
    %c8 = arith.constant 8 : index
    %c0_11 = arith.constant 0 : index
    %19 = vector.load %arg5[%c8, %c0_11] : memref<67x332xf32, #tpu.memory_space<vmem>>, vector<1x332xf32>
    tpu.vector_store %arg5[%c8, %c0_11], %18 {strides = array<i32>} : memref<67x332xf32, #tpu.memory_space<vmem>>, vector<1x332xf32>,
    %20 = vector.extract_strided_slice %1 {offsets = [3, 1], sizes = [1, 332], strides = [1, 1]} : vector<6x343xf32> to vector<1x332xf32>
    %c9 = arith.constant 9 : index
    %c0_12 = arith.constant 0 : index
    %21 = vector.load %arg5[%c9, %c0_12] : memref<67x332xf32, #tpu.memory_space<vmem>>, vector<1x332xf32>
    tpu.vector_store %arg5[%c9, %c0_12], %20 {strides = array<i32>} : memref<67x332xf32, #tpu.memory_space<vmem>>, vector<1x332xf32>,
    %22 = vector.extract_strided_slice %1 {offsets = [4, 1], sizes = [1, 332], strides = [1, 1]} : vector<6x343xf32> to vector<1x332xf32>
    %c10 = arith.constant 10 : index
    %c0_13 = arith.constant 0 : index
    %23 = vector.load %arg5[%c10, %c0_13] : memref<67x332xf32, #tpu.memory_space<vmem>>, vector<1x332xf32>
    tpu.vector_store %arg5[%c10, %c0_13], %22 {strides = array<i32>} : memref<67x332xf32, #tpu.memory_space<vmem>>, vector<1x332xf32>,
    %24 = vector.extract_strided_slice %1 {offsets = [5, 1], sizes = [1, 332], strides = [1, 1]} : vector<6x343xf32> to vector<1x332xf32>
    %c11 = arith.constant 11 : index
    %c0_14 = arith.constant 0 : index
    %25 = vector.load %arg5[%c11, %c0_14] : memref<67x332xf32, #tpu.memory_space<vmem>>, vector<1x332xf32>
    tpu.vector_store %arg5[%c11, %c0_14], %24 {strides = array<i32>} : memref<67x332xf32, #tpu.memory_space<vmem>>, vector<1x332xf32>,
    %26 = vector.extract_strided_slice %1 {offsets = [0, 2], sizes = [1, 332], strides = [1, 1]} : vector<6x343xf32> to vector<1x332xf32>
    %c12 = arith.constant 12 : index
    %c0_15 = arith.constant 0 : index
    %27 = vector.load %arg5[%c12, %c0_15] : memref<67x332xf32, #tpu.memory_space<vmem>>, vector<1x332xf32>
    tpu.vector_store %arg5[%c12, %c0_15], %26 {strides = array<i32>} : memref<67x332xf32, #tpu.memory_space<vmem>>, vector<1x332xf32>,
    %28 = vector.extract_strided_slice %1 {offsets = [1, 2], sizes = [1, 332], strides = [1, 1]} : vector<6x343xf32> to vector<1x332xf32>
    %c13 = arith.constant 13 : index
    %c0_16 = arith.constant 0 : index
    %29 = vector.load %arg5[%c13, %c0_16] : memref<67x332xf32, #tpu.memory_space<vmem>>, vector<1x332xf32>
    tpu.vector_store %arg5[%c13, %c0_16], %28 {strides = array<i32>} : memref<67x332xf32, #tpu.memory_space<vmem>>, vector<1x332xf32>,
    %30 = vector.extract_strided_slice %1 {offsets = [2, 2], sizes = [1, 332], strides = [1, 1]} : vector<6x343xf32> to vector<1x332xf32>
    %c14 = arith.constant 14 : index
    %c0_17 = arith.constant 0 : index
    %31 = vector.load %arg5[%c14, %c0_17] : memref<67x332xf32, #tpu.memory_space<vmem>>, vector<1x332xf32>
    tpu.vector_store %arg5[%c14, %c0_17], %30 {strides = array<i32>} : memref<67x332xf32, #tpu.memory_space<vmem>>, vector<1x332xf32>,
    %32 = vector.extract_strided_slice %1 {offsets = [3, 2], sizes = [1, 332], strides = [1, 1]} : vector<6x343xf32> to vector<1x332xf32>
    %c15 = arith.constant 15 : index
    %c0_18 = arith.constant 0 : index
    %33 = vector.load %arg5[%c15, %c0_18] : memref<67x332xf32, #tpu.memory_space<vmem>>, vector<1x332xf32>
    tpu.vector_store %arg5[%c15, %c0_18], %32 {strides = array<i32>} : memref<67x332xf32, #tpu.memory_space<vmem>>, vector<1x332xf32>,
    %34 = vector.extract_strided_slice %1 {offsets = [4, 2], sizes = [1, 332], strides = [1, 1]} : vector<6x343xf32> to vector<1x332xf32>
    %c16 = arith.constant 16 : index
    %c0_19 = arith.constant 0 : index
    %35 = vector.load %arg5[%c16, %c0_19] : memref<67x332xf32, #tpu.memory_space<vmem>>, vector<1x332xf32>
    tpu.vector_store %arg5[%c16, %c0_19], %34 {strides = array<i32>} : memref<67x332xf32, #tpu.memory_space<vmem>>, vector<1x332xf32>,
    %36 = vector.extract_strided_slice %1 {offsets = [5, 2], sizes = [1, 332], strides = [1, 1]} : vector<6x343xf32> to vector<1x332xf32>
    %c17 = arith.constant 17 : index
    %c0_20 = arith.constant 0 : index
    %37 = vector.load %arg5[%c17, %c0_20] : memref<67x332xf32, #tpu.memory_space<vmem>>, vector<1x332xf32>
    tpu.vector_store %arg5[%c17, %c0_20], %36 {strides = array<i32>} : memref<67x332xf32, #tpu.memory_space<vmem>>, vector<1x332xf32>,
    %38 = vector.extract_strided_slice %1 {offsets = [0, 3], sizes = [1, 332], strides = [1, 1]} : vector<6x343xf32> to vector<1x332xf32>
    %c18 = arith.constant 18 : index
    %c0_21 = arith.constant 0 : index
    %39 = vector.load %arg5[%c18, %c0_21] : memref<67x332xf32, #tpu.memory_space<vmem>>, vector<1x332xf32>
    tpu.vector_store %arg5[%c18, %c0_21], %38 {strides = array<i32>} : memref<67x332xf32, #tpu.memory_space<vmem>>, vector<1x332xf32>,
    %40 = vector.extract_strided_slice %1 {offsets = [1, 3], sizes = [1, 332], strides = [1, 1]} : vector<6x343xf32> to vector<1x332xf32>
    %c19 = arith.constant 19 : index
    %c0_22 = arith.constant 0 : index
    %41 = vector.load %arg5[%c19, %c0_22] : memref<67x332xf32, #tpu.memory_space<vmem>>, vector<1x332xf32>
    tpu.vector_store %arg5[%c19, %c0_22], %40 {strides = array<i32>} : memref<67x332xf32, #tpu.memory_space<vmem>>, vector<1x332xf32>,
    %42 = vector.extract_strided_slice %1 {offsets = [2, 3], sizes = [1, 332], strides = [1, 1]} : vector<6x343xf32> to vector<1x332xf32>
    %c20 = arith.constant 20 : index
    %c0_23 = arith.constant 0 : index
    %43 = vector.load %arg5[%c20, %c0_23] : memref<67x332xf32, #tpu.memory_space<vmem>>, vector<1x332xf32>
    tpu.vector_store %arg5[%c20, %c0_23], %42 {strides = array<i32>} : memref<67x332xf32, #tpu.memory_space<vmem>>, vector<1x332xf32>,
    %44 = vector.extract_strided_slice %1 {offsets = [3, 3], sizes = [1, 332], strides = [1, 1]} : vector<6x343xf32> to vector<1x332xf32>
    %c21 = arith.constant 21 : index
    %c0_24 = arith.constant 0 : index
    %45 = vector.load %arg5[%c21, %c0_24] : memref<67x332xf32, #tpu.memory_space<vmem>>, vector<1x332xf32>
    tpu.vector_store %arg5[%c21, %c0_24], %44 {strides = array<i32>} : memref<67x332xf32, #tpu.memory_space<vmem>>, vector<1x332xf32>,
    %46 = vector.extract_strided_slice %1 {offsets = [4, 3], sizes = [1, 332], strides = [1, 1]} : vector<6x343xf32> to vector<1x332xf32>
    %c22 = arith.constant 22 : index
    %c0_25 = arith.constant 0 : index
    %47 = vector.load %arg5[%c22, %c0_25] : memref<67x332xf32, #tpu.memory_space<vmem>>, vector<1x332xf32>
    tpu.vector_store %arg5[%c22, %c0_25], %46 {strides = array<i32>} : memref<67x332xf32, #tpu.memory_space<vmem>>, vector<1x332xf32>,
    %48 = vector.extract_strided_slice %1 {offsets = [5, 3], sizes = [1, 332], strides = [1, 1]} : vector<6x343xf32> to vector<1x332xf32>
    %c23 = arith.constant 23 : index
    %c0_26 = arith.constant 0 : index
    %49 = vector.load %arg5[%c23, %c0_26] : memref<67x332xf32, #tpu.memory_space<vmem>>, vector<1x332xf32>
    tpu.vector_store %arg5[%c23, %c0_26], %48 {strides = array<i32>} : memref<67x332xf32, #tpu.memory_space<vmem>>, vector<1x332xf32>,
    %50 = vector.extract_strided_slice %1 {offsets = [0, 4], sizes = [1, 332], strides = [1, 1]} : vector<6x343xf32> to vector<1x332xf32>
    %c24 = arith.constant 24 : index
    %c0_27 = arith.constant 0 : index
    %51 = vector.load %arg5[%c24, %c0_27] : memref<67x332xf32, #tpu.memory_space<vmem>>, vector<1x332xf32>
    tpu.vector_store %arg5[%c24, %c0_27], %50 {strides = array<i32>} : memref<67x332xf32, #tpu.memory_space<vmem>>, vector<1x332xf32>,
    %52 = vector.extract_strided_slice %1 {offsets = [1, 4], sizes = [1, 332], strides = [1, 1]} : vector<6x343xf32> to vector<1x332xf32>
    %c25 = arith.constant 25 : index
    %c0_28 = arith.constant 0 : index
    %53 = vector.load %arg5[%c25, %c0_28] : memref<67x332xf32, #tpu.memory_space<vmem>>, vector<1x332xf32>
    tpu.vector_store %arg5[%c25, %c0_28], %52 {strides = array<i32>} : memref<67x332xf32, #tpu.memory_space<vmem>>, vector<1x332xf32>,
    %54 = vector.extract_strided_slice %1 {offsets = [2, 4], sizes = [1, 332], strides = [1, 1]} : vector<6x343xf32> to vector<1x332xf32>
    %c26 = arith.constant 26 : index
    %c0_29 = arith.constant 0 : index
    %55 = vector.load %arg5[%c26, %c0_29] : memref<67x332xf32, #tpu.memory_space<vmem>>, vector<1x332xf32>
    tpu.vector_store %arg5[%c26, %c0_29], %54 {strides = array<i32>} : memref<67x332xf32, #tpu.memory_space<vmem>>, vector<1x332xf32>,
    %56 = vector.extract_strided_slice %1 {offsets = [3, 4], sizes = [1, 332], strides = [1, 1]} : vector<6x343xf32> to vector<1x332xf32>
    %c27 = arith.constant 27 : index
    %c0_30 = arith.constant 0 : index
    %57 = vector.load %arg5[%c27, %c0_30] : memref<67x332xf32, #tpu.memory_space<vmem>>, vector<1x332xf32>
    tpu.vector_store %arg5[%c27, %c0_30], %56 {strides = array<i32>} : memref<67x332xf32, #tpu.memory_space<vmem>>, vector<1x332xf32>,
    %58 = vector.extract_strided_slice %1 {offsets = [4, 4], sizes = [1, 332], strides = [1, 1]} : vector<6x343xf32> to vector<1x332xf32>
    %c28 = arith.constant 28 : index
    %c0_31 = arith.constant 0 : index
    %59 = vector.load %arg5[%c28, %c0_31] : memref<67x332xf32, #tpu.memory_space<vmem>>, vector<1x332xf32>
    tpu.vector_store %arg5[%c28, %c0_31], %58 {strides = array<i32>} : memref<67x332xf32, #tpu.memory_space<vmem>>, vector<1x332xf32>,
    %60 = vector.extract_strided_slice %1 {offsets = [5, 4], sizes = [1, 332], strides = [1, 1]} : vector<6x343xf32> to vector<1x332xf32>
    %c29 = arith.constant 29 : index
    %c0_32 = arith.constant 0 : index
    %61 = vector.load %arg5[%c29, %c0_32] : memref<67x332xf32, #tpu.memory_space<vmem>>, vector<1x332xf32>
    tpu.vector_store %arg5[%c29, %c0_32], %60 {strides = array<i32>} : memref<67x332xf32, #tpu.memory_space<vmem>>, vector<1x332xf32>,
    %62 = vector.extract_strided_slice %1 {offsets = [0, 5], sizes = [1, 332], strides = [1, 1]} : vector<6x343xf32> to vector<1x332xf32>
    %c30 = arith.constant 30 : index
    %c0_33 = arith.constant 0 : index
    %63 = vector.load %arg5[%c30, %c0_33] : memref<67x332xf32, #tpu.memory_space<vmem>>, vector<1x332xf32>
    tpu.vector_store %arg5[%c30, %c0_33], %62 {strides = array<i32>} : memref<67x332xf32, #tpu.memory_space<vmem>>, vector<1x332xf32>,
    %64 = vector.extract_strided_slice %1 {offsets = [1, 5], sizes = [1, 332], strides = [1, 1]} : vector<6x343xf32> to vector<1x332xf32>
    %c31 = arith.constant 31 : index
    %c0_34 = arith.constant 0 : index
    %65 = vector.load %arg5[%c31, %c0_34] : memref<67x332xf32, #tpu.memory_space<vmem>>, vector<1x332xf32>
    tpu.vector_store %arg5[%c31, %c0_34], %64 {strides = array<i32>} : memref<67x332xf32, #tpu.memory_space<vmem>>, vector<1x332xf32>,
    %66 = vector.extract_strided_slice %1 {offsets = [2, 5], sizes = [1, 332], strides = [1, 1]} : vector<6x343xf32> to vector<1x332xf32>
    %c32 = arith.constant 32 : index
    %c0_35 = arith.constant 0 : index
    %67 = vector.load %arg5[%c32, %c0_35] : memref<67x332xf32, #tpu.memory_space<vmem>>, vector<1x332xf32>
    tpu.vector_store %arg5[%c32, %c0_35], %66 {strides = array<i32>} : memref<67x332xf32, #tpu.memory_space<vmem>>, vector<1x332xf32>,
    %68 = vector.extract_strided_slice %1 {offsets = [3, 5], sizes = [1, 332], strides = [1, 1]} : vector<6x343xf32> to vector<1x332xf32>
    %c33 = arith.constant 33 : index
    %c0_36 = arith.constant 0 : index
    %69 = vector.load %arg5[%c33, %c0_36] : memref<67x332xf32, #tpu.memory_space<vmem>>, vector<1x332xf32>
    tpu.vector_store %arg5[%c33, %c0_36], %68 {strides = array<i32>} : memref<67x332xf32, #tpu.memory_space<vmem>>, vector<1x332xf32>,
    %70 = vector.extract_strided_slice %1 {offsets = [4, 5], sizes = [1, 332], strides = [1, 1]} : vector<6x343xf32> to vector<1x332xf32>
    %c34 = arith.constant 34 : index
    %c0_37 = arith.constant 0 : index
    %71 = vector.load %arg5[%c34, %c0_37] : memref<67x332xf32, #tpu.memory_space<vmem>>, vector<1x332xf32>
    tpu.vector_store %arg5[%c34, %c0_37], %70 {strides = array<i32>} : memref<67x332xf32, #tpu.memory_space<vmem>>, vector<1x332xf32>,
    %72 = vector.extract_strided_slice %1 {offsets = [5, 5], sizes = [1, 332], strides = [1, 1]} : vector<6x343xf32> to vector<1x332xf32>
    %c35 = arith.constant 35 : index
    %c0_38 = arith.constant 0 : index
    %73 = vector.load %arg5[%c35, %c0_38] : memref<67x332xf32, #tpu.memory_space<vmem>>, vector<1x332xf32>
    tpu.vector_store %arg5[%c35, %c0_38], %72 {strides = array<i32>} : memref<67x332xf32, #tpu.memory_space<vmem>>, vector<1x332xf32>,
    %74 = vector.extract_strided_slice %1 {offsets = [0, 6], sizes = [1, 332], strides = [1, 1]} : vector<6x343xf32> to vector<1x332xf32>
    %c36 = arith.constant 36 : index
    %c0_39 = arith.constant 0 : index
    %75 = vector.load %arg5[%c36, %c0_39] : memref<67x332xf32, #tpu.memory_space<vmem>>, vector<1x332xf32>
    tpu.vector_store %arg5[%c36, %c0_39], %74 {strides = array<i32>} : memref<67x332xf32, #tpu.memory_space<vmem>>, vector<1x332xf32>,
    %76 = vector.extract_strided_slice %1 {offsets = [1, 6], sizes = [1, 332], strides = [1, 1]} : vector<6x343xf32> to vector<1x332xf32>
    %c37 = arith.constant 37 : index
    %c0_40 = arith.constant 0 : index
    %77 = vector.load %arg5[%c37, %c0_40] : memref<67x332xf32, #tpu.memory_space<vmem>>, vector<1x332xf32>
    tpu.vector_store %arg5[%c37, %c0_40], %76 {strides = array<i32>} : memref<67x332xf32, #tpu.memory_space<vmem>>, vector<1x332xf32>,
    %78 = vector.extract_strided_slice %1 {offsets = [2, 6], sizes = [1, 332], strides = [1, 1]} : vector<6x343xf32> to vector<1x332xf32>
    %c38 = arith.constant 38 : index
    %c0_41 = arith.constant 0 : index
    %79 = vector.load %arg5[%c38, %c0_41] : memref<67x332xf32, #tpu.memory_space<vmem>>, vector<1x332xf32>
    tpu.vector_store %arg5[%c38, %c0_41], %78 {strides = array<i32>} : memref<67x332xf32, #tpu.memory_space<vmem>>, vector<1x332xf32>,
    %80 = vector.extract_strided_slice %1 {offsets = [3, 6], sizes = [1, 332], strides = [1, 1]} : vector<6x343xf32> to vector<1x332xf32>
    %c39 = arith.constant 39 : index
    %c0_42 = arith.constant 0 : index
    %81 = vector.load %arg5[%c39, %c0_42] : memref<67x332xf32, #tpu.memory_space<vmem>>, vector<1x332xf32>
    tpu.vector_store %arg5[%c39, %c0_42], %80 {strides = array<i32>} : memref<67x332xf32, #tpu.memory_space<vmem>>, vector<1x332xf32>,
    %82 = vector.extract_strided_slice %1 {offsets = [4, 6], sizes = [1, 332], strides = [1, 1]} : vector<6x343xf32> to vector<1x332xf32>
    %c40 = arith.constant 40 : index
    %c0_43 = arith.constant 0 : index
    %83 = vector.load %arg5[%c40, %c0_43] : memref<67x332xf32, #tpu.memory_space<vmem>>, vector<1x332xf32>
    tpu.vector_store %arg5[%c40, %c0_43], %82 {strides = array<i32>} : memref<67x332xf32, #tpu.memory_space<vmem>>, vector<1x332xf32>,
    %84 = vector.extract_strided_slice %1 {offsets = [5, 6], sizes = [1, 332], strides = [1, 1]} : vector<6x343xf32> to vector<1x332xf32>
    %c41 = arith.constant 41 : index
    %c0_44 = arith.constant 0 : index
    %85 = vector.load %arg5[%c41, %c0_44] : memref<67x332xf32, #tpu.memory_space<vmem>>, vector<1x332xf32>
    tpu.vector_store %arg5[%c41, %c0_44], %84 {strides = array<i32>} : memref<67x332xf32, #tpu.memory_space<vmem>>, vector<1x332xf32>,
    %86 = vector.extract_strided_slice %1 {offsets = [0, 7], sizes = [1, 332], strides = [1, 1]} : vector<6x343xf32> to vector<1x332xf32>
    %c42 = arith.constant 42 : index
    %c0_45 = arith.constant 0 : index
    %87 = vector.load %arg5[%c42, %c0_45] : memref<67x332xf32, #tpu.memory_space<vmem>>, vector<1x332xf32>
    tpu.vector_store %arg5[%c42, %c0_45], %86 {strides = array<i32>} : memref<67x332xf32, #tpu.memory_space<vmem>>, vector<1x332xf32>,
    %88 = vector.extract_strided_slice %1 {offsets = [1, 7], sizes = [1, 332], strides = [1, 1]} : vector<6x343xf32> to vector<1x332xf32>
    %c43 = arith.constant 43 : index
    %c0_46 = arith.constant 0 : index
    %89 = vector.load %arg5[%c43, %c0_46] : memref<67x332xf32, #tpu.memory_space<vmem>>, vector<1x332xf32>
    tpu.vector_store %arg5[%c43, %c0_46], %88 {strides = array<i32>} : memref<67x332xf32, #tpu.memory_space<vmem>>, vector<1x332xf32>,
    %90 = vector.extract_strided_slice %1 {offsets = [2, 7], sizes = [1, 332], strides = [1, 1]} : vector<6x343xf32> to vector<1x332xf32>
    %c44 = arith.constant 44 : index
    %c0_47 = arith.constant 0 : index
    %91 = vector.load %arg5[%c44, %c0_47] : memref<67x332xf32, #tpu.memory_space<vmem>>, vector<1x332xf32>
    tpu.vector_store %arg5[%c44, %c0_47], %90 {strides = array<i32>} : memref<67x332xf32, #tpu.memory_space<vmem>>, vector<1x332xf32>,
    %92 = vector.extract_strided_slice %1 {offsets = [3, 7], sizes = [1, 332], strides = [1, 1]} : vector<6x343xf32> to vector<1x332xf32>
    %c45 = arith.constant 45 : index
    %c0_48 = arith.constant 0 : index
    %93 = vector.load %arg5[%c45, %c0_48] : memref<67x332xf32, #tpu.memory_space<vmem>>, vector<1x332xf32>
    tpu.vector_store %arg5[%c45, %c0_48], %92 {strides = array<i32>} : memref<67x332xf32, #tpu.memory_space<vmem>>, vector<1x332xf32>,
    %94 = vector.extract_strided_slice %1 {offsets = [4, 7], sizes = [1, 332], strides = [1, 1]} : vector<6x343xf32> to vector<1x332xf32>
    %c46 = arith.constant 46 : index
    %c0_49 = arith.constant 0 : index
    %95 = vector.load %arg5[%c46, %c0_49] : memref<67x332xf32, #tpu.memory_space<vmem>>, vector<1x332xf32>
    tpu.vector_store %arg5[%c46, %c0_49], %94 {strides = array<i32>} : memref<67x332xf32, #tpu.memory_space<vmem>>, vector<1x332xf32>,
    %96 = vector.extract_strided_slice %1 {offsets = [5, 7], sizes = [1, 332], strides = [1, 1]} : vector<6x343xf32> to vector<1x332xf32>
    %c47 = arith.constant 47 : index
    %c0_50 = arith.constant 0 : index
    %97 = vector.load %arg5[%c47, %c0_50] : memref<67x332xf32, #tpu.memory_space<vmem>>, vector<1x332xf32>
    tpu.vector_store %arg5[%c47, %c0_50], %96 {strides = array<i32>} : memref<67x332xf32, #tpu.memory_space<vmem>>, vector<1x332xf32>,
    %98 = vector.extract_strided_slice %1 {offsets = [0, 8], sizes = [1, 332], strides = [1, 1]} : vector<6x343xf32> to vector<1x332xf32>
    %c48 = arith.constant 48 : index
    %c0_51 = arith.constant 0 : index
    %99 = vector.load %arg5[%c48, %c0_51] : memref<67x332xf32, #tpu.memory_space<vmem>>, vector<1x332xf32>
    tpu.vector_store %arg5[%c48, %c0_51], %98 {strides = array<i32>} : memref<67x332xf32, #tpu.memory_space<vmem>>, vector<1x332xf32>,
    %100 = vector.extract_strided_slice %1 {offsets = [1, 8], sizes = [1, 332], strides = [1, 1]} : vector<6x343xf32> to vector<1x332xf32>
    %c49 = arith.constant 49 : index
    %c0_52 = arith.constant 0 : index
    %101 = vector.load %arg5[%c49, %c0_52] : memref<67x332xf32, #tpu.memory_space<vmem>>, vector<1x332xf32>
    tpu.vector_store %arg5[%c49, %c0_52], %100 {strides = array<i32>} : memref<67x332xf32, #tpu.memory_space<vmem>>, vector<1x332xf32>,
    %102 = vector.extract_strided_slice %1 {offsets = [2, 8], sizes = [1, 332], strides = [1, 1]} : vector<6x343xf32> to vector<1x332xf32>
    %c50 = arith.constant 50 : index
    %c0_53 = arith.constant 0 : index
    %103 = vector.load %arg5[%c50, %c0_53] : memref<67x332xf32, #tpu.memory_space<vmem>>, vector<1x332xf32>
    tpu.vector_store %arg5[%c50, %c0_53], %102 {strides = array<i32>} : memref<67x332xf32, #tpu.memory_space<vmem>>, vector<1x332xf32>,
    %104 = vector.extract_strided_slice %1 {offsets = [3, 8], sizes = [1, 332], strides = [1, 1]} : vector<6x343xf32> to vector<1x332xf32>
    %c51 = arith.constant 51 : index
    %c0_54 = arith.constant 0 : index
    %105 = vector.load %arg5[%c51, %c0_54] : memref<67x332xf32, #tpu.memory_space<vmem>>, vector<1x332xf32>
    tpu.vector_store %arg5[%c51, %c0_54], %104 {strides = array<i32>} : memref<67x332xf32, #tpu.memory_space<vmem>>, vector<1x332xf32>,
    %106 = vector.extract_strided_slice %1 {offsets = [4, 8], sizes = [1, 332], strides = [1, 1]} : vector<6x343xf32> to vector<1x332xf32>
    %c52 = arith.constant 52 : index
    %c0_55 = arith.constant 0 : index
    %107 = vector.load %arg5[%c52, %c0_55] : memref<67x332xf32, #tpu.memory_space<vmem>>, vector<1x332xf32>
    tpu.vector_store %arg5[%c52, %c0_55], %106 {strides = array<i32>} : memref<67x332xf32, #tpu.memory_space<vmem>>, vector<1x332xf32>,
    %108 = vector.extract_strided_slice %1 {offsets = [5, 8], sizes = [1, 332], strides = [1, 1]} : vector<6x343xf32> to vector<1x332xf32>
    %c53 = arith.constant 53 : index
    %c0_56 = arith.constant 0 : index
    %109 = vector.load %arg5[%c53, %c0_56] : memref<67x332xf32, #tpu.memory_space<vmem>>, vector<1x332xf32>
    tpu.vector_store %arg5[%c53, %c0_56], %108 {strides = array<i32>} : memref<67x332xf32, #tpu.memory_space<vmem>>, vector<1x332xf32>,
    %110 = vector.extract_strided_slice %1 {offsets = [0, 9], sizes = [1, 332], strides = [1, 1]} : vector<6x343xf32> to vector<1x332xf32>
    %c54 = arith.constant 54 : index
    %c0_57 = arith.constant 0 : index
    %111 = vector.load %arg5[%c54, %c0_57] : memref<67x332xf32, #tpu.memory_space<vmem>>, vector<1x332xf32>
    tpu.vector_store %arg5[%c54, %c0_57], %110 {strides = array<i32>} : memref<67x332xf32, #tpu.memory_space<vmem>>, vector<1x332xf32>,
    %112 = vector.extract_strided_slice %1 {offsets = [1, 9], sizes = [1, 332], strides = [1, 1]} : vector<6x343xf32> to vector<1x332xf32>
    %c55 = arith.constant 55 : index
    %c0_58 = arith.constant 0 : index
    %113 = vector.load %arg5[%c55, %c0_58] : memref<67x332xf32, #tpu.memory_space<vmem>>, vector<1x332xf32>
    tpu.vector_store %arg5[%c55, %c0_58], %112 {strides = array<i32>} : memref<67x332xf32, #tpu.memory_space<vmem>>, vector<1x332xf32>,
    %114 = vector.extract_strided_slice %1 {offsets = [2, 9], sizes = [1, 332], strides = [1, 1]} : vector<6x343xf32> to vector<1x332xf32>
    %c56 = arith.constant 56 : index
    %c0_59 = arith.constant 0 : index
    %115 = vector.load %arg5[%c56, %c0_59] : memref<67x332xf32, #tpu.memory_space<vmem>>, vector<1x332xf32>
    tpu.vector_store %arg5[%c56, %c0_59], %114 {strides = array<i32>} : memref<67x332xf32, #tpu.memory_space<vmem>>, vector<1x332xf32>,
    %116 = vector.extract_strided_slice %1 {offsets = [3, 9], sizes = [1, 332], strides = [1, 1]} : vector<6x343xf32> to vector<1x332xf32>
    %c57 = arith.constant 57 : index
    %c0_60 = arith.constant 0 : index
    %117 = vector.load %arg5[%c57, %c0_60] : memref<67x332xf32, #tpu.memory_space<vmem>>, vector<1x332xf32>
    tpu.vector_store %arg5[%c57, %c0_60], %116 {strides = array<i32>} : memref<67x332xf32, #tpu.memory_space<vmem>>, vector<1x332xf32>,
    %118 = vector.extract_strided_slice %1 {offsets = [4, 9], sizes = [1, 332], strides = [1, 1]} : vector<6x343xf32> to vector<1x332xf32>
    %c58 = arith.constant 58 : index
    %c0_61 = arith.constant 0 : index
    %119 = vector.load %arg5[%c58, %c0_61] : memref<67x332xf32, #tpu.memory_space<vmem>>, vector<1x332xf32>
    tpu.vector_store %arg5[%c58, %c0_61], %118 {strides = array<i32>} : memref<67x332xf32, #tpu.memory_space<vmem>>, vector<1x332xf32>,
    %120 = vector.extract_strided_slice %1 {offsets = [5, 9], sizes = [1, 332], strides = [1, 1]} : vector<6x343xf32> to vector<1x332xf32>
    %c59 = arith.constant 59 : index
    %c0_62 = arith.constant 0 : index
    %121 = vector.load %arg5[%c59, %c0_62] : memref<67x332xf32, #tpu.memory_space<vmem>>, vector<1x332xf32>
    tpu.vector_store %arg5[%c59, %c0_62], %120 {strides = array<i32>} : memref<67x332xf32, #tpu.memory_space<vmem>>, vector<1x332xf32>,
    %122 = vector.extract_strided_slice %1 {offsets = [0, 10], sizes = [1, 332], strides = [1, 1]} : vector<6x343xf32> to vector<1x332xf32>
    %c60 = arith.constant 60 : index
    %c0_63 = arith.constant 0 : index
    %123 = vector.load %arg5[%c60, %c0_63] : memref<67x332xf32, #tpu.memory_space<vmem>>, vector<1x332xf32>
    tpu.vector_store %arg5[%c60, %c0_63], %122 {strides = array<i32>} : memref<67x332xf32, #tpu.memory_space<vmem>>, vector<1x332xf32>,
    %124 = vector.extract_strided_slice %1 {offsets = [1, 10], sizes = [1, 332], strides = [1, 1]} : vector<6x343xf32> to vector<1x332xf32>
    %c61 = arith.constant 61 : index
    %c0_64 = arith.constant 0 : index
    %125 = vector.load %arg5[%c61, %c0_64] : memref<67x332xf32, #tpu.memory_space<vmem>>, vector<1x332xf32>
    tpu.vector_store %arg5[%c61, %c0_64], %124 {strides = array<i32>} : memref<67x332xf32, #tpu.memory_space<vmem>>, vector<1x332xf32>,
    %126 = vector.extract_strided_slice %1 {offsets = [2, 10], sizes = [1, 332], strides = [1, 1]} : vector<6x343xf32> to vector<1x332xf32>
    %c62 = arith.constant 62 : index
    %c0_65 = arith.constant 0 : index
    %127 = vector.load %arg5[%c62, %c0_65] : memref<67x332xf32, #tpu.memory_space<vmem>>, vector<1x332xf32>
    tpu.vector_store %arg5[%c62, %c0_65], %126 {strides = array<i32>} : memref<67x332xf32, #tpu.memory_space<vmem>>, vector<1x332xf32>,
    %128 = vector.extract_strided_slice %1 {offsets = [3, 10], sizes = [1, 332], strides = [1, 1]} : vector<6x343xf32> to vector<1x332xf32>
    %c63 = arith.constant 63 : index
    %c0_66 = arith.constant 0 : index
    %129 = vector.load %arg5[%c63, %c0_66] : memref<67x332xf32, #tpu.memory_space<vmem>>, vector<1x332xf32>
    tpu.vector_store %arg5[%c63, %c0_66], %128 {strides = array<i32>} : memref<67x332xf32, #tpu.memory_space<vmem>>, vector<1x332xf32>,
    %130 = vector.extract_strided_slice %1 {offsets = [4, 10], sizes = [1, 332], strides = [1, 1]} : vector<6x343xf32> to vector<1x332xf32>
    %c64 = arith.constant 64 : index
    %c0_67 = arith.constant 0 : index
    %131 = vector.load %arg5[%c64, %c0_67] : memref<67x332xf32, #tpu.memory_space<vmem>>, vector<1x332xf32>
    tpu.vector_store %arg5[%c64, %c0_67], %130 {strides = array<i32>} : memref<67x332xf32, #tpu.memory_space<vmem>>, vector<1x332xf32>,
    %132 = vector.extract_strided_slice %1 {offsets = [5, 10], sizes = [1, 332], strides = [1, 1]} : vector<6x343xf32> to vector<1x332xf32>
    %c65 = arith.constant 65 : index
    %c0_68 = arith.constant 0 : index
    %133 = vector.load %arg5[%c65, %c0_68] : memref<67x332xf32, #tpu.memory_space<vmem>>, vector<1x332xf32>
    tpu.vector_store %arg5[%c65, %c0_68], %132 {strides = array<i32>} : memref<67x332xf32, #tpu.memory_space<vmem>>, vector<1x332xf32>,
    %134 = vector.extract_strided_slice %1 {offsets = [0, 11], sizes = [1, 332], strides = [1, 1]} : vector<6x343xf32> to vector<1x332xf32>
    %c66 = arith.constant 66 : index
    %c0_69 = arith.constant 0 : index
    %135 = vector.load %arg5[%c66, %c0_69] : memref<67x332xf32, #tpu.memory_space<vmem>>, vector<1x332xf32>
    tpu.vector_store %arg5[%c66, %c0_69], %134 {strides = array<i32>} : memref<67x332xf32, #tpu.memory_space<vmem>>, vector<1x332xf32>,
    %c0_70 = arith.constant 0 : index
    %c0_71 = arith.constant 0 : index
    %136 = vector.load %arg2[%c0_70, %c0_71] : memref<16x64xf32, #tpu.memory_space<vmem>>, vector<16x64xf32>
    %c0_72 = arith.constant 0 : index
    %c0_73 = arith.constant 0 : index
    %137 = vector.load %arg3[%c0_72, %c0_73] : memref<16x1xf32, #tpu.memory_space<vmem>>, vector<16x1xf32>
    %c0_74 = arith.constant 0 : index
    %c0_75 = arith.constant 0 : index
    %138 = vector.load %arg5[%c0_74, %c0_75] : memref<67x332xf32, #tpu.memory_space<vmem>>, vector<64x332xf32>
    %cst = arith.constant dense<0.000000e+00> : vector<16x332xf32>
    %139 = tpu.matmul %136, %138, %cst {dimension_numbers = #tpu.dot_dimension_numbers<[1], [0], [0], [1], [0, 0, 1, 1], [], []>} : vector<16x64xf32>, vector<64x332xf32>, vector<16x332xf32> -> vector<16x332xf32>
    %140 = vector.broadcast %137 : vector<16x1xf32> to vector<16x332xf32>
    %141 = arith.addf %139, %140 : vector<16x332xf32>
    %cst_76 = arith.constant 0.000000e+00 : f32
    %142 = vector.broadcast %cst_76 : f32 to vector<16x332xf32>
    %143 = arith.cmpf oge, %141, %142 : vector<16x332xf32>
    %cst_77 = arith.constant 2.000000e-02 : f32
    %144 = vector.broadcast %cst_77 : f32 to vector<16x332xf32>
    %145 = arith.mulf %144, %141 : vector<16x332xf32>
    %146 = arith.select %143, %141, %145 : vector<16x332xi1>, vector<16x332xf32>
    %c3_78 = arith.constant 3 : index
    %c0_79 = arith.constant 0 : index
    %147 = vector.load %arg5[%c3_78, %c0_79] : memref<67x332xf32, #tpu.memory_space<vmem>>, vector<64x332xf32>
    %cst_80 = arith.constant dense<0.000000e+00> : vector<16x332xf32>
    %148 = tpu.matmul %136, %147, %cst_80 {dimension_numbers = #tpu.dot_dimension_numbers<[1], [0], [0], [1], [0, 0, 1, 1], [], []>} : vector<16x64xf32>, vector<64x332xf32>, vector<16x332xf32> -> vector<16x332xf32>
    %149 = vector.broadcast %137 : vector<16x1xf32> to vector<16x332xf32>
    %150 = arith.addf %148, %149 : vector<16x332xf32>
    %cst_81 = arith.constant 0.000000e+00 : f32
    %151 = vector.broadcast %cst_81 : f32 to vector<16x332xf32>
    %152 = arith.cmpf oge, %150, %151 : vector<16x332xf32>
    %cst_82 = arith.constant 2.000000e-02 : f32
    %153 = vector.broadcast %cst_82 : f32 to vector<16x332xf32>
    %154 = arith.mulf %153, %150 : vector<16x332xf32>
    %155 = arith.select %152, %150, %154 : vector<16x332xi1>, vector<16x332xf32>
    %cst_83 = arith.constant 0xFF800000 : f32
    %156 = vector.broadcast %cst_83 : f32 to vector<16x1xf32>
    %157 = tpu.concatenate %156, %155 in 1 : vector<16x1xf32>, vector<16x332xf32> -> vector<16x333xf32>
    %158 = vector.extract_strided_slice %146 {offsets = [0, 0], sizes = [16, 331], strides = [1, 1]} : vector<16x332xf32> to vector<16x331xf32>
    %159 = vector.extract_strided_slice %146 {offsets = [0, 1], sizes = [16, 331], strides = [1, 1]} : vector<16x332xf32> to vector<16x331xf32>
    %160 = arith.maximumf %158, %159 : vector<16x331xf32>
    %161 = vector.extract_strided_slice %160 {offsets = [0, 0], sizes = [16, 329], strides = [1, 1]} : vector<16x331xf32> to vector<16x329xf32>
    %162 = vector.extract_strided_slice %160 {offsets = [0, 2], sizes = [16, 329], strides = [1, 1]} : vector<16x331xf32> to vector<16x329xf32>
    %163 = arith.maximumf %161, %162 : vector<16x329xf32>
    %164 = vector.extract_strided_slice %163 {offsets = [0, 0], sizes = [16, 325], strides = [1, 1]} : vector<16x329xf32> to vector<16x325xf32>
    %165 = vector.extract_strided_slice %163 {offsets = [0, 4], sizes = [16, 325], strides = [1, 1]} : vector<16x329xf32> to vector<16x325xf32>
    %166 = arith.maximumf %164, %165 : vector<16x325xf32>
    %167 = vector.extract_strided_slice %166 {offsets = [0, 0], sizes = [16, 317], strides = [1, 1]} : vector<16x325xf32> to vector<16x317xf32>
    %168 = vector.extract_strided_slice %166 {offsets = [0, 8], sizes = [16, 317], strides = [1, 1]} : vector<16x325xf32> to vector<16x317xf32>
    %169 = arith.maximumf %167, %168 : vector<16x317xf32>
    %170 = vector.extract_strided_slice %169 {offsets = [0, 0], sizes = [16, 301], strides = [1, 1]} : vector<16x317xf32> to vector<16x301xf32>
    %171 = vector.extract_strided_slice %169 {offsets = [0, 16], sizes = [16, 301], strides = [1, 1]} : vector<16x317xf32> to vector<16x301xf32>
    %172 = arith.maximumf %170, %171 : vector<16x301xf32>
    %173 = vector.extract_strided_slice %157 {offsets = [0, 0], sizes = [16, 332], strides = [1, 1]} : vector<16x333xf32> to vector<16x332xf32>
    %174 = vector.extract_strided_slice %157 {offsets = [0, 1], sizes = [16, 332], strides = [1, 1]} : vector<16x333xf32> to vector<16x332xf32>
    %175 = arith.maximumf %173, %174 : vector<16x332xf32>
    %176 = vector.extract_strided_slice %175 {offsets = [0, 0], sizes = [16, 330], strides = [1, 1]} : vector<16x332xf32> to vector<16x330xf32>
    %177 = vector.extract_strided_slice %175 {offsets = [0, 2], sizes = [16, 330], strides = [1, 1]} : vector<16x332xf32> to vector<16x330xf32>
    %178 = arith.maximumf %176, %177 : vector<16x330xf32>
    %179 = vector.extract_strided_slice %178 {offsets = [0, 0], sizes = [16, 326], strides = [1, 1]} : vector<16x330xf32> to vector<16x326xf32>
    %180 = vector.extract_strided_slice %178 {offsets = [0, 4], sizes = [16, 326], strides = [1, 1]} : vector<16x330xf32> to vector<16x326xf32>
    %181 = arith.maximumf %179, %180 : vector<16x326xf32>
    %182 = vector.extract_strided_slice %181 {offsets = [0, 0], sizes = [16, 318], strides = [1, 1]} : vector<16x326xf32> to vector<16x318xf32>
    %183 = vector.extract_strided_slice %181 {offsets = [0, 8], sizes = [16, 318], strides = [1, 1]} : vector<16x326xf32> to vector<16x318xf32>
    %184 = arith.maximumf %182, %183 : vector<16x318xf32>
    %185 = vector.extract_strided_slice %184 {offsets = [0, 0], sizes = [16, 302], strides = [1, 1]} : vector<16x318xf32> to vector<16x302xf32>
    %186 = vector.extract_strided_slice %184 {offsets = [0, 16], sizes = [16, 302], strides = [1, 1]} : vector<16x318xf32> to vector<16x302xf32>
    %187 = arith.maximumf %185, %186 : vector<16x302xf32>
    %188 = vector.extract_strided_slice %187 {offsets = [0, 0], sizes = [16, 301], strides = [1, 1]} : vector<16x302xf32> to vector<16x301xf32>
    %189 = arith.maximumf %172, %188 : vector<16x301xf32>
    %c0_84 = arith.constant 0 : index
    %c0_85 = arith.constant 0 : index
    %c0_86 = arith.constant 0 : index
    %190 = vector.load %arg4[%c0_84, %c0_85, %c0_86] : memref<1x16x301xf32, #tpu.memory_space<vmem>>, vector<1x16x301xf32>
    %191 = vector.shape_cast %190 : vector<1x16x301xf32> to vector<16x301xf32>
    %192 = vector.shape_cast %189 : vector<16x301xf32> to vector<1x16x301xf32>
    tpu.vector_store %arg4[%c0_84, %c0_85, %c0_86], %192 {strides = array<i32>} : memref<1x16x301xf32, #tpu.memory_space<vmem>>, vector<1x16x301xf32>,
    return
  }
  func.func @transform_0(%arg0: i32) -> (i32, i32, i32) {
    %c0_i32 = arith.constant 0 : i32
    %c0_i32_0 = arith.constant 0 : i32
    %c0_i32_1 = arith.constant 0 : i32
    return %arg0, %c0_i32, %c0_i32_0 : i32, i32, i32
  }
  func.func @transform_1(%arg0: i32) -> (i32, i32) {
    %c0_i32 = arith.constant 0 : i32
    %c0_i32_0 = arith.constant 0 : i32
    %c0_i32_1 = arith.constant 0 : i32
    return %c0_i32, %c0_i32_0 : i32, i32
  }
  func.func @transform_2(%arg0: i32) -> (i32, i32) {
    %c0_i32 = arith.constant 0 : i32
    %c0_i32_0 = arith.constant 0 : i32
    %c0_i32_1 = arith.constant 0 : i32
    return %c0_i32, %c0_i32_0 : i32, i32
  }
  func.func @transform_3(%arg0: i32) -> (i32, i32, i32) {
    %c0_i32 = arith.constant 0 : i32
    %c0_i32_0 = arith.constant 0 : i32
    %c0_i32_1 = arith.constant 0 : i32
    return %arg0, %c0_i32, %c0_i32_0 : i32, i32, i32
  }
}

module attributes {stable_mosaic.version = 11 : i64} {
  func.func @_fused_stage_kernel(%arg0: i32, %arg1: memref<1x64x76xf32, #tpu.memory_space<vmem>>, %arg2: memref<32x512xf32, #tpu.memory_space<vmem>>, %arg3: memref<32x1xf32, #tpu.memory_space<vmem>>, %arg4: memref<1x32x54xf32, #tpu.memory_space<vmem>>, %arg5: memref<544x68xf32, #tpu.memory_space<vmem>>) attributes {dimension_semantics = [#tpu.dimension_semantics<parallel>], iteration_bounds = array<i64: 2>, scalar_prefetch = 0 : i64, scratch_operands = 1 : i64, tpu.core_type = #tpu.core_type<tc>, window_params = [{transform_indices = @transform_0, window_bounds = array<i64: 1, 64, 76>}, {pipeline_mode = #tpu.pipeline_mode<synchronous>, transform_indices = @transform_1, window_bounds = array<i64: 32, 512>}, {pipeline_mode = #tpu.pipeline_mode<synchronous>, transform_indices = @transform_2, window_bounds = array<i64: 32, 1>}, {transform_indices = @transform_3, window_bounds = array<i64: 1, 32, 54>}]} {
    %c0 = arith.constant 0 : index
    %c0_0 = arith.constant 0 : index
    %c0_1 = arith.constant 0 : index
    %0 = vector.load %arg1[%c0, %c0_0, %c0_1] : memref<1x64x76xf32, #tpu.memory_space<vmem>>, vector<1x64x76xf32>
    %1 = vector.shape_cast %0 : vector<1x64x76xf32> to vector<64x76xf32>
    %2 = vector.extract_strided_slice %1 {offsets = [0, 0], sizes = [16, 68], strides = [1, 1]} : vector<64x76xf32> to vector<16x68xf32>
    %c0_2 = arith.constant 0 : index
    %c0_3 = arith.constant 0 : index
    %3 = vector.load %arg5[%c0_2, %c0_3] : memref<544x68xf32, #tpu.memory_space<vmem>>, vector<16x68xf32>
    tpu.vector_store %arg5[%c0_2, %c0_3], %2 {strides = array<i32>} : memref<544x68xf32, #tpu.memory_space<vmem>>, vector<16x68xf32>,
    %4 = vector.extract_strided_slice %1 {offsets = [16, 0], sizes = [16, 68], strides = [1, 1]} : vector<64x76xf32> to vector<16x68xf32>
    %c16 = arith.constant 16 : index
    %c0_4 = arith.constant 0 : index
    %5 = vector.load %arg5[%c16, %c0_4] : memref<544x68xf32, #tpu.memory_space<vmem>>, vector<16x68xf32>
    tpu.vector_store %arg5[%c16, %c0_4], %4 {strides = array<i32>} : memref<544x68xf32, #tpu.memory_space<vmem>>, vector<16x68xf32>,
    %6 = vector.extract_strided_slice %1 {offsets = [32, 0], sizes = [16, 68], strides = [1, 1]} : vector<64x76xf32> to vector<16x68xf32>
    %c32 = arith.constant 32 : index
    %c0_5 = arith.constant 0 : index
    %7 = vector.load %arg5[%c32, %c0_5] : memref<544x68xf32, #tpu.memory_space<vmem>>, vector<16x68xf32>
    tpu.vector_store %arg5[%c32, %c0_5], %6 {strides = array<i32>} : memref<544x68xf32, #tpu.memory_space<vmem>>, vector<16x68xf32>,
    %8 = vector.extract_strided_slice %1 {offsets = [48, 0], sizes = [16, 68], strides = [1, 1]} : vector<64x76xf32> to vector<16x68xf32>
    %c48 = arith.constant 48 : index
    %c0_6 = arith.constant 0 : index
    %9 = vector.load %arg5[%c48, %c0_6] : memref<544x68xf32, #tpu.memory_space<vmem>>, vector<16x68xf32>
    tpu.vector_store %arg5[%c48, %c0_6], %8 {strides = array<i32>} : memref<544x68xf32, #tpu.memory_space<vmem>>, vector<16x68xf32>,
    %10 = vector.extract_strided_slice %1 {offsets = [0, 1], sizes = [16, 68], strides = [1, 1]} : vector<64x76xf32> to vector<16x68xf32>
    %c64 = arith.constant 64 : index
    %c0_7 = arith.constant 0 : index
    %11 = vector.load %arg5[%c64, %c0_7] : memref<544x68xf32, #tpu.memory_space<vmem>>, vector<16x68xf32>
    tpu.vector_store %arg5[%c64, %c0_7], %10 {strides = array<i32>} : memref<544x68xf32, #tpu.memory_space<vmem>>, vector<16x68xf32>,
    %12 = vector.extract_strided_slice %1 {offsets = [16, 1], sizes = [16, 68], strides = [1, 1]} : vector<64x76xf32> to vector<16x68xf32>
    %c80 = arith.constant 80 : index
    %c0_8 = arith.constant 0 : index
    %13 = vector.load %arg5[%c80, %c0_8] : memref<544x68xf32, #tpu.memory_space<vmem>>, vector<16x68xf32>
    tpu.vector_store %arg5[%c80, %c0_8], %12 {strides = array<i32>} : memref<544x68xf32, #tpu.memory_space<vmem>>, vector<16x68xf32>,
    %14 = vector.extract_strided_slice %1 {offsets = [32, 1], sizes = [16, 68], strides = [1, 1]} : vector<64x76xf32> to vector<16x68xf32>
    %c96 = arith.constant 96 : index
    %c0_9 = arith.constant 0 : index
    %15 = vector.load %arg5[%c96, %c0_9] : memref<544x68xf32, #tpu.memory_space<vmem>>, vector<16x68xf32>
    tpu.vector_store %arg5[%c96, %c0_9], %14 {strides = array<i32>} : memref<544x68xf32, #tpu.memory_space<vmem>>, vector<16x68xf32>,
    %16 = vector.extract_strided_slice %1 {offsets = [48, 1], sizes = [16, 68], strides = [1, 1]} : vector<64x76xf32> to vector<16x68xf32>
    %c112 = arith.constant 112 : index
    %c0_10 = arith.constant 0 : index
    %17 = vector.load %arg5[%c112, %c0_10] : memref<544x68xf32, #tpu.memory_space<vmem>>, vector<16x68xf32>
    tpu.vector_store %arg5[%c112, %c0_10], %16 {strides = array<i32>} : memref<544x68xf32, #tpu.memory_space<vmem>>, vector<16x68xf32>,
    %18 = vector.extract_strided_slice %1 {offsets = [0, 2], sizes = [16, 68], strides = [1, 1]} : vector<64x76xf32> to vector<16x68xf32>
    %c128 = arith.constant 128 : index
    %c0_11 = arith.constant 0 : index
    %19 = vector.load %arg5[%c128, %c0_11] : memref<544x68xf32, #tpu.memory_space<vmem>>, vector<16x68xf32>
    tpu.vector_store %arg5[%c128, %c0_11], %18 {strides = array<i32>} : memref<544x68xf32, #tpu.memory_space<vmem>>, vector<16x68xf32>,
    %20 = vector.extract_strided_slice %1 {offsets = [16, 2], sizes = [16, 68], strides = [1, 1]} : vector<64x76xf32> to vector<16x68xf32>
    %c144 = arith.constant 144 : index
    %c0_12 = arith.constant 0 : index
    %21 = vector.load %arg5[%c144, %c0_12] : memref<544x68xf32, #tpu.memory_space<vmem>>, vector<16x68xf32>
    tpu.vector_store %arg5[%c144, %c0_12], %20 {strides = array<i32>} : memref<544x68xf32, #tpu.memory_space<vmem>>, vector<16x68xf32>,
    %22 = vector.extract_strided_slice %1 {offsets = [32, 2], sizes = [16, 68], strides = [1, 1]} : vector<64x76xf32> to vector<16x68xf32>
    %c160 = arith.constant 160 : index
    %c0_13 = arith.constant 0 : index
    %23 = vector.load %arg5[%c160, %c0_13] : memref<544x68xf32, #tpu.memory_space<vmem>>, vector<16x68xf32>
    tpu.vector_store %arg5[%c160, %c0_13], %22 {strides = array<i32>} : memref<544x68xf32, #tpu.memory_space<vmem>>, vector<16x68xf32>,
    %24 = vector.extract_strided_slice %1 {offsets = [48, 2], sizes = [16, 68], strides = [1, 1]} : vector<64x76xf32> to vector<16x68xf32>
    %c176 = arith.constant 176 : index
    %c0_14 = arith.constant 0 : index
    %25 = vector.load %arg5[%c176, %c0_14] : memref<544x68xf32, #tpu.memory_space<vmem>>, vector<16x68xf32>
    tpu.vector_store %arg5[%c176, %c0_14], %24 {strides = array<i32>} : memref<544x68xf32, #tpu.memory_space<vmem>>, vector<16x68xf32>,
    %26 = vector.extract_strided_slice %1 {offsets = [0, 3], sizes = [16, 68], strides = [1, 1]} : vector<64x76xf32> to vector<16x68xf32>
    %c192 = arith.constant 192 : index
    %c0_15 = arith.constant 0 : index
    %27 = vector.load %arg5[%c192, %c0_15] : memref<544x68xf32, #tpu.memory_space<vmem>>, vector<16x68xf32>
    tpu.vector_store %arg5[%c192, %c0_15], %26 {strides = array<i32>} : memref<544x68xf32, #tpu.memory_space<vmem>>, vector<16x68xf32>,
    %28 = vector.extract_strided_slice %1 {offsets = [16, 3], sizes = [16, 68], strides = [1, 1]} : vector<64x76xf32> to vector<16x68xf32>
    %c208 = arith.constant 208 : index
    %c0_16 = arith.constant 0 : index
    %29 = vector.load %arg5[%c208, %c0_16] : memref<544x68xf32, #tpu.memory_space<vmem>>, vector<16x68xf32>
    tpu.vector_store %arg5[%c208, %c0_16], %28 {strides = array<i32>} : memref<544x68xf32, #tpu.memory_space<vmem>>, vector<16x68xf32>,
    %30 = vector.extract_strided_slice %1 {offsets = [32, 3], sizes = [16, 68], strides = [1, 1]} : vector<64x76xf32> to vector<16x68xf32>
    %c224 = arith.constant 224 : index
    %c0_17 = arith.constant 0 : index
    %31 = vector.load %arg5[%c224, %c0_17] : memref<544x68xf32, #tpu.memory_space<vmem>>, vector<16x68xf32>
    tpu.vector_store %arg5[%c224, %c0_17], %30 {strides = array<i32>} : memref<544x68xf32, #tpu.memory_space<vmem>>, vector<16x68xf32>,
    %32 = vector.extract_strided_slice %1 {offsets = [48, 3], sizes = [16, 68], strides = [1, 1]} : vector<64x76xf32> to vector<16x68xf32>
    %c240 = arith.constant 240 : index
    %c0_18 = arith.constant 0 : index
    %33 = vector.load %arg5[%c240, %c0_18] : memref<544x68xf32, #tpu.memory_space<vmem>>, vector<16x68xf32>
    tpu.vector_store %arg5[%c240, %c0_18], %32 {strides = array<i32>} : memref<544x68xf32, #tpu.memory_space<vmem>>, vector<16x68xf32>,
    %34 = vector.extract_strided_slice %1 {offsets = [0, 4], sizes = [16, 68], strides = [1, 1]} : vector<64x76xf32> to vector<16x68xf32>
    %c256 = arith.constant 256 : index
    %c0_19 = arith.constant 0 : index
    %35 = vector.load %arg5[%c256, %c0_19] : memref<544x68xf32, #tpu.memory_space<vmem>>, vector<16x68xf32>
    tpu.vector_store %arg5[%c256, %c0_19], %34 {strides = array<i32>} : memref<544x68xf32, #tpu.memory_space<vmem>>, vector<16x68xf32>,
    %36 = vector.extract_strided_slice %1 {offsets = [16, 4], sizes = [16, 68], strides = [1, 1]} : vector<64x76xf32> to vector<16x68xf32>
    %c272 = arith.constant 272 : index
    %c0_20 = arith.constant 0 : index
    %37 = vector.load %arg5[%c272, %c0_20] : memref<544x68xf32, #tpu.memory_space<vmem>>, vector<16x68xf32>
    tpu.vector_store %arg5[%c272, %c0_20], %36 {strides = array<i32>} : memref<544x68xf32, #tpu.memory_space<vmem>>, vector<16x68xf32>,
    %38 = vector.extract_strided_slice %1 {offsets = [32, 4], sizes = [16, 68], strides = [1, 1]} : vector<64x76xf32> to vector<16x68xf32>
    %c288 = arith.constant 288 : index
    %c0_21 = arith.constant 0 : index
    %39 = vector.load %arg5[%c288, %c0_21] : memref<544x68xf32, #tpu.memory_space<vmem>>, vector<16x68xf32>
    tpu.vector_store %arg5[%c288, %c0_21], %38 {strides = array<i32>} : memref<544x68xf32, #tpu.memory_space<vmem>>, vector<16x68xf32>,
    %40 = vector.extract_strided_slice %1 {offsets = [48, 4], sizes = [16, 68], strides = [1, 1]} : vector<64x76xf32> to vector<16x68xf32>
    %c304 = arith.constant 304 : index
    %c0_22 = arith.constant 0 : index
    %41 = vector.load %arg5[%c304, %c0_22] : memref<544x68xf32, #tpu.memory_space<vmem>>, vector<16x68xf32>
    tpu.vector_store %arg5[%c304, %c0_22], %40 {strides = array<i32>} : memref<544x68xf32, #tpu.memory_space<vmem>>, vector<16x68xf32>,
    %42 = vector.extract_strided_slice %1 {offsets = [0, 5], sizes = [16, 68], strides = [1, 1]} : vector<64x76xf32> to vector<16x68xf32>
    %c320 = arith.constant 320 : index
    %c0_23 = arith.constant 0 : index
    %43 = vector.load %arg5[%c320, %c0_23] : memref<544x68xf32, #tpu.memory_space<vmem>>, vector<16x68xf32>
    tpu.vector_store %arg5[%c320, %c0_23], %42 {strides = array<i32>} : memref<544x68xf32, #tpu.memory_space<vmem>>, vector<16x68xf32>,
    %44 = vector.extract_strided_slice %1 {offsets = [16, 5], sizes = [16, 68], strides = [1, 1]} : vector<64x76xf32> to vector<16x68xf32>
    %c336 = arith.constant 336 : index
    %c0_24 = arith.constant 0 : index
    %45 = vector.load %arg5[%c336, %c0_24] : memref<544x68xf32, #tpu.memory_space<vmem>>, vector<16x68xf32>
    tpu.vector_store %arg5[%c336, %c0_24], %44 {strides = array<i32>} : memref<544x68xf32, #tpu.memory_space<vmem>>, vector<16x68xf32>,
    %46 = vector.extract_strided_slice %1 {offsets = [32, 5], sizes = [16, 68], strides = [1, 1]} : vector<64x76xf32> to vector<16x68xf32>
    %c352 = arith.constant 352 : index
    %c0_25 = arith.constant 0 : index
    %47 = vector.load %arg5[%c352, %c0_25] : memref<544x68xf32, #tpu.memory_space<vmem>>, vector<16x68xf32>
    tpu.vector_store %arg5[%c352, %c0_25], %46 {strides = array<i32>} : memref<544x68xf32, #tpu.memory_space<vmem>>, vector<16x68xf32>,
    %48 = vector.extract_strided_slice %1 {offsets = [48, 5], sizes = [16, 68], strides = [1, 1]} : vector<64x76xf32> to vector<16x68xf32>
    %c368 = arith.constant 368 : index
    %c0_26 = arith.constant 0 : index
    %49 = vector.load %arg5[%c368, %c0_26] : memref<544x68xf32, #tpu.memory_space<vmem>>, vector<16x68xf32>
    tpu.vector_store %arg5[%c368, %c0_26], %48 {strides = array<i32>} : memref<544x68xf32, #tpu.memory_space<vmem>>, vector<16x68xf32>,
    %50 = vector.extract_strided_slice %1 {offsets = [0, 6], sizes = [16, 68], strides = [1, 1]} : vector<64x76xf32> to vector<16x68xf32>
    %c384 = arith.constant 384 : index
    %c0_27 = arith.constant 0 : index
    %51 = vector.load %arg5[%c384, %c0_27] : memref<544x68xf32, #tpu.memory_space<vmem>>, vector<16x68xf32>
    tpu.vector_store %arg5[%c384, %c0_27], %50 {strides = array<i32>} : memref<544x68xf32, #tpu.memory_space<vmem>>, vector<16x68xf32>,
    %52 = vector.extract_strided_slice %1 {offsets = [16, 6], sizes = [16, 68], strides = [1, 1]} : vector<64x76xf32> to vector<16x68xf32>
    %c400 = arith.constant 400 : index
    %c0_28 = arith.constant 0 : index
    %53 = vector.load %arg5[%c400, %c0_28] : memref<544x68xf32, #tpu.memory_space<vmem>>, vector<16x68xf32>
    tpu.vector_store %arg5[%c400, %c0_28], %52 {strides = array<i32>} : memref<544x68xf32, #tpu.memory_space<vmem>>, vector<16x68xf32>,
    %54 = vector.extract_strided_slice %1 {offsets = [32, 6], sizes = [16, 68], strides = [1, 1]} : vector<64x76xf32> to vector<16x68xf32>
    %c416 = arith.constant 416 : index
    %c0_29 = arith.constant 0 : index
    %55 = vector.load %arg5[%c416, %c0_29] : memref<544x68xf32, #tpu.memory_space<vmem>>, vector<16x68xf32>
    tpu.vector_store %arg5[%c416, %c0_29], %54 {strides = array<i32>} : memref<544x68xf32, #tpu.memory_space<vmem>>, vector<16x68xf32>,
    %56 = vector.extract_strided_slice %1 {offsets = [48, 6], sizes = [16, 68], strides = [1, 1]} : vector<64x76xf32> to vector<16x68xf32>
    %c432 = arith.constant 432 : index
    %c0_30 = arith.constant 0 : index
    %57 = vector.load %arg5[%c432, %c0_30] : memref<544x68xf32, #tpu.memory_space<vmem>>, vector<16x68xf32>
    tpu.vector_store %arg5[%c432, %c0_30], %56 {strides = array<i32>} : memref<544x68xf32, #tpu.memory_space<vmem>>, vector<16x68xf32>,
    %58 = vector.extract_strided_slice %1 {offsets = [0, 7], sizes = [16, 68], strides = [1, 1]} : vector<64x76xf32> to vector<16x68xf32>
    %c448 = arith.constant 448 : index
    %c0_31 = arith.constant 0 : index
    %59 = vector.load %arg5[%c448, %c0_31] : memref<544x68xf32, #tpu.memory_space<vmem>>, vector<16x68xf32>
    tpu.vector_store %arg5[%c448, %c0_31], %58 {strides = array<i32>} : memref<544x68xf32, #tpu.memory_space<vmem>>, vector<16x68xf32>,
    %60 = vector.extract_strided_slice %1 {offsets = [16, 7], sizes = [16, 68], strides = [1, 1]} : vector<64x76xf32> to vector<16x68xf32>
    %c464 = arith.constant 464 : index
    %c0_32 = arith.constant 0 : index
    %61 = vector.load %arg5[%c464, %c0_32] : memref<544x68xf32, #tpu.memory_space<vmem>>, vector<16x68xf32>
    tpu.vector_store %arg5[%c464, %c0_32], %60 {strides = array<i32>} : memref<544x68xf32, #tpu.memory_space<vmem>>, vector<16x68xf32>,
    %62 = vector.extract_strided_slice %1 {offsets = [32, 7], sizes = [16, 68], strides = [1, 1]} : vector<64x76xf32> to vector<16x68xf32>
    %c480 = arith.constant 480 : index
    %c0_33 = arith.constant 0 : index
    %63 = vector.load %arg5[%c480, %c0_33] : memref<544x68xf32, #tpu.memory_space<vmem>>, vector<16x68xf32>
    tpu.vector_store %arg5[%c480, %c0_33], %62 {strides = array<i32>} : memref<544x68xf32, #tpu.memory_space<vmem>>, vector<16x68xf32>,
    %64 = vector.extract_strided_slice %1 {offsets = [48, 7], sizes = [16, 68], strides = [1, 1]} : vector<64x76xf32> to vector<16x68xf32>
    %c496 = arith.constant 496 : index
    %c0_34 = arith.constant 0 : index
    %65 = vector.load %arg5[%c496, %c0_34] : memref<544x68xf32, #tpu.memory_space<vmem>>, vector<16x68xf32>
    tpu.vector_store %arg5[%c496, %c0_34], %64 {strides = array<i32>} : memref<544x68xf32, #tpu.memory_space<vmem>>, vector<16x68xf32>,
    %66 = vector.extract_strided_slice %1 {offsets = [0, 8], sizes = [16, 68], strides = [1, 1]} : vector<64x76xf32> to vector<16x68xf32>
    %c512 = arith.constant 512 : index
    %c0_35 = arith.constant 0 : index
    %67 = vector.load %arg5[%c512, %c0_35] : memref<544x68xf32, #tpu.memory_space<vmem>>, vector<16x68xf32>
    tpu.vector_store %arg5[%c512, %c0_35], %66 {strides = array<i32>} : memref<544x68xf32, #tpu.memory_space<vmem>>, vector<16x68xf32>,
    %68 = vector.extract_strided_slice %1 {offsets = [16, 8], sizes = [16, 68], strides = [1, 1]} : vector<64x76xf32> to vector<16x68xf32>
    %c528 = arith.constant 528 : index
    %c0_36 = arith.constant 0 : index
    %69 = vector.load %arg5[%c528, %c0_36] : memref<544x68xf32, #tpu.memory_space<vmem>>, vector<16x68xf32>
    tpu.vector_store %arg5[%c528, %c0_36], %68 {strides = array<i32>} : memref<544x68xf32, #tpu.memory_space<vmem>>, vector<16x68xf32>,
    %c0_37 = arith.constant 0 : index
    %c0_38 = arith.constant 0 : index
    %70 = vector.load %arg2[%c0_37, %c0_38] : memref<32x512xf32, #tpu.memory_space<vmem>>, vector<32x512xf32>
    %c0_39 = arith.constant 0 : index
    %c0_40 = arith.constant 0 : index
    %71 = vector.load %arg3[%c0_39, %c0_40] : memref<32x1xf32, #tpu.memory_space<vmem>>, vector<32x1xf32>
    %c0_41 = arith.constant 0 : index
    %c0_42 = arith.constant 0 : index
    %72 = vector.load %arg5[%c0_41, %c0_42] : memref<544x68xf32, #tpu.memory_space<vmem>>, vector<512x68xf32>
    %cst = arith.constant dense<0.000000e+00> : vector<32x68xf32>
    %73 = tpu.matmul %70, %72, %cst {dimension_numbers = #tpu.dot_dimension_numbers<[1], [0], [0], [1], [0, 0, 1, 1], [], []>} : vector<32x512xf32>, vector<512x68xf32>, vector<32x68xf32> -> vector<32x68xf32>
    %74 = vector.broadcast %71 : vector<32x1xf32> to vector<32x68xf32>
    %75 = arith.addf %73, %74 : vector<32x68xf32>
    %cst_43 = arith.constant 0.000000e+00 : f32
    %76 = vector.broadcast %cst_43 : f32 to vector<32x68xf32>
    %77 = arith.cmpf oge, %75, %76 : vector<32x68xf32>
    %cst_44 = arith.constant 2.000000e-02 : f32
    %78 = vector.broadcast %cst_44 : f32 to vector<32x68xf32>
    %79 = arith.mulf %78, %75 : vector<32x68xf32>
    %80 = arith.select %77, %75, %79 : vector<32x68xi1>, vector<32x68xf32>
    %c32_45 = arith.constant 32 : index
    %c0_46 = arith.constant 0 : index
    %81 = vector.load %arg5[%c32_45, %c0_46] : memref<544x68xf32, #tpu.memory_space<vmem>>, vector<512x68xf32>
    %cst_47 = arith.constant dense<0.000000e+00> : vector<32x68xf32>
    %82 = tpu.matmul %70, %81, %cst_47 {dimension_numbers = #tpu.dot_dimension_numbers<[1], [0], [0], [1], [0, 0, 1, 1], [], []>} : vector<32x512xf32>, vector<512x68xf32>, vector<32x68xf32> -> vector<32x68xf32>
    %83 = vector.broadcast %71 : vector<32x1xf32> to vector<32x68xf32>
    %84 = arith.addf %82, %83 : vector<32x68xf32>
    %cst_48 = arith.constant 0.000000e+00 : f32
    %85 = vector.broadcast %cst_48 : f32 to vector<32x68xf32>
    %86 = arith.cmpf oge, %84, %85 : vector<32x68xf32>
    %cst_49 = arith.constant 2.000000e-02 : f32
    %87 = vector.broadcast %cst_49 : f32 to vector<32x68xf32>
    %88 = arith.mulf %87, %84 : vector<32x68xf32>
    %89 = arith.select %86, %84, %88 : vector<32x68xi1>, vector<32x68xf32>
    %cst_50 = arith.constant 0xFF800000 : f32
    %90 = vector.broadcast %cst_50 : f32 to vector<32x1xf32>
    %91 = tpu.concatenate %80, %90 in 1 : vector<32x68xf32>, vector<32x1xf32> -> vector<32x69xf32>
    %92 = tpu.concatenate %90, %89 in 1 : vector<32x1xf32>, vector<32x68xf32> -> vector<32x69xf32>
    %93 = vector.extract_strided_slice %91 {offsets = [0, 0], sizes = [32, 68], strides = [1, 1]} : vector<32x69xf32> to vector<32x68xf32>
    %94 = vector.extract_strided_slice %91 {offsets = [0, 1], sizes = [32, 68], strides = [1, 1]} : vector<32x69xf32> to vector<32x68xf32>
    %95 = arith.maximumf %93, %94 : vector<32x68xf32>
    %96 = vector.extract_strided_slice %95 {offsets = [0, 0], sizes = [32, 66], strides = [1, 1]} : vector<32x68xf32> to vector<32x66xf32>
    %97 = vector.extract_strided_slice %95 {offsets = [0, 2], sizes = [32, 66], strides = [1, 1]} : vector<32x68xf32> to vector<32x66xf32>
    %98 = arith.maximumf %96, %97 : vector<32x66xf32>
    %99 = vector.extract_strided_slice %98 {offsets = [0, 0], sizes = [32, 62], strides = [1, 1]} : vector<32x66xf32> to vector<32x62xf32>
    %100 = vector.extract_strided_slice %98 {offsets = [0, 4], sizes = [32, 62], strides = [1, 1]} : vector<32x66xf32> to vector<32x62xf32>
    %101 = arith.maximumf %99, %100 : vector<32x62xf32>
    %102 = vector.extract_strided_slice %101 {offsets = [0, 0], sizes = [32, 54], strides = [1, 1]} : vector<32x62xf32> to vector<32x54xf32>
    %103 = vector.extract_strided_slice %101 {offsets = [0, 8], sizes = [32, 54], strides = [1, 1]} : vector<32x62xf32> to vector<32x54xf32>
    %104 = arith.maximumf %102, %103 : vector<32x54xf32>
    %105 = vector.extract_strided_slice %92 {offsets = [0, 0], sizes = [32, 68], strides = [1, 1]} : vector<32x69xf32> to vector<32x68xf32>
    %106 = vector.extract_strided_slice %92 {offsets = [0, 1], sizes = [32, 68], strides = [1, 1]} : vector<32x69xf32> to vector<32x68xf32>
    %107 = arith.maximumf %105, %106 : vector<32x68xf32>
    %108 = vector.extract_strided_slice %107 {offsets = [0, 0], sizes = [32, 66], strides = [1, 1]} : vector<32x68xf32> to vector<32x66xf32>
    %109 = vector.extract_strided_slice %107 {offsets = [0, 2], sizes = [32, 66], strides = [1, 1]} : vector<32x68xf32> to vector<32x66xf32>
    %110 = arith.maximumf %108, %109 : vector<32x66xf32>
    %111 = vector.extract_strided_slice %110 {offsets = [0, 0], sizes = [32, 62], strides = [1, 1]} : vector<32x66xf32> to vector<32x62xf32>
    %112 = vector.extract_strided_slice %110 {offsets = [0, 4], sizes = [32, 62], strides = [1, 1]} : vector<32x66xf32> to vector<32x62xf32>
    %113 = arith.maximumf %111, %112 : vector<32x62xf32>
    %114 = vector.extract_strided_slice %113 {offsets = [0, 0], sizes = [32, 54], strides = [1, 1]} : vector<32x62xf32> to vector<32x54xf32>
    %115 = vector.extract_strided_slice %113 {offsets = [0, 8], sizes = [32, 54], strides = [1, 1]} : vector<32x62xf32> to vector<32x54xf32>
    %116 = arith.maximumf %114, %115 : vector<32x54xf32>
    %117 = arith.maximumf %104, %116 : vector<32x54xf32>
    %c0_51 = arith.constant 0 : index
    %c0_52 = arith.constant 0 : index
    %c0_53 = arith.constant 0 : index
    %118 = vector.load %arg4[%c0_51, %c0_52, %c0_53] : memref<1x32x54xf32, #tpu.memory_space<vmem>>, vector<1x32x54xf32>
    %119 = vector.shape_cast %118 : vector<1x32x54xf32> to vector<32x54xf32>
    %120 = vector.shape_cast %117 : vector<32x54xf32> to vector<1x32x54xf32>
    tpu.vector_store %arg4[%c0_51, %c0_52, %c0_53], %120 {strides = array<i32>} : memref<1x32x54xf32, #tpu.memory_space<vmem>>, vector<1x32x54xf32>,
    return
  }
  func.func @transform_0(%arg0: i32) -> (i32, i32, i32) {
    %c0_i32 = arith.constant 0 : i32
    %c0_i32_0 = arith.constant 0 : i32
    %c0_i32_1 = arith.constant 0 : i32
    return %arg0, %c0_i32, %c0_i32_0 : i32, i32, i32
  }
  func.func @transform_1(%arg0: i32) -> (i32, i32) {
    %c0_i32 = arith.constant 0 : i32
    %c0_i32_0 = arith.constant 0 : i32
    %c0_i32_1 = arith.constant 0 : i32
    return %c0_i32, %c0_i32_0 : i32, i32
  }
  func.func @transform_2(%arg0: i32) -> (i32, i32) {
    %c0_i32 = arith.constant 0 : i32
    %c0_i32_0 = arith.constant 0 : i32
    %c0_i32_1 = arith.constant 0 : i32
    return %c0_i32, %c0_i32_0 : i32, i32
  }
  func.func @transform_3(%arg0: i32) -> (i32, i32, i32) {
    %c0_i32 = arith.constant 0 : i32
    %c0_i32_0 = arith.constant 0 : i32
    %c0_i32_1 = arith.constant 0 : i32
    return %arg0, %c0_i32, %c0_i32_0 : i32, i32, i32
  }
}

module attributes {stable_mosaic.version = 11 : i64} {
  func.func @_fused_stage_kernel(%arg0: i32, %arg1: memref<1x64x28xf32, #tpu.memory_space<vmem>>, %arg2: memref<128x1024xf32, #tpu.memory_space<vmem>>, %arg3: memref<128x1xf32, #tpu.memory_space<vmem>>, %arg4: memref<1x128x13xf32, #tpu.memory_space<vmem>>, %arg5: memref<1024x13xf32, #tpu.memory_space<vmem>>) attributes {dimension_semantics = [#tpu.dimension_semantics<parallel>], iteration_bounds = array<i64: 2>, scalar_prefetch = 0 : i64, scratch_operands = 1 : i64, tpu.core_type = #tpu.core_type<tc>, window_params = [{transform_indices = @transform_0, window_bounds = array<i64: 1, 64, 28>}, {pipeline_mode = #tpu.pipeline_mode<synchronous>, transform_indices = @transform_1, window_bounds = array<i64: 128, 1024>}, {pipeline_mode = #tpu.pipeline_mode<synchronous>, transform_indices = @transform_2, window_bounds = array<i64: 128, 1>}, {transform_indices = @transform_3, window_bounds = array<i64: 1, 128, 13>}]} {
    %c0 = arith.constant 0 : index
    %c0_0 = arith.constant 0 : index
    %c0_1 = arith.constant 0 : index
    %0 = vector.load %arg1[%c0, %c0_0, %c0_1] : memref<1x64x28xf32, #tpu.memory_space<vmem>>, vector<1x64x28xf32>
    %1 = vector.shape_cast %0 : vector<1x64x28xf32> to vector<64x28xf32>
    %2 = vector.extract_strided_slice %1 {offsets = [0, 0], sizes = [32, 13], strides = [1, 1]} : vector<64x28xf32> to vector<32x13xf32>
    %c0_2 = arith.constant 0 : index
    %c0_3 = arith.constant 0 : index
    %3 = vector.load %arg5[%c0_2, %c0_3] : memref<1024x13xf32, #tpu.memory_space<vmem>>, vector<32x13xf32>
    tpu.vector_store %arg5[%c0_2, %c0_3], %2 {strides = array<i32>} : memref<1024x13xf32, #tpu.memory_space<vmem>>, vector<32x13xf32>,
    %4 = vector.extract_strided_slice %1 {offsets = [32, 0], sizes = [32, 13], strides = [1, 1]} : vector<64x28xf32> to vector<32x13xf32>
    %c32 = arith.constant 32 : index
    %c0_4 = arith.constant 0 : index
    %5 = vector.load %arg5[%c32, %c0_4] : memref<1024x13xf32, #tpu.memory_space<vmem>>, vector<32x13xf32>
    tpu.vector_store %arg5[%c32, %c0_4], %4 {strides = array<i32>} : memref<1024x13xf32, #tpu.memory_space<vmem>>, vector<32x13xf32>,
    %6 = vector.extract_strided_slice %1 {offsets = [0, 1], sizes = [32, 13], strides = [1, 1]} : vector<64x28xf32> to vector<32x13xf32>
    %c64 = arith.constant 64 : index
    %c0_5 = arith.constant 0 : index
    %7 = vector.load %arg5[%c64, %c0_5] : memref<1024x13xf32, #tpu.memory_space<vmem>>, vector<32x13xf32>
    tpu.vector_store %arg5[%c64, %c0_5], %6 {strides = array<i32>} : memref<1024x13xf32, #tpu.memory_space<vmem>>, vector<32x13xf32>,
    %8 = vector.extract_strided_slice %1 {offsets = [32, 1], sizes = [32, 13], strides = [1, 1]} : vector<64x28xf32> to vector<32x13xf32>
    %c96 = arith.constant 96 : index
    %c0_6 = arith.constant 0 : index
    %9 = vector.load %arg5[%c96, %c0_6] : memref<1024x13xf32, #tpu.memory_space<vmem>>, vector<32x13xf32>
    tpu.vector_store %arg5[%c96, %c0_6], %8 {strides = array<i32>} : memref<1024x13xf32, #tpu.memory_space<vmem>>, vector<32x13xf32>,
    %10 = vector.extract_strided_slice %1 {offsets = [0, 2], sizes = [32, 13], strides = [1, 1]} : vector<64x28xf32> to vector<32x13xf32>
    %c128 = arith.constant 128 : index
    %c0_7 = arith.constant 0 : index
    %11 = vector.load %arg5[%c128, %c0_7] : memref<1024x13xf32, #tpu.memory_space<vmem>>, vector<32x13xf32>
    tpu.vector_store %arg5[%c128, %c0_7], %10 {strides = array<i32>} : memref<1024x13xf32, #tpu.memory_space<vmem>>, vector<32x13xf32>,
    %12 = vector.extract_strided_slice %1 {offsets = [32, 2], sizes = [32, 13], strides = [1, 1]} : vector<64x28xf32> to vector<32x13xf32>
    %c160 = arith.constant 160 : index
    %c0_8 = arith.constant 0 : index
    %13 = vector.load %arg5[%c160, %c0_8] : memref<1024x13xf32, #tpu.memory_space<vmem>>, vector<32x13xf32>
    tpu.vector_store %arg5[%c160, %c0_8], %12 {strides = array<i32>} : memref<1024x13xf32, #tpu.memory_space<vmem>>, vector<32x13xf32>,
    %14 = vector.extract_strided_slice %1 {offsets = [0, 3], sizes = [32, 13], strides = [1, 1]} : vector<64x28xf32> to vector<32x13xf32>
    %c192 = arith.constant 192 : index
    %c0_9 = arith.constant 0 : index
    %15 = vector.load %arg5[%c192, %c0_9] : memref<1024x13xf32, #tpu.memory_space<vmem>>, vector<32x13xf32>
    tpu.vector_store %arg5[%c192, %c0_9], %14 {strides = array<i32>} : memref<1024x13xf32, #tpu.memory_space<vmem>>, vector<32x13xf32>,
    %16 = vector.extract_strided_slice %1 {offsets = [32, 3], sizes = [32, 13], strides = [1, 1]} : vector<64x28xf32> to vector<32x13xf32>
    %c224 = arith.constant 224 : index
    %c0_10 = arith.constant 0 : index
    %17 = vector.load %arg5[%c224, %c0_10] : memref<1024x13xf32, #tpu.memory_space<vmem>>, vector<32x13xf32>
    tpu.vector_store %arg5[%c224, %c0_10], %16 {strides = array<i32>} : memref<1024x13xf32, #tpu.memory_space<vmem>>, vector<32x13xf32>,
    %18 = vector.extract_strided_slice %1 {offsets = [0, 4], sizes = [32, 13], strides = [1, 1]} : vector<64x28xf32> to vector<32x13xf32>
    %c256 = arith.constant 256 : index
    %c0_11 = arith.constant 0 : index
    %19 = vector.load %arg5[%c256, %c0_11] : memref<1024x13xf32, #tpu.memory_space<vmem>>, vector<32x13xf32>
    tpu.vector_store %arg5[%c256, %c0_11], %18 {strides = array<i32>} : memref<1024x13xf32, #tpu.memory_space<vmem>>, vector<32x13xf32>,
    %20 = vector.extract_strided_slice %1 {offsets = [32, 4], sizes = [32, 13], strides = [1, 1]} : vector<64x28xf32> to vector<32x13xf32>
    %c288 = arith.constant 288 : index
    %c0_12 = arith.constant 0 : index
    %21 = vector.load %arg5[%c288, %c0_12] : memref<1024x13xf32, #tpu.memory_space<vmem>>, vector<32x13xf32>
    tpu.vector_store %arg5[%c288, %c0_12], %20 {strides = array<i32>} : memref<1024x13xf32, #tpu.memory_space<vmem>>, vector<32x13xf32>,
    %22 = vector.extract_strided_slice %1 {offsets = [0, 5], sizes = [32, 13], strides = [1, 1]} : vector<64x28xf32> to vector<32x13xf32>
    %c320 = arith.constant 320 : index
    %c0_13 = arith.constant 0 : index
    %23 = vector.load %arg5[%c320, %c0_13] : memref<1024x13xf32, #tpu.memory_space<vmem>>, vector<32x13xf32>
    tpu.vector_store %arg5[%c320, %c0_13], %22 {strides = array<i32>} : memref<1024x13xf32, #tpu.memory_space<vmem>>, vector<32x13xf32>,
    %24 = vector.extract_strided_slice %1 {offsets = [32, 5], sizes = [32, 13], strides = [1, 1]} : vector<64x28xf32> to vector<32x13xf32>
    %c352 = arith.constant 352 : index
    %c0_14 = arith.constant 0 : index
    %25 = vector.load %arg5[%c352, %c0_14] : memref<1024x13xf32, #tpu.memory_space<vmem>>, vector<32x13xf32>
    tpu.vector_store %arg5[%c352, %c0_14], %24 {strides = array<i32>} : memref<1024x13xf32, #tpu.memory_space<vmem>>, vector<32x13xf32>,
    %26 = vector.extract_strided_slice %1 {offsets = [0, 6], sizes = [32, 13], strides = [1, 1]} : vector<64x28xf32> to vector<32x13xf32>
    %c384 = arith.constant 384 : index
    %c0_15 = arith.constant 0 : index
    %27 = vector.load %arg5[%c384, %c0_15] : memref<1024x13xf32, #tpu.memory_space<vmem>>, vector<32x13xf32>
    tpu.vector_store %arg5[%c384, %c0_15], %26 {strides = array<i32>} : memref<1024x13xf32, #tpu.memory_space<vmem>>, vector<32x13xf32>,
    %28 = vector.extract_strided_slice %1 {offsets = [32, 6], sizes = [32, 13], strides = [1, 1]} : vector<64x28xf32> to vector<32x13xf32>
    %c416 = arith.constant 416 : index
    %c0_16 = arith.constant 0 : index
    %29 = vector.load %arg5[%c416, %c0_16] : memref<1024x13xf32, #tpu.memory_space<vmem>>, vector<32x13xf32>
    tpu.vector_store %arg5[%c416, %c0_16], %28 {strides = array<i32>} : memref<1024x13xf32, #tpu.memory_space<vmem>>, vector<32x13xf32>,
    %30 = vector.extract_strided_slice %1 {offsets = [0, 7], sizes = [32, 13], strides = [1, 1]} : vector<64x28xf32> to vector<32x13xf32>
    %c448 = arith.constant 448 : index
    %c0_17 = arith.constant 0 : index
    %31 = vector.load %arg5[%c448, %c0_17] : memref<1024x13xf32, #tpu.memory_space<vmem>>, vector<32x13xf32>
    tpu.vector_store %arg5[%c448, %c0_17], %30 {strides = array<i32>} : memref<1024x13xf32, #tpu.memory_space<vmem>>, vector<32x13xf32>,
    %32 = vector.extract_strided_slice %1 {offsets = [32, 7], sizes = [32, 13], strides = [1, 1]} : vector<64x28xf32> to vector<32x13xf32>
    %c480 = arith.constant 480 : index
    %c0_18 = arith.constant 0 : index
    %33 = vector.load %arg5[%c480, %c0_18] : memref<1024x13xf32, #tpu.memory_space<vmem>>, vector<32x13xf32>
    tpu.vector_store %arg5[%c480, %c0_18], %32 {strides = array<i32>} : memref<1024x13xf32, #tpu.memory_space<vmem>>, vector<32x13xf32>,
    %34 = vector.extract_strided_slice %1 {offsets = [0, 8], sizes = [32, 13], strides = [1, 1]} : vector<64x28xf32> to vector<32x13xf32>
    %c512 = arith.constant 512 : index
    %c0_19 = arith.constant 0 : index
    %35 = vector.load %arg5[%c512, %c0_19] : memref<1024x13xf32, #tpu.memory_space<vmem>>, vector<32x13xf32>
    tpu.vector_store %arg5[%c512, %c0_19], %34 {strides = array<i32>} : memref<1024x13xf32, #tpu.memory_space<vmem>>, vector<32x13xf32>,
    %36 = vector.extract_strided_slice %1 {offsets = [32, 8], sizes = [32, 13], strides = [1, 1]} : vector<64x28xf32> to vector<32x13xf32>
    %c544 = arith.constant 544 : index
    %c0_20 = arith.constant 0 : index
    %37 = vector.load %arg5[%c544, %c0_20] : memref<1024x13xf32, #tpu.memory_space<vmem>>, vector<32x13xf32>
    tpu.vector_store %arg5[%c544, %c0_20], %36 {strides = array<i32>} : memref<1024x13xf32, #tpu.memory_space<vmem>>, vector<32x13xf32>,
    %38 = vector.extract_strided_slice %1 {offsets = [0, 9], sizes = [32, 13], strides = [1, 1]} : vector<64x28xf32> to vector<32x13xf32>
    %c576 = arith.constant 576 : index
    %c0_21 = arith.constant 0 : index
    %39 = vector.load %arg5[%c576, %c0_21] : memref<1024x13xf32, #tpu.memory_space<vmem>>, vector<32x13xf32>
    tpu.vector_store %arg5[%c576, %c0_21], %38 {strides = array<i32>} : memref<1024x13xf32, #tpu.memory_space<vmem>>, vector<32x13xf32>,
    %40 = vector.extract_strided_slice %1 {offsets = [32, 9], sizes = [32, 13], strides = [1, 1]} : vector<64x28xf32> to vector<32x13xf32>
    %c608 = arith.constant 608 : index
    %c0_22 = arith.constant 0 : index
    %41 = vector.load %arg5[%c608, %c0_22] : memref<1024x13xf32, #tpu.memory_space<vmem>>, vector<32x13xf32>
    tpu.vector_store %arg5[%c608, %c0_22], %40 {strides = array<i32>} : memref<1024x13xf32, #tpu.memory_space<vmem>>, vector<32x13xf32>,
    %42 = vector.extract_strided_slice %1 {offsets = [0, 10], sizes = [32, 13], strides = [1, 1]} : vector<64x28xf32> to vector<32x13xf32>
    %c640 = arith.constant 640 : index
    %c0_23 = arith.constant 0 : index
    %43 = vector.load %arg5[%c640, %c0_23] : memref<1024x13xf32, #tpu.memory_space<vmem>>, vector<32x13xf32>
    tpu.vector_store %arg5[%c640, %c0_23], %42 {strides = array<i32>} : memref<1024x13xf32, #tpu.memory_space<vmem>>, vector<32x13xf32>,
    %44 = vector.extract_strided_slice %1 {offsets = [32, 10], sizes = [32, 13], strides = [1, 1]} : vector<64x28xf32> to vector<32x13xf32>
    %c672 = arith.constant 672 : index
    %c0_24 = arith.constant 0 : index
    %45 = vector.load %arg5[%c672, %c0_24] : memref<1024x13xf32, #tpu.memory_space<vmem>>, vector<32x13xf32>
    tpu.vector_store %arg5[%c672, %c0_24], %44 {strides = array<i32>} : memref<1024x13xf32, #tpu.memory_space<vmem>>, vector<32x13xf32>,
    %46 = vector.extract_strided_slice %1 {offsets = [0, 11], sizes = [32, 13], strides = [1, 1]} : vector<64x28xf32> to vector<32x13xf32>
    %c704 = arith.constant 704 : index
    %c0_25 = arith.constant 0 : index
    %47 = vector.load %arg5[%c704, %c0_25] : memref<1024x13xf32, #tpu.memory_space<vmem>>, vector<32x13xf32>
    tpu.vector_store %arg5[%c704, %c0_25], %46 {strides = array<i32>} : memref<1024x13xf32, #tpu.memory_space<vmem>>, vector<32x13xf32>,
    %48 = vector.extract_strided_slice %1 {offsets = [32, 11], sizes = [32, 13], strides = [1, 1]} : vector<64x28xf32> to vector<32x13xf32>
    %c736 = arith.constant 736 : index
    %c0_26 = arith.constant 0 : index
    %49 = vector.load %arg5[%c736, %c0_26] : memref<1024x13xf32, #tpu.memory_space<vmem>>, vector<32x13xf32>
    tpu.vector_store %arg5[%c736, %c0_26], %48 {strides = array<i32>} : memref<1024x13xf32, #tpu.memory_space<vmem>>, vector<32x13xf32>,
    %50 = vector.extract_strided_slice %1 {offsets = [0, 12], sizes = [32, 13], strides = [1, 1]} : vector<64x28xf32> to vector<32x13xf32>
    %c768 = arith.constant 768 : index
    %c0_27 = arith.constant 0 : index
    %51 = vector.load %arg5[%c768, %c0_27] : memref<1024x13xf32, #tpu.memory_space<vmem>>, vector<32x13xf32>
    tpu.vector_store %arg5[%c768, %c0_27], %50 {strides = array<i32>} : memref<1024x13xf32, #tpu.memory_space<vmem>>, vector<32x13xf32>,
    %52 = vector.extract_strided_slice %1 {offsets = [32, 12], sizes = [32, 13], strides = [1, 1]} : vector<64x28xf32> to vector<32x13xf32>
    %c800 = arith.constant 800 : index
    %c0_28 = arith.constant 0 : index
    %53 = vector.load %arg5[%c800, %c0_28] : memref<1024x13xf32, #tpu.memory_space<vmem>>, vector<32x13xf32>
    tpu.vector_store %arg5[%c800, %c0_28], %52 {strides = array<i32>} : memref<1024x13xf32, #tpu.memory_space<vmem>>, vector<32x13xf32>,
    %54 = vector.extract_strided_slice %1 {offsets = [0, 13], sizes = [32, 13], strides = [1, 1]} : vector<64x28xf32> to vector<32x13xf32>
    %c832 = arith.constant 832 : index
    %c0_29 = arith.constant 0 : index
    %55 = vector.load %arg5[%c832, %c0_29] : memref<1024x13xf32, #tpu.memory_space<vmem>>, vector<32x13xf32>
    tpu.vector_store %arg5[%c832, %c0_29], %54 {strides = array<i32>} : memref<1024x13xf32, #tpu.memory_space<vmem>>, vector<32x13xf32>,
    %56 = vector.extract_strided_slice %1 {offsets = [32, 13], sizes = [32, 13], strides = [1, 1]} : vector<64x28xf32> to vector<32x13xf32>
    %c864 = arith.constant 864 : index
    %c0_30 = arith.constant 0 : index
    %57 = vector.load %arg5[%c864, %c0_30] : memref<1024x13xf32, #tpu.memory_space<vmem>>, vector<32x13xf32>
    tpu.vector_store %arg5[%c864, %c0_30], %56 {strides = array<i32>} : memref<1024x13xf32, #tpu.memory_space<vmem>>, vector<32x13xf32>,
    %58 = vector.extract_strided_slice %1 {offsets = [0, 14], sizes = [32, 13], strides = [1, 1]} : vector<64x28xf32> to vector<32x13xf32>
    %c896 = arith.constant 896 : index
    %c0_31 = arith.constant 0 : index
    %59 = vector.load %arg5[%c896, %c0_31] : memref<1024x13xf32, #tpu.memory_space<vmem>>, vector<32x13xf32>
    tpu.vector_store %arg5[%c896, %c0_31], %58 {strides = array<i32>} : memref<1024x13xf32, #tpu.memory_space<vmem>>, vector<32x13xf32>,
    %60 = vector.extract_strided_slice %1 {offsets = [32, 14], sizes = [32, 13], strides = [1, 1]} : vector<64x28xf32> to vector<32x13xf32>
    %c928 = arith.constant 928 : index
    %c0_32 = arith.constant 0 : index
    %61 = vector.load %arg5[%c928, %c0_32] : memref<1024x13xf32, #tpu.memory_space<vmem>>, vector<32x13xf32>
    tpu.vector_store %arg5[%c928, %c0_32], %60 {strides = array<i32>} : memref<1024x13xf32, #tpu.memory_space<vmem>>, vector<32x13xf32>,
    %62 = vector.extract_strided_slice %1 {offsets = [0, 15], sizes = [32, 13], strides = [1, 1]} : vector<64x28xf32> to vector<32x13xf32>
    %c960 = arith.constant 960 : index
    %c0_33 = arith.constant 0 : index
    %63 = vector.load %arg5[%c960, %c0_33] : memref<1024x13xf32, #tpu.memory_space<vmem>>, vector<32x13xf32>
    tpu.vector_store %arg5[%c960, %c0_33], %62 {strides = array<i32>} : memref<1024x13xf32, #tpu.memory_space<vmem>>, vector<32x13xf32>,
    %64 = vector.extract_strided_slice %1 {offsets = [32, 15], sizes = [32, 13], strides = [1, 1]} : vector<64x28xf32> to vector<32x13xf32>
    %c992 = arith.constant 992 : index
    %c0_34 = arith.constant 0 : index
    %65 = vector.load %arg5[%c992, %c0_34] : memref<1024x13xf32, #tpu.memory_space<vmem>>, vector<32x13xf32>
    tpu.vector_store %arg5[%c992, %c0_34], %64 {strides = array<i32>} : memref<1024x13xf32, #tpu.memory_space<vmem>>, vector<32x13xf32>,
    %c0_35 = arith.constant 0 : index
    %c0_36 = arith.constant 0 : index
    %66 = vector.load %arg2[%c0_35, %c0_36] : memref<128x1024xf32, #tpu.memory_space<vmem>>, vector<128x1024xf32>
    %c0_37 = arith.constant 0 : index
    %c0_38 = arith.constant 0 : index
    %67 = vector.load %arg3[%c0_37, %c0_38] : memref<128x1xf32, #tpu.memory_space<vmem>>, vector<128x1xf32>
    %c0_39 = arith.constant 0 : index
    %c0_40 = arith.constant 0 : index
    %68 = vector.load %arg5[%c0_39, %c0_40] : memref<1024x13xf32, #tpu.memory_space<vmem>>, vector<1024x13xf32>
    %cst = arith.constant dense<0.000000e+00> : vector<128x13xf32>
    %69 = tpu.matmul %66, %68, %cst {dimension_numbers = #tpu.dot_dimension_numbers<[1], [0], [0], [1], [0, 0, 1, 1], [], []>} : vector<128x1024xf32>, vector<1024x13xf32>, vector<128x13xf32> -> vector<128x13xf32>
    %70 = vector.broadcast %67 : vector<128x1xf32> to vector<128x13xf32>
    %71 = arith.addf %69, %70 : vector<128x13xf32>
    %c0_41 = arith.constant 0 : index
    %c0_42 = arith.constant 0 : index
    %c0_43 = arith.constant 0 : index
    %72 = vector.load %arg4[%c0_41, %c0_42, %c0_43] : memref<1x128x13xf32, #tpu.memory_space<vmem>>, vector<1x128x13xf32>
    %73 = vector.shape_cast %72 : vector<1x128x13xf32> to vector<128x13xf32>
    %74 = vector.shape_cast %71 : vector<128x13xf32> to vector<1x128x13xf32>
    tpu.vector_store %arg4[%c0_41, %c0_42, %c0_43], %74 {strides = array<i32>} : memref<1x128x13xf32, #tpu.memory_space<vmem>>, vector<1x128x13xf32>,
    return
  }
  func.func @transform_0(%arg0: i32) -> (i32, i32, i32) {
    %c0_i32 = arith.constant 0 : i32
    %c0_i32_0 = arith.constant 0 : i32
    %c0_i32_1 = arith.constant 0 : i32
    return %arg0, %c0_i32, %c0_i32_0 : i32, i32, i32
  }
  func.func @transform_1(%arg0: i32) -> (i32, i32) {
    %c0_i32 = arith.constant 0 : i32
    %c0_i32_0 = arith.constant 0 : i32
    %c0_i32_1 = arith.constant 0 : i32
    return %c0_i32, %c0_i32_0 : i32, i32
  }
  func.func @transform_2(%arg0: i32) -> (i32, i32) {
    %c0_i32 = arith.constant 0 : i32
    %c0_i32_0 = arith.constant 0 : i32
    %c0_i32_1 = arith.constant 0 : i32
    return %c0_i32, %c0_i32_0 : i32, i32
  }
  func.func @transform_3(%arg0: i32) -> (i32, i32, i32) {
    %c0_i32 = arith.constant 0 : i32
    %c0_i32_0 = arith.constant 0 : i32
    %c0_i32_1 = arith.constant 0 : i32
    return %arg0, %c0_i32, %c0_i32_0 : i32, i32, i32
  }
}

</mosaic_0001>

<bundles_post_ra>
// kernel: downsample_fft_full.3
= control target key start
LH: loop header
LB: loop body
LE: loop exit
PB: predicated region body
PF: predicated region fallthrough
CT: control target
= control target key end

     0   :  { %s1870_s12 = smov 0   ;;  %s2535_s0 = inlined_call_operand.vmem [shape: f32[2,6,343], index: 0, kind: input, shape index: {}]   ;;  %s2536_s1 = inlined_call_operand.vmem [shape: f32[16,64], index: 1, kind: input, shape index: {}]   ;;  %s2537_s2 = inlined_call_operand.vmem [shape: f32[16,1], index: 2, kind: input, shape index: {}]   ;;  %s2538_s3 = inlined_call_operand.vmem [shape: f32[2,16,301], index: 3, kind: output, shape index: {}]  }
   0x1 LB: > { %s1719_s13 = sadd.s32 4294967295, %s1832_s12   ;;  %p1723_p0 = scmp.ge.s32.totalorder %s1832_s12, 1  ;;  %s1832_s12 = sphi %s1870_s12, %s13_s12  }
   0x2   : > { %p137_p1 = scmp.lt.s32.totalorder %s1832_s12, 3 }
   0x4   : > { %p138_p2 = pnand %p1723_p0, %p137_p1 }
   0x5   : > { %p161_p3 = scmp.lt.s32.totalorder (!%p138_p2), %s1719_s13, 1  ;;  %s1835_s18 = smov (!%p138_p2), 119  }
   0x6   : > { %141 = sbr.rel (%p138_p2) target bundleno = 1218 (0x4c2), region = 32  ;;  %s1836_s19 = smov (!%p138_p2), 118  }
   0x7   : > { %s1837_s20 = smov (!%p138_p2), 120   ;;  %s1838_s21 = smov (!%p138_p2), 122  }
   0x8   : > { %s1839_s22 = smov (!%p138_p2), 121   ;;  %s1840_s23 = smov (!%p138_p2), 123  }
   0x9   : > { %s1841_s24 = smov (!%p138_p2), 124   ;;  %s1842_s25 = smov (!%p138_p2), 126  }
   0xa   : > { %s1843_s26 = smov (!%p138_p2), 125   ;;  %s1844_s27 = smov (!%p138_p2), 127  }
   0xb   : > { %v181_v0 = vlaneseq  ;;  %v1834_v1 = vmov 1966171168   ;;  %s2542_s13 = smov (!%p161_p3, %s1719_s13), 1  ;;  %vm664_vm1 = vcmask 973824   ;;  %vm713_vm2 = vcmask 965632   ;;  %s1845_s28 = smov 117  }
   0xc   : > { %v179_v2 = vunpack.c.l.s4 %v1834_v1  ;;  %s1794_s14 = smul.u32 24, %s2542_s13  ;;  %vm615_vm3 = vcmask 982016   ;;  %v2007_v33 = vld [vmem:[%s2536_s1] sm:$0xff]  ;;  %vm806_vm4 = vcmask 523264   ;;  %v1846_v36 = vmov 0.0   ;;  %s1848_s10 = smov 1  }
   0xd   : > { %v182_v3 = vshrl.u32 %v181_v0, 7  ;;  %vm1892_vm0 = vcmp.lt.s32.totalorder %v181_v0, 332  ;;  %877 = vmatprep.mubr.f32.mxu0 %v1846_v36  ;;  %1772 = vmatprep.mubr.msk.f32.mxu1 %vm806_vm4, %v2007_v33  ;;  %vm517_vm5 = vcmask 998400   ;;  %vm566_vm6 = vcmask 990208   ;;  %s1849_s11 = smov 112  }
   0xe   : > { %v180_v4 = vunpack.c.0.s8 %v179_v2  ;;  %s165_s17 = scalar_lea.vmem %s2535_s0, %s1794_s14  ;;  %vm1037_vm7 = vcmask 1044480   ;;  %vm468_vm8 = vcmask 1006592   ;;  %vm419_vm9 = vcmask 1014784   ;;  %s1795_s14 = smul.u32 48, %s2542_s13 }
   0xf   : > { %v173_v6 = vld [vmem:[%s165_s17 + $0x10] sm:$0x3f]  ;;  %v1822_v8 = vld [vmem:[%s165_s17 + $0x4] ss:$8 sps:$4 sm:$0x33]   ;;  %vm321_vm10 = vcmask 1031168  }
  0x10   : > { %v183_v5 = vsub.s32 %v180_v4, %v182_v3  ;;  %v230_v9 = vcombine.high %v173_v6, %v173_v6  ;;  %v1825_v10 = vld [vmem:[%s165_s17] ss:$8 sps:$4 sm:$0xff]   ;;  %vm370_vm11 = vcmask 1022976   ;;  %vm272_vm12 = vcmask 1039360   ;;  %s2510_s17 = scalar_lea.vmem %s2538_s3, %s1795_s14 }
  0x11   : > { %vm762_vm13 = vcmask 957440  }
  0x12   : > { %v191_v7 = vrot.slane %v173_v6, %v183_v5  ;;  %v237_v11 = vrot.slane %v1822_v8, %v183_v5  ;;  %v244_v12 = vrot.slane %v230_v9, %v183_v5  ;;  %v184_v13 = vrot.slane %v1825_v10, %v183_v5 }
  0x14   : > { %v245_v14 = vcombine.low %v237_v11, %v244_v12  ;;  %v192_v15 = vcombine.low %v184_v13, %v191_v7  ;;  %v207_v16 = vcombine.high %v184_v13, %v191_v7  ;;  %v257_v17 = vcombine.high %v237_v11, %v244_v12  ;;  %v770_v12 = vld [vmem:[%s2537_s2] sm:$0xff]  ;;  %v771_v13 = vld [vmem:[%s2537_s2 + $0x8] sm:$0xff] }
  0x16   : > { %v1884_v18 = vrot.slane %v245_v14, %v183_v5  ;;  %v1886_v19 = vrot.slane %v192_v15, %v183_v5  ;;  %v1888_v20 = vrot.slane %v257_v17, %v183_v5  ;;  %v1890_v21 = vrot.slane %v207_v16, %v183_v5 }
  0x17   : > { %v1847_v14 = vmov 0  }
  0x18   : > { %694 = vrot.lane.b32.xlu1 %v1884_v18, %s1835_s18  ;;  %205 = vst.msk [vmem:[#allocation2] ss:$8 sm:$0x7] %vm1892_vm0, %v1886_v19  ;;  %255 = vst.msk [vmem:[#allocation2 + $0x4] ss:$8 sm:$0x7] %vm1892_vm0, %v1884_v18  ;;  %710 = vrot.lane.b32.xlu0 %v1886_v19, %s1836_s19  ;;  %v1913_v23 = vcombine.high %v1886_v19, %v1886_v19  ;;  %v224_v24 = vcombine.high %v1890_v21, %v1890_v21 }
  0x19   : > { %267 = vst.msk [vmem:[#allocation2 + $0x5] ss:$8 sm:$0x7] %vm1892_vm0, %v1888_v20  ;;  %217 = vst.msk [vmem:[#allocation2 + $0x1] ss:$8 sm:$0x7] %vm1892_vm0, %v1890_v21  ;;  %1820 = vset.pattern.permute.xlu1 %v1847_v14  ;;  %1821 = vset.pattern.permute.xlu0 %v1847_v14 }
  0x1a   : > { %222 = vst.msk [vmem:[#allocation2 + $0x2] ss:$8 sm:$0x7] %vm1892_vm0, %v1913_v23  ;;  %227 = vst.msk [vmem:[#allocation2 + $0x3] ss:$8 sm:$0x7] %vm1892_vm0, %v224_v24 }
  0x1c   : > { %702 = vrot.lane.b32.xlu1 %v1888_v20, %s1835_s18  ;;  %612 = vrot.lane.b32.xlu0 %v1886_v19, %s1837_s20 }
  0x20   : > { %719 = vrot.lane.b32.xlu1 %v1890_v21, %s1836_s19  ;;  %678 = vrot.lane.b32.xlu0 %v1913_v23, %s1835_s18 }
  0x24   : > { %621 = vrot.lane.b32.xlu1 %v1890_v21, %s1837_s20  ;;  %686 = vrot.lane.b32.xlu0 %v224_v24, %s1835_s18 }
  0x28   : > { %735 = vrot.lane.b32.xlu1 %v224_v24, %s1836_s19  ;;  %727 = vrot.lane.b32.xlu0 %v1913_v23, %s1836_s19 }
  0x2c   : > { %637 = vrot.lane.b32.xlu1 %v224_v24, %s1837_s20  ;;  %629 = vrot.lane.b32.xlu0 %v1913_v23, %s1837_s20 }
  0x30   : > { %653 = vrot.lane.b32.xlu1 %v1888_v20, %s1837_s20  ;;  %645 = vrot.lane.b32.xlu0 %v1884_v18, %s1837_s20 }
  0x34   : > { %670 = vrot.lane.b32.xlu1 %v1890_v21, %s1835_s18  ;;  %661 = vrot.lane.b32.xlu0 %v1886_v19, %s1835_s18 }
  0x38   : > { %555 = vrot.lane.b32.xlu1 %v1888_v20, %s1838_s21  ;;  %547 = vrot.lane.b32.xlu0 %v1884_v18, %s1838_s21 }
  0x3c   : > { %572 = vrot.lane.b32.xlu1 %v1890_v21, %s1839_s22  ;;  %563 = vrot.lane.b32.xlu0 %v1886_v19, %s1839_s22 }
  0x40   : > { %588 = vrot.lane.b32.xlu1 %v224_v24, %s1839_s22  ;;  %580 = vrot.lane.b32.xlu0 %v1913_v23, %s1839_s22 }
  0x44   : > { %604 = vrot.lane.b32.xlu1 %v1888_v20, %s1839_s22  ;;  %596 = vrot.lane.b32.xlu0 %v1884_v18, %s1839_s22 }
  0x48   : > { %490 = vrot.lane.b32.xlu1 %v224_v24, %s1840_s23  ;;  %482 = vrot.lane.b32.xlu0 %v1913_v23, %s1840_s23 }
  0x4c   : > { %506 = vrot.lane.b32.xlu1 %v1888_v20, %s1840_s23  ;;  %498 = vrot.lane.b32.xlu0 %v1884_v18, %s1840_s23 }
  0x50   : > { %523 = vrot.lane.b32.xlu1 %v1890_v21, %s1838_s21  ;;  %514 = vrot.lane.b32.xlu0 %v1886_v19, %s1838_s21 }
  0x54   : > { %539 = vrot.lane.b32.xlu1 %v224_v24, %s1838_s21  ;;  %531 = vrot.lane.b32.xlu0 %v1913_v23, %s1838_s21 }
  0x58   : > { %425 = vrot.lane.b32.xlu1 %v1890_v21, %s1841_s24  ;;  %416 = vrot.lane.b32.xlu0 %v1886_v19, %s1841_s24 }
  0x5c   : > { %441 = vrot.lane.b32.xlu1 %v224_v24, %s1841_s24  ;;  %433 = vrot.lane.b32.xlu0 %v1913_v23, %s1841_s24 }
  0x60   : > { %457 = vrot.lane.b32.xlu1 %v1888_v20, %s1841_s24  ;;  %449 = vrot.lane.b32.xlu0 %v1884_v18, %s1841_s24 }
  0x64   : > { %474 = vrot.lane.b32.xlu1 %v1890_v21, %s1840_s23  ;;  %465 = vrot.lane.b32.xlu0 %v1886_v19, %s1840_s23 }
  0x68   : > { %359 = vrot.lane.b32.xlu1 %v1888_v20, %s1842_s25  ;;  %351 = vrot.lane.b32.xlu0 %v1884_v18, %s1842_s25 }
  0x6c   : > { %376 = vrot.lane.b32.xlu1 %v1890_v21, %s1843_s26  ;;  %367 = vrot.lane.b32.xlu0 %v1886_v19, %s1843_s26 }
  0x70   : > { %392 = vrot.lane.b32.xlu1 %v224_v24, %s1843_s26  ;;  %384 = vrot.lane.b32.xlu0 %v1913_v23, %s1843_s26 }
  0x74   : > { %408 = vrot.lane.b32.xlu1 %v1888_v20, %s1843_s26  ;;  %400 = vrot.lane.b32.xlu0 %v1884_v18, %s1843_s26 }
  0x78   : > { %294 = vrot.lane.b32.xlu1 %v224_v24, %s1844_s27  ;;  %286 = vrot.lane.b32.xlu0 %v1913_v23, %s1844_s27 }
  0x7c   : > { %310 = vrot.lane.b32.xlu1 %v1888_v20, %s1844_s27  ;;  %302 = vrot.lane.b32.xlu0 %v1884_v18, %s1844_s27 }
  0x80   : > { %327 = vrot.lane.b32.xlu1 %v1890_v21, %s1842_s25  ;;  %318 = vrot.lane.b32.xlu0 %v1886_v19, %s1842_s25 }
  0x84   : > { %343 = vrot.lane.b32.xlu1 %v224_v24, %s1842_s25  ;;  %335 = vrot.lane.b32.xlu0 %v1913_v23, %s1842_s25 }
  0x88   : > { %743 = vrot.lane.b32.xlu0 %v1884_v18, %s1836_s19  ;;  %751 = vrot.lane.b32.xlu1 %v1888_v20, %s1836_s19 }
  0x8a   : > { %v695_v25 = vpop.permute.xlu1 %694  ;;  %v711_v26 = vpop.permute.xlu0 %710 }
  0x8b   : > { %v696_v27 = vrot.slane %v695_v25, 1  ;;  %v712_v28 = vrot.slane %v711_v26, 1 }
  0x8c   : > { %759 = vrot.lane.b32.xlu0 %v1886_v19, %s1845_s28  ;;  %269 = vrot.lane.b32.xlu1 %v1886_v19, %s1844_s27 }
  0x8d   : > { %v697_v29 = vsel %vm664_vm1, %v695_v25, %v696_v27  ;;  %v714_v30 = vsel %vm713_vm2, %v711_v26, %v712_v28 }
  0x8e   : > { %700 = vst.msk [vmem:[#allocation2 + $0xaa] ss:$8 sm:$0x7] %vm1892_vm0, %v697_v29  ;;  %717 = vst.msk [vmem:[#allocation2 + $0xac] ss:$8 sm:$0x7] %vm1892_vm0, %v714_v30  ;;  %v703_v31 = vpop.permute.xlu1 %702  ;;  %v613_v32 = vpop.permute.xlu0 %612 }
  0x8f   : > { %v704_v34 = vrot.slane %v703_v31, 1  ;;  %v614_v35 = vrot.slane %v613_v32, 1 }
  0x90   : > { %278 = vrot.lane.b32.xlu0 %v1890_v21, %s1844_s27  ;;  %798 = vperm.xlu1 %1820, %v770_v12  }
  0x91   : > { %v705_v37 = vsel %vm664_vm1, %v703_v31, %v704_v34  ;;  %v616_v38 = vsel %vm615_vm3, %v613_v32, %v614_v35 }
  0x92   : > { %708 = vst.msk [vmem:[#allocation2 + $0xab] ss:$8 sm:$0x7] %vm1892_vm0, %v705_v37  ;;  %619 = vst.msk [vmem:[#allocation2 + $0x90] ss:$8 sm:$0x7] %vm1892_vm0, %v616_v38  ;;  %v720_v39 = vpop.permute.xlu1 %719  ;;  %v679_v40 = vpop.permute.xlu0 %678 }
  0x93   : > { %v721_v41 = vrot.slane %v720_v39, 1  ;;  %v680_v42 = vrot.slane %v679_v40, 1 }
  0x94   : > { %803 = vperm.xlu0 %1821, %v771_v13  }
  0x95   : > { %v722_v43 = vsel %vm713_vm2, %v720_v39, %v721_v41  ;;  %v681_v44 = vsel %vm664_vm1, %v679_v40, %v680_v42 }
  0x96   : > { %725 = vst.msk [vmem:[#allocation2 + $0xad] ss:$8 sm:$0x7] %vm1892_vm0, %v722_v43  ;;  %684 = vst.msk [vmem:[#allocation2 + $0xa8] ss:$8 sm:$0x7] %vm1892_vm0, %v681_v44  ;;  %v622_v45 = vpop.permute.xlu1 %621  ;;  %v687_v46 = vpop.permute.xlu0 %686 }
  0x97   : > { %v623_v47 = vrot.slane %v622_v45, 1  ;;  %v688_v48 = vrot.slane %v687_v46, 1 }
  0x99   : > { %v624_v49 = vsel %vm615_vm3, %v622_v45, %v623_v47  ;;  %v689_v50 = vsel %vm664_vm1, %v687_v46, %v688_v48 }
  0x9a   : > { %627 = vst.msk [vmem:[#allocation2 + $0x91] ss:$8 sm:$0x7] %vm1892_vm0, %v624_v49  ;;  %692 = vst.msk [vmem:[#allocation2 + $0xa9] ss:$8 sm:$0x7] %vm1892_vm0, %v689_v50  ;;  %v736_v51 = vpop.permute.xlu1 %735  ;;  %v728_v52 = vpop.permute.xlu0 %727 }
  0x9b   : > { %v737_v53 = vrot.slane %v736_v51, 1  ;;  %v729_v54 = vrot.slane %v728_v52, 1 }
  0x9d   : > { %v738_v55 = vsel %vm713_vm2, %v736_v51, %v737_v53  ;;  %v730_v56 = vsel %vm713_vm2, %v728_v52, %v729_v54 }
  0x9e   : > { %741 = vst.msk [vmem:[#allocation2 + $0xaf] ss:$8 sm:$0x7] %vm1892_vm0, %v738_v55  ;;  %733 = vst.msk [vmem:[#allocation2 + $0xae] ss:$8 sm:$0x7] %vm1892_vm0, %v730_v56  ;;  %v638_v57 = vpop.permute.xlu1 %637  ;;  %v630_v58 = vpop.permute.xlu0 %629 }
  0x9f   : > { %v639_v59 = vrot.slane %v638_v57, 1  ;;  %v631_v60 = vrot.slane %v630_v58, 1 }
  0xa1   : > { %v640_v61 = vsel %vm615_vm3, %v638_v57, %v639_v59  ;;  %v632_v62 = vsel %vm615_vm3, %v630_v58, %v631_v60 }
  0xa2   : > { %643 = vst.msk [vmem:[#allocation2 + $0x93] ss:$8 sm:$0x7] %vm1892_vm0, %v640_v61  ;;  %635 = vst.msk [vmem:[#allocation2 + $0x92] ss:$8 sm:$0x7] %vm1892_vm0, %v632_v62  ;;  %v654_v63 = vpop.permute.xlu1 %653  ;;  %v646_v0 = vpop.permute.xlu0 %645 }
  0xa3   : > { %v655_v1 = vrot.slane %v654_v63, 1  ;;  %v647_v2 = vrot.slane %v646_v0, 1 }
  0xa5   : > { %v656_v3 = vsel %vm615_vm3, %v654_v63, %v655_v1  ;;  %v648_v4 = vsel %vm615_vm3, %v646_v0, %v647_v2  ;;  %v2046_v5 = vld [vmem:[#allocation2 + $0xb0] sm:$0xff]  ;;  %v2048_v6 = vld [vmem:[#allocation2 + $0xb8] sm:$0xff]  ;;  %v2050_v7 = vld [vmem:[#allocation2 + $0xa8] sm:$0xff] }
  0xa6   : > { %659 = vst.msk [vmem:[#allocation2 + $0x95] ss:$8 sm:$0x7] %vm1892_vm0, %v656_v3  ;;  %651 = vst.msk [vmem:[#allocation2 + $0x94] ss:$8 sm:$0x7] %vm1892_vm0, %v648_v4  ;;  %v671_v8 = vpop.permute.xlu1 %670  ;;  %829 = vmatprep.subr.mxu0 %v2046_v5  ;;  %1756 = vmatprep.subr.mxu1 %v2048_v6  ;;  %v662_v9 = vpop.permute.xlu0 %661 }
  0xa7   : > { %v672_v10 = vrot.slane %v671_v8, 1  ;;  %v663_v11 = vrot.slane %v662_v9, 1  ;;  %830 = vmatpush1.msra.mxu0 %v2050_v7  ;;  %1757 = vmatpush3.msra.mxu1 %v2048_v6  ;;  %v1079_v34 = vrot.slane %v2046_v5, 3  ;;  %v1081_v35 = vrot.slane %v2048_v6, 3 }
  0xa8   : > { %v1077_v39 = vrot.slane %v2050_v7, 3 }
  0xa9   : > { %v673_v15 = vsel %vm664_vm1, %v671_v8, %v672_v10  ;;  %v665_v16 = vsel %vm664_vm1, %v662_v9, %v663_v11 }
  0xaa   : > { %676 = vst.msk [vmem:[#allocation2 + $0x97] ss:$8 sm:$0x7] %vm1892_vm0, %v673_v15  ;;  %668 = vst.msk [vmem:[#allocation2 + $0x96] ss:$8 sm:$0x7] %vm1892_vm0, %v665_v16  ;;  %v556_v17 = vpop.permute.xlu1 %555  ;;  %v548_v18 = vpop.permute.xlu0 %547 }
  0xab   : > { %v557_v19 = vrot.slane %v556_v17, 1  ;;  %v549_v20 = vrot.slane %v548_v18, 1 }
  0xad   : > { %v558_v21 = vsel %vm517_vm5, %v556_v17, %v557_v19  ;;  %v550_v23 = vsel %vm517_vm5, %v548_v18, %v549_v20 }
  0xae   : > { %561 = vst.msk [vmem:[#allocation2 + $0x79] ss:$8 sm:$0x7] %vm1892_vm0, %v558_v21  ;;  %553 = vst.msk [vmem:[#allocation2 + $0x78] ss:$8 sm:$0x7] %vm1892_vm0, %v550_v23  ;;  %v573_v24 = vpop.permute.xlu1 %572  ;;  %v564_v25 = vpop.permute.xlu0 %563 }
  0xaf   : > { %v574_v26 = vrot.slane %v573_v24, 1  ;;  %v565_v27 = vrot.slane %v564_v25, 1 }
  0xb1   : > { %v575_v28 = vsel %vm566_vm6, %v573_v24, %v574_v26  ;;  %v567_v29 = vsel %vm566_vm6, %v564_v25, %v565_v27  ;;  %v2080_v30 = vld [vmem:[#allocation2 + $0x98] sm:$0xff]  ;;  %v2082_v31 = vld [vmem:[#allocation2 + $0xa0] sm:$0xff]  ;;  %v2084_v32 = vld [vmem:[#allocation2 + $0x90] sm:$0xff] }
  0xb2   : > { %578 = vst.msk [vmem:[#allocation2 + $0x7b] ss:$8 sm:$0x7] %vm1892_vm0, %v575_v28  ;;  %570 = vst.msk [vmem:[#allocation2 + $0x7a] ss:$8 sm:$0x7] %vm1892_vm0, %v567_v29  ;;  %v589_v37 = vpop.permute.xlu1 %588  ;;  %831 = vmatprep.subr.mxu0 %v2080_v30  ;;  %1758 = vmatprep.subr.mxu1 %v2082_v31  ;;  %v581_v38 = vpop.permute.xlu0 %580 }
  0xb3   : > { %v1073_v40 = vrot.slane %v2080_v30, 3  ;;  %v1075_v41 = vrot.slane %v2082_v31, 3  ;;  %v1071_v42 = vrot.slane %v2084_v32, 3  ;;  %v590_v43 = vrot.slane %v589_v37, 1  ;;  %832 = vmatpush1.msra.mxu0 %v2084_v32  ;;  %1759 = vmatpush3.msra.mxu1 %v2082_v31 }
  0xb4   : > { %v582_v44 = vrot.slane %v581_v38, 1 }
  0xb5   : > { %v2103_v45 = vsel %vm1037_vm7, %v1073_v40, %v1079_v34  ;;  %v2108_v46 = vsel %vm1037_vm7, %v1075_v41, %v1081_v35  ;;  %v2113_v47 = vsel %vm1037_vm7, %v1071_v42, %v1077_v39  ;;  %v591_v48 = vsel %vm566_vm6, %v589_v37, %v590_v43 }
  0xb6   : > { %v583_v49 = vsel %vm566_vm6, %v581_v38, %v582_v44  ;;  %594 = vst.msk [vmem:[#allocation2 + $0x7d] ss:$8 sm:$0x7] %vm1892_vm0, %v591_v48  ;;  %v605_v50 = vpop.permute.xlu1 %604  ;;  %v597_v51 = vpop.permute.xlu0 %596 }
  0xb7   : > { %586 = vst.msk [vmem:[#allocation2 + $0x7c] ss:$8 sm:$0x7] %vm1892_vm0, %v583_v49  ;;  %v606_v52 = vrot.slane %v605_v50, 1  ;;  %v598_v53 = vrot.slane %v597_v51, 1 }
  0xb9   : > { %v607_v54 = vsel %vm566_vm6, %v605_v50, %v606_v52  ;;  %v599_v55 = vsel %vm566_vm6, %v597_v51, %v598_v53 }
  0xba   : > { %610 = vst.msk [vmem:[#allocation2 + $0x7f] ss:$8 sm:$0x7] %vm1892_vm0, %v607_v54  ;;  %602 = vst.msk [vmem:[#allocation2 + $0x7e] ss:$8 sm:$0x7] %vm1892_vm0, %v599_v55  ;;  %v491_v56 = vpop.permute.xlu1 %490  ;;  %v483_v57 = vpop.permute.xlu0 %482 }
  0xbb   : > { %v492_v58 = vrot.slane %v491_v56, 1  ;;  %v484_v59 = vrot.slane %v483_v57, 1 }
  0xbd   : > { %v493_v60 = vsel %vm468_vm8, %v491_v56, %v492_v58  ;;  %v485_v61 = vsel %vm468_vm8, %v483_v57, %v484_v59 }
  0xbe   : > { %496 = vst.msk [vmem:[#allocation2 + $0x61] ss:$8 sm:$0x7] %vm1892_vm0, %v493_v60  ;;  %488 = vst.msk [vmem:[#allocation2 + $0x60] ss:$8 sm:$0x7] %vm1892_vm0, %v485_v61  ;;  %v507_v62 = vpop.permute.xlu1 %506  ;;  %v499_v63 = vpop.permute.xlu0 %498 }
  0xbf   : > { %v508_v0 = vrot.slane %v507_v62, 1  ;;  %v500_v1 = vrot.slane %v499_v63, 1 }
  0xc1   : > { %v509_v2 = vsel %vm468_vm8, %v507_v62, %v508_v0  ;;  %v501_v3 = vsel %vm468_vm8, %v499_v63, %v500_v1  ;;  %v2135_v4 = vld [vmem:[#allocation2 + $0x80] sm:$0xff]  ;;  %v2137_v8 = vld [vmem:[#allocation2 + $0x88] sm:$0xff]  ;;  %v2139_v9 = vld [vmem:[#allocation2 + $0x78] sm:$0xff] }
  0xc2   : > { %512 = vst.msk [vmem:[#allocation2 + $0x63] ss:$8 sm:$0x7] %vm1892_vm0, %v509_v2  ;;  %504 = vst.msk [vmem:[#allocation2 + $0x62] ss:$8 sm:$0x7] %vm1892_vm0, %v501_v3  ;;  %v524_v10 = vpop.permute.xlu1 %523  ;;  %833 = vmatprep.subr.mxu0 %v2135_v4  ;;  %1760 = vmatprep.subr.mxu1 %v2137_v8  ;;  %v515_v11 = vpop.permute.xlu0 %514 }
  0xc3   : > { %v1067_v12 = vrot.slane %v2135_v4, 3  ;;  %v1069_v13 = vrot.slane %v2137_v8, 3  ;;  %v1065_v14 = vrot.slane %v2139_v9, 3  ;;  %v525_v15 = vrot.slane %v524_v10, 1  ;;  %834 = vmatpush1.msra.mxu0 %v2139_v9  ;;  %1761 = vmatpush3.msra.mxu1 %v2137_v8 }
  0xc4   : > { %v516_v16 = vrot.slane %v515_v11, 1 }
  0xc5   : > { %v2153_v17 = vsel %vm1037_vm7, %v1067_v12, %v1073_v40  ;;  %v2156_v18 = vsel %vm1037_vm7, %v1069_v13, %v1075_v41  ;;  %v2159_v19 = vsel %vm1037_vm7, %v1065_v14, %v1071_v42  ;;  %v526_v20 = vsel %vm517_vm5, %v524_v10, %v525_v15 }
  0xc6   : > { %v518_v21 = vsel %vm517_vm5, %v515_v11, %v516_v16  ;;  %529 = vst.msk [vmem:[#allocation2 + $0x65] ss:$8 sm:$0x7] %vm1892_vm0, %v526_v20  ;;  %v540_v23 = vpop.permute.xlu1 %539  ;;  %v532_v24 = vpop.permute.xlu0 %531 }
  0xc7   : > { %521 = vst.msk [vmem:[#allocation2 + $0x64] ss:$8 sm:$0x7] %vm1892_vm0, %v518_v21  ;;  %v541_v25 = vrot.slane %v540_v23, 1  ;;  %v533_v26 = vrot.slane %v532_v24, 1 }
  0xc9   : > { %v542_v27 = vsel %vm517_vm5, %v540_v23, %v541_v25  ;;  %v534_v28 = vsel %vm517_vm5, %v532_v24, %v533_v26 }
  0xca   : > { %545 = vst.msk [vmem:[#allocation2 + $0x67] ss:$8 sm:$0x7] %vm1892_vm0, %v542_v27  ;;  %537 = vst.msk [vmem:[#allocation2 + $0x66] ss:$8 sm:$0x7] %vm1892_vm0, %v534_v28  ;;  %v426_v29 = vpop.permute.xlu1 %425  ;;  %v417_v30 = vpop.permute.xlu0 %416 }
  0xcb   : > { %v427_v31 = vrot.slane %v426_v29, 1  ;;  %v418_v32 = vrot.slane %v417_v30, 1 }
  0xcd   : > { %v428_v37 = vsel %vm419_vm9, %v426_v29, %v427_v31  ;;  %v420_v38 = vsel %vm419_vm9, %v417_v30, %v418_v32 }
  0xce   : > { %431 = vst.msk [vmem:[#allocation2 + $0x49] ss:$8 sm:$0x7] %vm1892_vm0, %v428_v37  ;;  %423 = vst.msk [vmem:[#allocation2 + $0x48] ss:$8 sm:$0x7] %vm1892_vm0, %v420_v38  ;;  %v442_v40 = vpop.permute.xlu1 %441  ;;  %v434_v41 = vpop.permute.xlu0 %433 }
  0xcf   : > { %v443_v42 = vrot.slane %v442_v40, 1  ;;  %v435_v43 = vrot.slane %v434_v41, 1 }
  0xd1   : > { %v444_v44 = vsel %vm419_vm9, %v442_v40, %v443_v42  ;;  %v436_v48 = vsel %vm419_vm9, %v434_v41, %v435_v43  ;;  %v2181_v49 = vld [vmem:[#allocation2 + $0x68] sm:$0xff]  ;;  %v2183_v50 = vld [vmem:[#allocation2 + $0x70] sm:$0xff]  ;;  %v2185_v51 = vld [vmem:[#allocation2 + $0x60] sm:$0xff] }
  0xd2   : > { %447 = vst.msk [vmem:[#allocation2 + $0x4b] ss:$8 sm:$0x7] %vm1892_vm0, %v444_v44  ;;  %439 = vst.msk [vmem:[#allocation2 + $0x4a] ss:$8 sm:$0x7] %vm1892_vm0, %v436_v48  ;;  %v458_v52 = vpop.permute.xlu1 %457  ;;  %835 = vmatprep.subr.mxu0 %v2181_v49  ;;  %1762 = vmatprep.subr.mxu1 %v2183_v50  ;;  %v450_v53 = vpop.permute.xlu0 %449 }
  0xd3   : > { %v1061_v54 = vrot.slane %v2181_v49, 3  ;;  %v1063_v55 = vrot.slane %v2183_v50, 3  ;;  %v1059_v56 = vrot.slane %v2185_v51, 3  ;;  %v459_v57 = vrot.slane %v458_v52, 1  ;;  %836 = vmatpush1.msra.mxu0 %v2185_v51  ;;  %1763 = vmatpush3.msra.mxu1 %v2183_v50 }
  0xd4   : > { %v451_v58 = vrot.slane %v450_v53, 1 }
  0xd5   : > { %v2201_v59 = vsel %vm1037_vm7, %v1061_v54, %v1067_v12  ;;  %v2206_v60 = vsel %vm1037_vm7, %v1063_v55, %v1069_v13  ;;  %v2211_v61 = vsel %vm1037_vm7, %v1059_v56, %v1065_v14  ;;  %v460_v62 = vsel %vm419_vm9, %v458_v52, %v459_v57 }
  0xd6   : > { %v452_v63 = vsel %vm419_vm9, %v450_v53, %v451_v58  ;;  %463 = vst.msk [vmem:[#allocation2 + $0x4d] ss:$8 sm:$0x7] %vm1892_vm0, %v460_v62  ;;  %v475_v0 = vpop.permute.xlu1 %474  ;;  %v466_v1 = vpop.permute.xlu0 %465 }
  0xd7   : > { %455 = vst.msk [vmem:[#allocation2 + $0x4c] ss:$8 sm:$0x7] %vm1892_vm0, %v452_v63  ;;  %v476_v2 = vrot.slane %v475_v0, 1  ;;  %v467_v3 = vrot.slane %v466_v1, 1 }
  0xd9   : > { %v477_v4 = vsel %vm468_vm8, %v475_v0, %v476_v2  ;;  %v469_v8 = vsel %vm468_vm8, %v466_v1, %v467_v3 }
  0xda   : > { %480 = vst.msk [vmem:[#allocation2 + $0x4f] ss:$8 sm:$0x7] %vm1892_vm0, %v477_v4  ;;  %472 = vst.msk [vmem:[#allocation2 + $0x4e] ss:$8 sm:$0x7] %vm1892_vm0, %v469_v8  ;;  %v360_v9 = vpop.permute.xlu1 %359  ;;  %v352_v10 = vpop.permute.xlu0 %351 }
  0xdb   : > { %v361_v11 = vrot.slane %v360_v9, 1  ;;  %v353_v12 = vrot.slane %v352_v10, 1 }
  0xdd   : > { %v362_v13 = vsel %vm321_vm10, %v360_v9, %v361_v11  ;;  %v354_v14 = vsel %vm321_vm10, %v352_v10, %v353_v12 }
  0xde   : > { %365 = vst.msk [vmem:[#allocation2 + $0x31] ss:$8 sm:$0x7] %vm1892_vm0, %v362_v13  ;;  %357 = vst.msk [vmem:[#allocation2 + $0x30] ss:$8 sm:$0x7] %vm1892_vm0, %v354_v14  ;;  %v377_v15 = vpop.permute.xlu1 %376  ;;  %v368_v16 = vpop.permute.xlu0 %367 }
  0xdf   : > { %v378_v20 = vrot.slane %v377_v15, 1  ;;  %v369_v21 = vrot.slane %v368_v16, 1 }
  0xe1   : > { %v379_v23 = vsel %vm370_vm11, %v377_v15, %v378_v20  ;;  %v371_v24 = vsel %vm370_vm11, %v368_v16, %v369_v21  ;;  %v2233_v25 = vld [vmem:[#allocation2 + $0x50] sm:$0xff]  ;;  %v2235_v26 = vld [vmem:[#allocation2 + $0x58] sm:$0xff]  ;;  %v2237_v27 = vld [vmem:[#allocation2 + $0x48] sm:$0xff] }
  0xe2   : > { %382 = vst.msk [vmem:[#allocation2 + $0x33] ss:$8 sm:$0x7] %vm1892_vm0, %v379_v23  ;;  %374 = vst.msk [vmem:[#allocation2 + $0x32] ss:$8 sm:$0x7] %vm1892_vm0, %v371_v24  ;;  %v393_v28 = vpop.permute.xlu1 %392  ;;  %837 = vmatprep.subr.mxu0 %v2233_v25  ;;  %1764 = vmatprep.subr.mxu1 %v2235_v26  ;;  %v385_v29 = vpop.permute.xlu0 %384 }
  0xe3   : > { %v394_v30 = vrot.slane %v393_v28, 1  ;;  %v386_v31 = vrot.slane %v385_v29, 1  ;;  %838 = vmatpush1.msra.mxu0 %v2237_v27  ;;  %1765 = vmatpush3.msra.mxu1 %v2235_v26  ;;  %v1055_v5 = vrot.slane %v2233_v25, 3  ;;  %v1057_v6 = vrot.slane %v2235_v26, 3 }
  0xe4   : > { %v1053_v7 = vrot.slane %v2237_v27, 3 }
  0xe5   : > { %v395_v32 = vsel %vm370_vm11, %v393_v28, %v394_v30  ;;  %v387_v37 = vsel %vm370_vm11, %v385_v29, %v386_v31 }
  0xe6   : > { %398 = vst.msk [vmem:[#allocation2 + $0x35] ss:$8 sm:$0x7] %vm1892_vm0, %v395_v32  ;;  %390 = vst.msk [vmem:[#allocation2 + $0x34] ss:$8 sm:$0x7] %vm1892_vm0, %v387_v37  ;;  %v409_v38 = vpop.permute.xlu1 %408  ;;  %v401_v40 = vpop.permute.xlu0 %400 }
  0xe7   : > { %v410_v41 = vrot.slane %v409_v38, 1  ;;  %v402_v42 = vrot.slane %v401_v40, 1 }
  0xe9   : > { %v411_v43 = vsel %vm370_vm11, %v409_v38, %v410_v41  ;;  %v403_v44 = vsel %vm370_vm11, %v401_v40, %v402_v42 }
  0xea   : > { %414 = vst.msk [vmem:[#allocation2 + $0x37] ss:$8 sm:$0x7] %vm1892_vm0, %v411_v43  ;;  %406 = vst.msk [vmem:[#allocation2 + $0x36] ss:$8 sm:$0x7] %vm1892_vm0, %v403_v44  ;;  %v295_v48 = vpop.permute.xlu1 %294  ;;  %v287_v52 = vpop.permute.xlu0 %286 }
  0xeb   : > { %v296_v53 = vrot.slane %v295_v48, 1  ;;  %v288_v57 = vrot.slane %v287_v52, 1 }
  0xed   : > { %v297_v58 = vsel %vm272_vm12, %v295_v48, %v296_v53  ;;  %v289_v62 = vsel %vm272_vm12, %v287_v52, %v288_v57 }
  0xee   : > { %300 = vst.msk [vmem:[#allocation2 + $0x19] ss:$8 sm:$0x7] %vm1892_vm0, %v297_v58  ;;  %292 = vst.msk [vmem:[#allocation2 + $0x18] ss:$8 sm:$0x7] %vm1892_vm0, %v289_v62  ;;  %v311_v63 = vpop.permute.xlu1 %310  ;;  %v303_v0 = vpop.permute.xlu0 %302 }
  0xef   : > { %v312_v1 = vrot.slane %v311_v63, 1  ;;  %v304_v2 = vrot.slane %v303_v0, 1 }
  0xf1   : > { %v313_v3 = vsel %vm272_vm12, %v311_v63, %v312_v1  ;;  %v305_v4 = vsel %vm272_vm12, %v303_v0, %v304_v2  ;;  %v2267_v8 = vld [vmem:[#allocation2 + $0x38] sm:$0xff]  ;;  %v2269_v9 = vld [vmem:[#allocation2 + $0x40] sm:$0xff]  ;;  %v2271_v10 = vld [vmem:[#allocation2 + $0x30] sm:$0xff] }
  0xf2   : > { %316 = vst.msk [vmem:[#allocation2 + $0x1b] ss:$8 sm:$0x7] %vm1892_vm0, %v313_v3  ;;  %308 = vst.msk [vmem:[#allocation2 + $0x1a] ss:$8 sm:$0x7] %vm1892_vm0, %v305_v4  ;;  %v328_v11 = vpop.permute.xlu1 %327  ;;  %839 = vmatprep.subr.mxu0 %v2267_v8  ;;  %1766 = vmatprep.subr.mxu1 %v2269_v9  ;;  %v319_v12 = vpop.permute.xlu0 %318 }
  0xf3   : > { %v329_v13 = vrot.slane %v328_v11, 1  ;;  %v320_v14 = vrot.slane %v319_v12, 1  ;;  %840 = vmatpush1.msra.mxu0 %v2271_v10  ;;  %1767 = vmatpush3.msra.mxu1 %v2269_v9  ;;  %v2320_v4 = vld [vmem:[%s2536_s1 + $0x8] sm:$0xff] }
  0xf5   : > { %v330_v15 = vsel %vm321_vm10, %v328_v11, %v329_v13  ;;  %v322_v16 = vsel %vm321_vm10, %v319_v12, %v320_v14 }
  0xf6   : > { %333 = vst.msk [vmem:[#allocation2 + $0x1d] ss:$8 sm:$0x7] %vm1892_vm0, %v330_v15  ;;  %325 = vst.msk [vmem:[#allocation2 + $0x1c] ss:$8 sm:$0x7] %vm1892_vm0, %v322_v16  ;;  %v344_v20 = vpop.permute.xlu1 %343  ;;  %v336_v21 = vpop.permute.xlu0 %335 }
  0xf7   : > { %v345_v23 = vrot.slane %v344_v20, 1  ;;  %v337_v24 = vrot.slane %v336_v21, 1 }
  0xf9   : > { %v346_v28 = vsel %vm321_vm10, %v344_v20, %v345_v23  ;;  %v338_v29 = vsel %vm321_vm10, %v336_v21, %v337_v24 }
  0xfa   : > { %349 = vst.msk [vmem:[#allocation2 + $0x1f] ss:$8 sm:$0x7] %vm1892_vm0, %v346_v28  ;;  %341 = vst.msk [vmem:[#allocation2 + $0x1e] ss:$8 sm:$0x7] %vm1892_vm0, %v338_v29  ;;  %v744_v30 = vpop.permute.xlu0 %743  ;;  %v752_v31 = vpop.permute.xlu1 %751 }
  0xfb   : > { %v745_v32 = vrot.slane %v744_v30, 1  ;;  %v753_v37 = vrot.slane %v752_v31, 1 }
  0xfd   : > { %v746_v38 = vsel %vm713_vm2, %v744_v30, %v745_v32  ;;  %v754_v40 = vsel %vm713_vm2, %v752_v31, %v753_v37 }
  0xfe   : > { %749 = vst.msk [vmem:[#allocation2 + $0xc0] ss:$8 sm:$0x7] %vm1892_vm0, %v746_v38  ;;  %757 = vst.msk [vmem:[#allocation2 + $0xc1] ss:$8 sm:$0x7] %vm1892_vm0, %v754_v40  ;;  %v760_v41 = vpop.permute.xlu0 %759  ;;  %v270_v42 = vpop.permute.xlu1 %269 }
  0xff   : > { %v761_v43 = vrot.slane %v760_v41, 1  ;;  %v271_v44 = vrot.slane %v270_v42, 1 }
 0x101   : > { %v763_v48 = vsel %vm762_vm13, %v760_v41, %v761_v43  ;;  %v273_v52 = vsel %vm272_vm12, %v270_v42, %v271_v44  ;;  %v2300_v53 = vld [vmem:[#allocation2 + $0x20] sm:$0xff]  ;;  %v2302_v57 = vld [vmem:[#allocation2 + $0x28] sm:$0xff]  ;;  %v2304_v58 = vld [vmem:[#allocation2 + $0x18] sm:$0xff] }
 0x102   : > { %766 = vst.msk [vmem:[#allocation2 + $0xc2] ss:$8 sm:$0x7] %vm1892_vm0, %v763_v48  ;;  %276 = vst.msk [vmem:[#allocation2 + $0x6] ss:$8 sm:$0x7] %vm1892_vm0, %v273_v52  ;;  %841 = vmatprep.subr.mxu0 %v2300_v53  ;;  %1768 = vmatprep.subr.mxu1 %v2302_v57  ;;  %v279_v62 = vpop.permute.xlu0 %278 }
 0x103   : > { %v280_v63 = vrot.slane %v279_v62, 1  ;;  %842 = vmatpush1.msra.mxu0 %v2304_v58  ;;  %1769 = vmatpush3.msra.mxu1 %v2302_v57 }
 0x105   : > { %v281_v0 = vsel %vm272_vm12, %v279_v62, %v280_v63 }
 0x106   : > { %284 = vst.msk [vmem:[#allocation2 + $0x7] ss:$8 sm:$0x7] %vm1892_vm0, %v281_v0 }
 0x109   : > { %v1008_v1 = vld [vmem:[#allocation2 + $0xc8] sm:$0x7]  ;;  %v1009_v2 = vld [vmem:[#allocation2 + $0xd0] sm:$0x7]  ;;  %v1007_v3 = vld [vmem:[#allocation2 + $0xc0] sm:$0x7] }
 0x10a   : > { %v1085_v11 = vrot.slane %v1008_v1, 3  ;;  %v1087_v12 = vrot.slane %v1009_v2, 3  ;;  %v1083_v16 = vrot.slane %v1007_v3, 3 }
 0x10b   : > { %v799_v32 = vpop.permute.xlu1 %798 }
 0x10c   : > { %v1086_v22 = vsel %vm1037_vm7, %v1079_v34, %v1085_v11  ;;  %v1088_v20 = vsel %vm1037_vm7, %v1081_v35, %v1087_v12  ;;  %v1084_v21 = vsel %vm1037_vm7, %v1077_v39, %v1083_v16  ;;  %v1049_v34 = vrot.slane %v2267_v8, 3 }
 0x10d   : > { %v773_v13 = vld [vmem:[#allocation2 + $0x8] sm:$0xff]  ;;  %v774_v14 = vld [vmem:[#allocation2 + $0x10] sm:$0xff]  ;;  %v772_v15 = vld [vmem:[#allocation2] sm:$0xff]  ;;  %v1051_v35 = vrot.slane %v2269_v9, 3  ;;  %v1047_v39 = vrot.slane %v2271_v10, 3 }
 0x10e   : > { %843 = vmatprep.subr.mxu0 %v773_v13  ;;  %1770 = vmatprep.subr.mxu1 %v774_v14  ;;  %v1056_v49 = vsel %vm1037_vm7, %v1049_v34, %v1055_v5 }
 0x10f   : > { %844 = vmatpush1.msra.mxu0 %v772_v15  ;;  %1771 = vmatpush3.msra.mxu1 %v774_v14  ;;  %v1058_v50 = vsel %vm1037_vm7, %v1051_v35, %v1057_v6  ;;  %v1054_v25 = vsel %vm1037_vm7, %v1047_v39, %v1053_v7 }
 0x110   : > { %1726 = vmatmul.mubr.msk.f32.vlgmr.msra.gmra.mxu0 %vm806_vm4, %v2007_v33  ;;  %1773 = vmatmul.mubr.msk.f32.vlgmr.msra.gmra.mxu1 %vm806_vm4, %v2320_v4 }
 0x111   : > { %1129 = vmatprep.subr.mxu0 %v1086_v22  ;;  %1775 = vmatprep.subr.mxu1 %v1088_v20 }
 0x112   : > { %1130 = vmatpush1.msra.mxu0 %v1084_v21  ;;  %1776 = vmatpush3.msra.mxu1 %v1088_v20 }
 0x113   : > { %1131 = vmatprep.subr.mxu0 %v2103_v45  ;;  %1777 = vmatprep.subr.mxu1 %v2108_v46  ;;  %v984_v45 = vld [vmem:[#allocation2 + $0x8] sm:$0xf8] }
 0x114   : > { %1132 = vmatpush1.msra.mxu0 %v2113_v47  ;;  %1778 = vmatpush3.msra.mxu1 %v2108_v46  ;;  %v985_v46 = vld [vmem:[#allocation2 + $0x10] sm:$0xf8]  ;;  %v1062_v47 = vsel %vm1037_vm7, %v1055_v5, %v1061_v54  ;;  %v1041_v54 = vrot.slane %v984_v45, 3 }
 0x115   : > { %1133 = vmatprep.subr.mxu0 %v2153_v17  ;;  %1779 = vmatprep.subr.mxu1 %v2156_v18  ;;  %v1064_v17 = vsel %vm1037_vm7, %v1057_v6, %v1063_v55  ;;  %v1044_v55 = vrot.slane %v985_v46, 3 }
 0x116   : > { %1134 = vmatpush1.msra.mxu0 %v2159_v19  ;;  %1780 = vmatpush3.msra.mxu1 %v2156_v18  ;;  %v1042_v18 = vrot.slane %v2300_v53, 3  ;;  %v1045_v19 = vrot.slane %v2302_v57, 3 }
 0x117   : > { %1135 = vmatprep.subr.mxu0 %v2201_v59  ;;  %1781 = vmatprep.subr.mxu1 %v2206_v60  ;;  %v983_v59 = vld [vmem:[#allocation2] sm:$0xf8] }
 0x118   : > { %883 = vmatprep.mubr.f32.mxu0 %v1846_v36  ;;  %1136 = vmatpush1.msra.mxu0 %v2211_v61  ;;  %v1039_v61 = vrot.slane %v2304_v58, 3  ;;  %v1038_v26 = vrot.slane %v983_v59, 3  ;;  %v1050_v51 = vsel %vm1037_vm7, %v1042_v18, %v1049_v34  ;;  %v1043_v8 = vsel %vm1037_vm7, %v1041_v54, %v1042_v18 }
 0x119   : > { %1782 = vmatpush3.msra.mxu1 %v2206_v60  ;;  %1727 = vmatmul.mubr.msk.f32.gmra.mxu0 %vm806_vm4, %v2320_v4  ;;  %v1060_v60 = vsel %vm1037_vm7, %v1053_v7, %v1059_v56  ;;  %v1052_v56 = vsel %vm1037_vm7, %v1045_v19, %v1051_v35  ;;  %v1046_v9 = vsel %vm1037_vm7, %v1044_v55, %v1045_v19 }
 0x11a   : > { %1137 = vmatprep.subr.mxu0 %v1062_v47  ;;  %1783 = vmatprep.subr.mxu1 %v1064_v17  ;;  %v1048_v27 = vsel %vm1037_vm7, %v1039_v61, %v1047_v39  ;;  %v1040_v10 = vsel %vm1037_vm7, %v1038_v26, %v1039_v61 }
 0x11b   : > { %1138 = vmatpush1.msra.mxu0 %v1060_v60  ;;  %1784 = vmatpush3.msra.mxu1 %v1064_v17 }
 0x11c   : > { %1139 = vmatprep.subr.mxu0 %v1056_v49  ;;  %1785 = vmatprep.subr.mxu1 %v1058_v50 }
 0x11d   : > { %1140 = vmatpush1.msra.mxu0 %v1054_v25  ;;  %1786 = vmatpush3.msra.mxu1 %v1058_v50 }
 0x11e   : > { %1141 = vmatprep.subr.mxu0 %v1050_v51  ;;  %1787 = vmatprep.subr.mxu1 %v1052_v56 }
 0x11f   : > { %1142 = vmatpush1.msra.mxu0 %v1048_v27  ;;  %1788 = vmatpush3.msra.mxu1 %v1052_v56 }
 0x120   : > { %1143 = vmatprep.subr.mxu0 %v1043_v8  ;;  %1789 = vmatprep.subr.mxu1 %v1046_v9 }
 0x121   : > { %1144 = vmatpush1.msra.mxu0 %v1040_v10  ;;  %1177 = vmatprep.mubr.f32.mxu0 %v1846_v36 }
 0x122   : > { %1790 = vmatpush3.msra.mxu1 %v1046_v9  ;;  %1791 = vmatprep.mubr.msk.f32.mxu1 %vm806_vm4, %v2007_v33 }
 0x123   : > { %1730 = vmatmul.mubr.msk.f32.vlgmr.msra.gmra.mxu0 %vm806_vm4, %v2007_v33  ;;  %1792 = vmatmul.mubr.msk.f32.vlgmr.msra.gmra.mxu1 %vm806_vm4, %v2320_v4 }
 0x124   : > { %1183 = vmatprep.mubr.f32.mxu0 %v1846_v36  ;;  %v804_v36 = vpop.permute.xlu0 %803 }
 0x127   : > { %1731 = vmatmul.mubr.msk.f32.gmra.mxu0 %vm806_vm4, %v2320_v4 }
 0x1d0   : > { %v879_v23 = vpop.f32.mrf.mxu0  ;;  %v2387_v28 = vpop.f32.mrf.mxu1 }
 0x1d1   : > { %v880_v63 = vadd.f32 %v879_v23, %v799_v32  ;;  %v962_v47 = vadd.f32 %v2387_v28, %v804_v36 }
 0x1d2   : > { %v881_v24 = vpop.f32.mrf.mxu0  ;;  %v956_v30 = vpop.f32.mrf.mxu1 }
 0x1d3   : > { %v971_v12 = vmul.f32 0.02, %v880_v63  ;;  %v957_v13 = vadd.f32 %v956_v30, %v799_v32  ;;  %vm965_vm4 = vcmp.ge.f32.partialorder %v880_v63, 0.0  ;;  %v882_v15 = vadd.f32 %v881_v24, %v799_v32 }
 0x1d4   : > { %v976_v19 = vmul.f32 0.02, %v962_v47  ;;  %vm970_vm13 = vcmp.ge.f32.partialorder %v962_v47, 0.0 }
 0x1d5   : > { %v973_v20 = vmul.f32 0.02, %v957_v13  ;;  %v977_v5 = vsel %vm965_vm4, %v880_v63, %v971_v12  ;;  %vm967_vm6 = vcmp.ge.f32.partialorder %v957_v13, 0.0  ;;  %v972_v6 = vmul.f32 0.02, %v882_v15 }
 0x1d6   : > { %vm966_vm7 = vcmp.ge.f32.partialorder %v882_v15, 0.0  ;;  %v982_v59 = vsel %vm970_vm13, %v962_v47, %v976_v19 }
 0x1d7   : > { %v979_v39 = vsel %vm967_vm6, %v957_v13, %v973_v20  ;;  %v978_v46 = vsel %vm966_vm7, %v882_v15, %v972_v6 }
 0x1d9   : > { %v885_v29 = vpop.f32.mrf.mxu0 }
 0x1da   : > { %v886_v7 = vadd.f32 %v885_v29, %v804_v36 }
 0x1db   : > { %v887_v31 = vpop.f32.mrf.mxu0 }
 0x1dc   : > { %v888_v21 = vadd.f32 %v887_v31, %v804_v36  ;;  %v974_v45 = vmul.f32 0.02, %v886_v7  ;;  %vm968_vm11 = vcmp.ge.f32.partialorder %v886_v7, 0.0 }
 0x1de   : > { %v975_v35 = vmul.f32 0.02, %v888_v21  ;;  %vm969_vm8 = vcmp.ge.f32.partialorder %v888_v21, 0.0  ;;  %v980_v18 = vsel %vm968_vm11, %v886_v7, %v974_v45 }
 0x1e0   : > { %v981_v17 = vsel %vm969_vm8, %v888_v21, %v975_v35 }
 0x1e3   : > { %v1179_v37 = vpop.f32.mrf.mxu0  ;;  %v1793_v38 = vpop.f32.mrf.mxu1 }
 0x1e4   : > { %v1180_v40 = vadd.f32 %v1179_v37, %v799_v32  ;;  %v1262_v2 = vadd.f32 %v1793_v38, %v804_v36 }
 0x1e5   : > { %v1181_v33 = vpop.f32.mrf.mxu0  ;;  %v1256_v41 = vpop.f32.mrf.mxu1 }
 0x1e6   : > { %v1271_v42 = vmul.f32 0.02, %v1180_v40  ;;  %v1182_v43 = vadd.f32 %v1181_v33, %v799_v32  ;;  %v1257_v44 = vadd.f32 %v1256_v41, %v799_v32  ;;  %vm1265_vm14 = vcmp.ge.f32.partialorder %v1180_v40, 0.0 }
 0x1e7   : > { %v1185_v48 = vpop.f32.mrf.mxu0  ;;  %v1276_v16 = vmul.f32 0.02, %v1262_v2  ;;  %vm1270_vm5 = vcmp.ge.f32.partialorder %v1262_v2, 0.0 }
 0x1e8   : > { %v1272_v52 = vmul.f32 0.02, %v1182_v43  ;;  %v1273_v53 = vmul.f32 0.02, %v1257_v44  ;;  %v1186_v57 = vadd.f32 %v1185_v48, %v804_v36  ;;  %v1277_v58 = vsel %vm1265_vm14, %v1180_v40, %v1271_v42 }
 0x1e9   : > { %v1187_v62 = vpop.f32.mrf.mxu0  ;;  %1289 = vrot.lane.b32.xlu1 %v1277_v58, %s1848_s10  ;;  %vm1267_vm15 = vcmp.ge.f32.partialorder %v1257_v44, 0.0  ;;  %vm1266_vm0 = vcmp.ge.f32.partialorder %v1182_v43, 0.0  ;;  %v1282_v34 = vsel %vm1270_vm5, %v1262_v2, %v1276_v16  ;;  %vm1301_vm14 = vcmask 7168  }
 0x1ea   : > { %v1188_v0 = vadd.f32 %v1187_v62, %v804_v36  ;;  %v1279_v1 = vsel %vm1267_vm15, %v1257_v44, %v1273_v53  ;;  %v1274_v3 = vmul.f32 0.02, %v1186_v57  ;;  %v1278_v11 = vsel %vm1266_vm0, %v1182_v43, %v1272_v52 }
 0x1eb   : > { %1293 = vrot.lane.b32.xlu0 %v1279_v1, %s1848_s10  ;;  %vm1268_vm2 = vcmp.ge.f32.partialorder %v1186_v57, 0.0 }
 0x1ec   : > { %v1275_v4 = vmul.f32 0.02, %v1188_v0  ;;  %vm1269_vm1 = vcmp.ge.f32.partialorder %v1188_v0, 0.0  ;;  %v1280_v22 = vsel %vm1268_vm2, %v1186_v57, %v1274_v3 }
 0x1ed   : > { %1291 = vrot.lane.b32.xlu1 %v1278_v11, %s1848_s10 }
 0x1ee   : > { %v1281_v14 = vsel %vm1269_vm1, %v1188_v0, %v1275_v4 }
 0x1ef   : > { %1297 = vrot.lane.b32.xlu0 %v1281_v14, %s1848_s10 }
 0x1f1   : > { %1295 = vrot.lane.b32.xlu1 %v1280_v22, %s1848_s10 }
 0x1f3   : > { %1320 = vrot.lane.b32.xlu0 %v977_v5, %s1844_s27 }
 0x1f5   : > { %1299 = vrot.lane.b32.xlu1 %v1282_v34, %s1848_s10 }
 0x1f7   : > { %1324 = vrot.lane.b32.xlu0 %v979_v39, %s1844_s27 }
 0x1f9   : > { %1322 = vrot.lane.b32.xlu1 %v978_v46, %s1844_s27 }
 0x1fb   : > { %1328 = vrot.lane.b32.xlu0 %v981_v17, %s1844_s27 }
 0x1fd   : > { %1326 = vrot.lane.b32.xlu1 %v980_v18, %s1844_s27 }
 0x201   : > { %1330 = vrot.lane.b32.xlu1 %v982_v59, %s1844_s27 }
 0x25b   : > { %v1290_v60 = vpop.permute.xlu1 %1289 }
 0x25c   : > { %v1312_v61 = vsel %vm1301_vm14, -inf, %v1290_v60 }
 0x25d   : > { %v1294_v49 = vpop.permute.xlu0 %1293  ;;  %1487 = vrot.lane.b32.xlu0 %v1312_v61, %s1844_s27 }
 0x25f   : > { %v1292_v50 = vpop.permute.xlu1 %1291 }
 0x260   : > { %v1302_v54 = vsel %vm1301_vm14, %v1290_v60, %v1292_v50  ;;  %v1303_v55 = vsel %vm1301_vm14, %v1292_v50, %v1294_v49 }
 0x261   : > { %v1298_v25 = vpop.permute.xlu0 %1297  ;;  %1489 = vrot.lane.b32.xlu1 %v1302_v54, %s1844_s27  ;;  %1491 = vrot.lane.b32.xlu0 %v1303_v55, %s1844_s27 }
 0x263   : > { %v1296_v26 = vpop.permute.xlu1 %1295 }
 0x264   : > { %v1313_v51 = vsel %vm1301_vm14, -inf, %v1296_v26  ;;  %v1304_v56 = vsel %vm1301_vm14, %v1296_v26, %v1298_v25 }
 0x265   : > { %1493 = vrot.lane.b32.xlu1 %v1313_v51, %s1844_s27  ;;  %1495 = vrot.lane.b32.xlu0 %v1304_v56, %s1844_s27  ;;  %v1321_v27 = vpop.permute.xlu0 %1320 }
 0x267   : > { %v1300_v8 = vpop.permute.xlu1 %1299 }
 0x268   : > { %v1305_v9 = vsel %vm1301_vm14, %v1298_v25, %v1300_v8 }
 0x269   : > { %1497 = vrot.lane.b32.xlu1 %v1305_v9, %s1844_s27  ;;  %v1325_v10 = vpop.permute.xlu0 %1324 }
 0x26a   : > { %v1344_v38 = vmax.f32 %v979_v39, %v1325_v10 }
 0x26b   : > { %v1323_v23 = vpop.permute.xlu1 %1322 }
 0x26c   : > { %v1332_v24 = vsel %vm272_vm12, %v1321_v27, %v1323_v23  ;;  %v1333_v28 = vsel %vm272_vm12, %v1323_v23, %v1325_v10 }
 0x26d   : > { %v1342_v29 = vmax.f32 %v977_v5, %v1332_v24  ;;  %v1343_v30 = vmax.f32 %v978_v46, %v1333_v28  ;;  %v1329_v31 = vpop.permute.xlu0 %1328 }
 0x26f   : > { %v1327_v32 = vpop.permute.xlu1 %1326  ;;  %1354 = vrot.lane.b32.xlu0 %v1342_v29, %s1842_s25  ;;  %1356 = vrot.lane.b32.xlu1 %v1343_v30, %s1842_s25 }
 0x270   : > { %v1334_v37 = vsel %vm272_vm12, %v1327_v32, %v1329_v31 }
 0x271   : > { %v1345_v40 = vmax.f32 %v980_v18, %v1334_v37 }
 0x273   : > { %v1331_v33 = vpop.permute.xlu1 %1330  ;;  %1358 = vrot.lane.b32.xlu0 %v1344_v38, %s1842_s25  ;;  %1360 = vrot.lane.b32.xlu1 %v1345_v40, %s1842_s25 }
 0x274   : > { %v1335_v41 = vsel %vm272_vm12, %v1329_v31, %v1331_v33  ;;  %v1347_v42 = vmax.f32 %v982_v59, %v1331_v33 }
 0x275   : > { %v1346_v43 = vmax.f32 %v981_v17, %v1335_v41 }
 0x277   : > { %1362 = vrot.lane.b32.xlu0 %v1346_v43, %s1842_s25  ;;  %1364 = vrot.lane.b32.xlu1 %v1347_v42, %s1842_s25 }
 0x2cf   : > { %v1488_v44 = vpop.permute.xlu0 %1487 }
 0x2d3   : > { %v1490_v36 = vpop.permute.xlu1 %1489  ;;  %v1492_v48 = vpop.permute.xlu0 %1491 }
 0x2d4   : > { %v1500_v52 = vsel %vm272_vm12, %v1490_v36, %v1492_v48  ;;  %v1511_v53 = vmax.f32 %v1303_v55, %v1492_v48  ;;  %v1499_v57 = vsel %vm272_vm12, %v1488_v44, %v1490_v36 }
 0x2d5   : > { %v1510_v58 = vmax.f32 %v1302_v54, %v1500_v52  ;;  %v1509_v0 = vmax.f32 %v1312_v61, %v1499_v57 }
 0x2d6   : > { %1525 = vrot.lane.b32.xlu0 %v1511_v53, %s1842_s25 }
 0x2d7   : > { %v1494_v62 = vpop.permute.xlu1 %1493  ;;  %1523 = vrot.lane.b32.xlu1 %v1510_v58, %s1842_s25  ;;  %v1496_v63 = vpop.permute.xlu0 %1495 }
 0x2d8   : > { %v1501_v1 = vsel %vm272_vm12, %v1494_v62, %v1496_v63 }
 0x2d9   : > { %v1512_v2 = vmax.f32 %v1313_v51, %v1501_v1 }
 0x2da   : > { %1521 = vrot.lane.b32.xlu0 %v1509_v0, %s1842_s25 }
 0x2db   : > { %v1498_v3 = vpop.permute.xlu1 %1497  ;;  %1527 = vrot.lane.b32.xlu1 %v1512_v2, %s1842_s25 }
 0x2dc   : > { %v1502_v4 = vsel %vm272_vm12, %v1496_v63, %v1498_v3  ;;  %v1514_v11 = vmax.f32 %v1305_v9, %v1498_v3 }
 0x2dd   : > { %v1513_v12 = vmax.f32 %v1304_v56, %v1502_v4 }
 0x2df   : > { %1529 = vrot.lane.b32.xlu0 %v1513_v12, %s1842_s25  ;;  %1531 = vrot.lane.b32.xlu1 %v1514_v11, %s1842_s25 }
 0x2e1   : > { %v1357_v13 = vpop.permute.xlu1 %1356  ;;  %v1355_v14 = vpop.permute.xlu0 %1354 }
 0x2e2   : > { %v1366_v15 = vsel %vm321_vm10, %v1355_v14, %v1357_v13 }
 0x2e3   : > { %v1376_v16 = vmax.f32 %v1342_v29, %v1366_v15 }
 0x2e5   : > { %v1361_v22 = vpop.permute.xlu1 %1360  ;;  %1388 = vrot.lane.b32.xlu0 %v1376_v16, %s1841_s24  ;;  %v1359_v20 = vpop.permute.xlu0 %1358 }
 0x2e6   : > { %v1367_v21 = vsel %vm321_vm10, %v1357_v13, %v1359_v20  ;;  %v1378_v5 = vmax.f32 %v1344_v38, %v1359_v20 }
 0x2e7   : > { %v1377_v6 = vmax.f32 %v1343_v30, %v1367_v21 }
 0x2e9   : > { %v1365_v7 = vpop.permute.xlu1 %1364  ;;  %1392 = vrot.lane.b32.xlu0 %v1378_v5, %s1841_s24  ;;  %1390 = vrot.lane.b32.xlu1 %v1377_v6, %s1841_s24  ;;  %v1363_v34 = vpop.permute.xlu0 %1362 }
 0x2ea   : > { %v1368_v35 = vsel %vm321_vm10, %v1361_v22, %v1363_v34  ;;  %v1369_v39 = vsel %vm321_vm10, %v1363_v34, %v1365_v7  ;;  %v1381_v47 = vmax.f32 %v1347_v42, %v1365_v7 }
 0x2eb   : > { %v1379_v45 = vmax.f32 %v1345_v40, %v1368_v35  ;;  %v1380_v46 = vmax.f32 %v1346_v43, %v1369_v39 }
 0x2ed   : > { %1396 = vrot.lane.b32.xlu0 %v1380_v46, %s1841_s24  ;;  %1394 = vrot.lane.b32.xlu1 %v1379_v45, %s1841_s24 }
 0x2f1   : > { %1398 = vrot.lane.b32.xlu1 %v1381_v47, %s1841_s24 }
 0x348   : > { %v1526_v17 = vpop.permute.xlu0 %1525 }
 0x349   : > { %v1545_v18 = vmax.f32 %v1511_v53, %v1526_v17  ;;  %v1524_v19 = vpop.permute.xlu1 %1523 }
 0x34a   : > { %v1534_v59 = vsel %vm321_vm10, %v1524_v19, %v1526_v17 }
 0x34b   : > { %v1544_v60 = vmax.f32 %v1510_v58, %v1534_v59  ;;  %1559 = vrot.lane.b32.xlu0 %v1545_v18, %s1841_s24 }
 0x34c   : > { %v1522_v61 = vpop.permute.xlu0 %1521 }
 0x34d   : > { %v1533_v49 = vsel %vm321_vm10, %v1522_v61, %v1524_v19  ;;  %v1528_v50 = vpop.permute.xlu1 %1527  ;;  %1557 = vrot.lane.b32.xlu1 %v1544_v60, %s1841_s24 }
 0x34e   : > { %v1543_v54 = vmax.f32 %v1509_v0, %v1533_v49 }
 0x350   : > { %1555 = vrot.lane.b32.xlu0 %v1543_v54, %s1841_s24 }
 0x351   : > { %v1532_v55 = vpop.permute.xlu1 %1531  ;;  %v1530_v25 = vpop.permute.xlu0 %1529 }
 0x352   : > { %v1535_v26 = vsel %vm321_vm10, %v1528_v50, %v1530_v25  ;;  %v1536_v51 = vsel %vm321_vm10, %v1530_v25, %v1532_v55  ;;  %v1548_v8 = vmax.f32 %v1514_v11, %v1532_v55 }
 0x353   : > { %v1546_v56 = vmax.f32 %v1512_v2, %v1535_v26  ;;  %v1547_v27 = vmax.f32 %v1513_v12, %v1536_v51 }
 0x355   : > { %1563 = vrot.lane.b32.xlu0 %v1547_v27, %s1841_s24  ;;  %1561 = vrot.lane.b32.xlu1 %v1546_v56, %s1841_s24 }
 0x357   : > { %v1389_v9 = vpop.permute.xlu0 %1388 }
 0x359   : > { %1565 = vrot.lane.b32.xlu1 %v1548_v8, %s1841_s24 }
 0x35b   : > { %v1391_v10 = vpop.permute.xlu1 %1390  ;;  %v1393_v23 = vpop.permute.xlu0 %1392 }
 0x35c   : > { %v1400_v24 = vsel %vm419_vm9, %v1389_v9, %v1391_v10  ;;  %v1401_v28 = vsel %vm419_vm9, %v1391_v10, %v1393_v23  ;;  %v1412_v38 = vmax.f32 %v1378_v5, %v1393_v23 }
 0x35d   : > { %v1410_v29 = vmax.f32 %v1376_v16, %v1400_v24  ;;  %v1411_v30 = vmax.f32 %v1377_v6, %v1401_v28 }
 0x35f   : > { %v1395_v31 = vpop.permute.xlu1 %1394  ;;  %1422 = vrot.lane.b32.xlu0 %v1410_v29, %s1837_s20  ;;  %1424 = vrot.lane.b32.xlu1 %v1411_v30, %s1837_s20  ;;  %v1397_v32 = vpop.permute.xlu0 %1396 }
 0x360   : > { %v1402_v37 = vsel %vm419_vm9, %v1395_v31, %v1397_v32 }
 0x361   : > { %v1413_v40 = vmax.f32 %v1379_v45, %v1402_v37 }
 0x363   : > { %v1399_v33 = vpop.permute.xlu1 %1398  ;;  %1426 = vrot.lane.b32.xlu0 %v1412_v38, %s1837_s20  ;;  %1428 = vrot.lane.b32.xlu1 %v1413_v40, %s1837_s20 }
 0x364   : > { %v1403_v41 = vsel %vm419_vm9, %v1397_v32, %v1399_v33  ;;  %v1415_v42 = vmax.f32 %v1381_v47, %v1399_v33 }
 0x365   : > { %v1414_v43 = vmax.f32 %v1380_v46, %v1403_v41 }
 0x367   : > { %1430 = vrot.lane.b32.xlu0 %v1414_v43, %s1837_s20  ;;  %1432 = vrot.lane.b32.xlu1 %v1415_v42, %s1837_s20 }
 0x3bd   : > { %v1560_v44 = vpop.permute.xlu0 %1559 }
 0x3be   : > { %v1579_v36 = vmax.f32 %v1545_v18, %v1560_v44 }
 0x3bf   : > { %v1558_v48 = vpop.permute.xlu1 %1557 }
 0x3c0   : > { %v1568_v52 = vsel %vm419_vm9, %v1558_v48, %v1560_v44  ;;  %1593 = vrot.lane.b32.xlu0 %v1579_v36, %s1837_s20 }
 0x3c1   : > { %v1578_v53 = vmax.f32 %v1544_v60, %v1568_v52 }
 0x3c2   : > { %v1556_v57 = vpop.permute.xlu0 %1555 }
 0x3c3   : > { %v1567_v58 = vsel %vm419_vm9, %v1556_v57, %v1558_v48  ;;  %1591 = vrot.lane.b32.xlu1 %v1578_v53, %s1837_s20 }
 0x3c4   : > { %v1577_v62 = vmax.f32 %v1543_v54, %v1567_v58 }
 0x3c6   : > { %1589 = vrot.lane.b32.xlu0 %v1577_v62, %s1837_s20 }
 0x3c7   : > { %v1562_v63 = vpop.permute.xlu1 %1561  ;;  %v1564_v0 = vpop.permute.xlu0 %1563 }
 0x3c8   : > { %v1569_v1 = vsel %vm419_vm9, %v1562_v63, %v1564_v0 }
 0x3c9   : > { %v1580_v2 = vmax.f32 %v1546_v56, %v1569_v1 }
 0x3cb   : > { %v1566_v3 = vpop.permute.xlu1 %1565  ;;  %1595 = vrot.lane.b32.xlu1 %v1580_v2, %s1837_s20 }
 0x3cc   : > { %v1570_v4 = vsel %vm419_vm9, %v1564_v0, %v1566_v3  ;;  %v1582_v11 = vmax.f32 %v1548_v8, %v1566_v3  ;;  %vm1468_vm9 = vcmask 916480  }
 0x3cd   : > { %v1581_v12 = vmax.f32 %v1547_v27, %v1570_v4 }
 0x3cf   : > { %1597 = vrot.lane.b32.xlu0 %v1581_v12, %s1837_s20  ;;  %1599 = vrot.lane.b32.xlu1 %v1582_v11, %s1837_s20 }
 0x3d1   : > { %v1425_v13 = vpop.permute.xlu1 %1424  ;;  %v1423_v14 = vpop.permute.xlu0 %1422 }
 0x3d2   : > { %v1434_v15 = vsel %vm615_vm3, %v1423_v14, %v1425_v13 }
 0x3d3   : > { %v2475_v16 = vmax.f32 %v1410_v29, %v1434_v15 }
 0x3d5   : > { %v1429_v22 = vpop.permute.xlu1 %1428  ;;  %1456 = vrot.lane.b32.xlu0 %v2475_v16, %s1849_s11  ;;  %v1427_v20 = vpop.permute.xlu0 %1426 }
 0x3d6   : > { %v1435_v21 = vsel %vm615_vm3, %v1425_v13, %v1427_v20  ;;  %v1446_v5 = vmax.f32 %v1412_v38, %v1427_v20 }
 0x3d7   : > { %v1445_v6 = vmax.f32 %v1411_v30, %v1435_v21 }
 0x3d9   : > { %v1433_v7 = vpop.permute.xlu1 %1432  ;;  %1460 = vrot.lane.b32.xlu0 %v1446_v5, %s1849_s11  ;;  %1458 = vrot.lane.b32.xlu1 %v1445_v6, %s1849_s11  ;;  %v1431_v34 = vpop.permute.xlu0 %1430 }
 0x3da   : > { %v1436_v35 = vsel %vm615_vm3, %v1429_v22, %v1431_v34  ;;  %v1437_v39 = vsel %vm615_vm3, %v1431_v34, %v1433_v7  ;;  %v2492_v47 = vmax.f32 %v1415_v42, %v1433_v7 }
 0x3db   : > { %v2484_v45 = vmax.f32 %v1413_v40, %v1436_v35  ;;  %v2486_v46 = vmax.f32 %v1414_v43, %v1437_v39 }
 0x3dd   : > { %1464 = vrot.lane.b32.xlu0 %v2486_v46, %s1849_s11  ;;  %1462 = vrot.lane.b32.xlu1 %v2484_v45, %s1849_s11 }
 0x3e1   : > { %1466 = vrot.lane.b32.xlu1 %v2492_v47, %s1849_s11 }
 0x432   : > { %v1594_v17 = vpop.permute.xlu0 %1593 }
 0x433   : > { %v1613_v18 = vmax.f32 %v1579_v36, %v1594_v17 }
 0x435   : > { %v1592_v19 = vpop.permute.xlu1 %1591  ;;  %1627 = vrot.lane.b32.xlu0 %v1613_v18, %s1849_s11 }
 0x436   : > { %v1602_v59 = vsel %vm615_vm3, %v1592_v19, %v1594_v17 }
 0x437   : > { %v1612_v60 = vmax.f32 %v1578_v53, %v1602_v59 }
 0x438   : > { %v1590_v61 = vpop.permute.xlu0 %1589 }
 0x439   : > { %v1601_v49 = vsel %vm615_vm3, %v1590_v61, %v1592_v19  ;;  %1625 = vrot.lane.b32.xlu1 %v1612_v60, %s1849_s11 }
 0x43a   : > { %v1611_v50 = vmax.f32 %v1577_v62, %v1601_v49 }
 0x43c   : > { %1623 = vrot.lane.b32.xlu0 %v1611_v50, %s1849_s11 }
 0x43d   : > { %v1596_v54 = vpop.permute.xlu1 %1595 }
 0x441   : > { %v1600_v55 = vpop.permute.xlu1 %1599  ;;  %v1598_v25 = vpop.permute.xlu0 %1597 }
 0x442   : > { %v1603_v26 = vsel %vm615_vm3, %v1596_v54, %v1598_v25  ;;  %v1604_v51 = vsel %vm615_vm3, %v1598_v25, %v1600_v55  ;;  %v1616_v8 = vmax.f32 %v1582_v11, %v1600_v55  ;;  %vm1659_vm3 = vcmask 367616  }
 0x443   : > { %v1614_v56 = vmax.f32 %v1580_v2, %v1603_v26  ;;  %v1615_v27 = vmax.f32 %v1581_v12, %v1604_v51 }
 0x445   : > { %1631 = vrot.lane.b32.xlu0 %v1615_v27, %s1849_s11  ;;  %1629 = vrot.lane.b32.xlu1 %v1614_v56, %s1849_s11 }
 0x447   : > { %v1457_v9 = vpop.permute.xlu0 %1456 }
 0x449   : > { %1633 = vrot.lane.b32.xlu1 %v1616_v8, %s1849_s11 }
 0x44b   : > { %v1459_v10 = vpop.permute.xlu1 %1458  ;;  %v1461_v23 = vpop.permute.xlu0 %1460 }
 0x44c   : > { %v1481_v31 = vmax.f32 %v1446_v5, %v1461_v23  ;;  %v1470_v37 = vsel %vm1468_vm9, %v1459_v10, %v1461_v23  ;;  %v1469_v41 = vsel %vm1468_vm9, %v1457_v9, %v1459_v10 }
 0x44d   : > { %v1480_v42 = vmax.f32 %v1445_v6, %v1470_v37  ;;  %v1479_v52 = vmax.f32 %v2475_v16, %v1469_v41 }
 0x44f   : > { %v1463_v24 = vpop.permute.xlu1 %1462  ;;  %v1465_v28 = vpop.permute.xlu0 %1464 }
 0x450   : > { %v1471_v58 = vsel %vm1468_vm9, %v1463_v24, %v1465_v28 }
 0x451   : > { %v1482_v1 = vmax.f32 %v2484_v45, %v1471_v58 }
 0x453   : > { %v1467_v29 = vpop.permute.xlu1 %1466 }
 0x454   : > { %v1472_v3 = vsel %vm1468_vm9, %v1465_v28, %v1467_v29  ;;  %v1484_v12 = vmax.f32 %v2492_v47, %v1467_v29 }
 0x455   : > { %v1483_v15 = vmax.f32 %v2486_v46, %v1472_v3 }
 0x4a7   : > { %v1628_v30 = vpop.permute.xlu0 %1627 }
 0x4a8   : > { %v1647_v32 = vmax.f32 %v1613_v18, %v1628_v30 }
 0x4aa   : > { %v1653_v38 = vmax.f32 %v1481_v31, %v1647_v32 }
 0x4ab   : > { %v1626_v40 = vpop.permute.xlu1 %1625 }
 0x4ac   : > { %1660 = vst.msk [vmem:[%s2510_s17 + $0x10] sm:$0xff] %vm1659_vm3, %v1653_v38  ;;  %v1636_v33 = vsel %vm1468_vm9, %v1626_v40, %v1628_v30 }
 0x4ad   : > { %v1646_v43 = vmax.f32 %v1612_v60, %v1636_v33 }
 0x4ae   : > { %v1624_v44 = vpop.permute.xlu0 %1623 }
 0x4af   : > { %v1652_v36 = vmax.f32 %v1480_v42, %v1646_v43  ;;  %v1635_v48 = vsel %vm1468_vm9, %v1624_v44, %v1626_v40 }
 0x4b0   : > { %v1645_v53 = vmax.f32 %v1611_v50, %v1635_v48 }
 0x4b1   : > { %1658 = vst [vmem:[%s2510_s17 + $0x8] sm:$0xff] %v1652_v36 }
 0x4b2   : > { %v1651_v57 = vmax.f32 %v1479_v52, %v1645_v53 }
 0x4b4   : > { %1657 = vst [vmem:[%s2510_s17] sm:$0xff] %v1651_v57 }
 0x4b7   : > { %v1630_v62 = vpop.permute.xlu1 %1629  ;;  %v1632_v63 = vpop.permute.xlu0 %1631 }
 0x4b8   : > { %v1637_v0 = vsel %vm1468_vm9, %v1630_v62, %v1632_v63 }
 0x4b9   : > { %v1648_v2 = vmax.f32 %v1614_v56, %v1637_v0 }
 0x4bb   : > { %v1654_v4 = vmax.f32 %v1482_v1, %v1648_v2  ;;  %v1634_v11 = vpop.permute.xlu1 %1633 }
 0x4bc   : > { %v1638_v13 = vsel %vm1468_vm9, %v1632_v63, %v1634_v11  ;;  %v1650_v14 = vmax.f32 %v1616_v8, %v1634_v11 }
 0x4bd   : > { %1661 = vst [vmem:[%s2510_s17 + $0x18] sm:$0xff] %v1654_v4  ;;  %v1649_v16 = vmax.f32 %v1615_v27, %v1638_v13 }
 0x4be   : > { %v1656_v22 = vmax.f32 %v1484_v12, %v1650_v14 }
 0x4bf   : > { %v1655_v20 = vmax.f32 %v1483_v15, %v1649_v16 }
 0x4c0   : > { %1663 = vst.msk [vmem:[%s2510_s17 + $0x28] sm:$0xff] %vm1659_vm3, %v1656_v22 }
 0x4c1   : > { %1662 = vst [vmem:[%s2510_s17 + $0x20] sm:$0xff] %v1655_v20 }
 0x4c2 PF: > { %s13_s12 = sadd.s32 1, %s1832_s12  }
 0x4c3   : > { %p10_p4 = scmp.ge.s32.totalorder %s13_s12, 4  }
 0x4c5   :  { %12 = sbr.rel (!%p10_p4) target bundleno = 1 (0x1), region = 128 }

// kernel: downsample_fft_full.4
= control target key start
LH: loop header
LB: loop body
LE: loop exit
PB: predicated region body
PF: predicated region fallthrough
CT: control target
= control target key end

     0   :  { %s1464_s12 = smov 0   ;;  %s1974_s0 = inlined_call_operand.vmem [shape: f32[2,64,76], index: 0, kind: input, shape index: {}]   ;;  %s1975_s1 = inlined_call_operand.vmem [shape: f32[32,512], index: 1, kind: input, shape index: {}]   ;;  %s1976_s2 = inlined_call_operand.vmem [shape: f32[32,1], index: 2, kind: input, shape index: {}]   ;;  %s1977_s3 = inlined_call_operand.vmem [shape: f32[2,32,54], index: 3, kind: output, shape index: {}]  }
   0x1 LB: > { %s1217_s13 = sadd.s32 4294967295, %s1432_s12   ;;  %p1221_p0 = scmp.ge.s32.totalorder %s1432_s12, 1  ;;  %s1432_s12 = sphi %s1464_s12, %s13_s12  }
   0x2   : > { %p137_p1 = scmp.lt.s32.totalorder %s1432_s12, 3 }
   0x4   : > { %p138_p2 = pnand %p1221_p0, %p137_p1 }
   0x6   : > { %141 = sbr.rel (%p138_p2) target bundleno = 1088 (0x440), region = 32 }
   0xb   : > { %p161_p3 = scmp.lt.s32.totalorder %s1217_s13, 1  ;;  %vm179_vm0 = vcmask 556032   ;;  %s1434_s18 = smov 125   ;;  %v1559_v8 = vld [vmem:[%s1975_s1 + $0x8] sm:$0xff]  ;;  %v1569_v9 = vld [vmem:[%s1975_s1 + $0x18] sm:$0xff]  ;;  %v452_v50 = vld [vmem:[%s1976_s2] sm:$0xff] }
   0xc   : > { %s1435_s19 = smov 127   ;;  %s1436_s20 = smov 121   ;;  %604 = vmatprep.mubr.f32.mxu0 %v1559_v8  ;;  %689 = vmatprep.mubr.f32.mxu1 %v1569_v9  ;;  %v453_v51 = vld [vmem:[%s1976_s2 + $0x8] sm:$0xff]  ;;  %v1442_v52 = vmov 0   ;;  %v454_v53 = vld [vmem:[%s1976_s2 + $0x10] sm:$0xff]  ;;  %v455_v58 = vld [vmem:[%s1976_s2 + $0x18] sm:$0xff] }
   0xd   : > { %s1991_s13 = smov (!%p161_p3, %s1217_s13), 1  ;;  %s1437_s21 = smov 123   ;;  %1424 = vset.pattern.permute.xlu0 %v1442_v52  ;;  %1425 = vset.pattern.permute.xlu1 %v1442_v52  ;;  %vm988_vm9 = vcmask 7168   ;;  %vm1157_vm10 = vcmask 441344  }
   0xe   : > { %s1228_s14 = sshll.u32 %s1991_s13, 6  ;;  %s1438_s22 = smov 126  }
   0xf   : > { %s165_s17 = scalar_lea.vmem %s1974_s0, %s1228_s14  ;;  %s1439_s23 = smov 124  }
  0x10   : > { %v178_v0 = vld [vmem:[%s165_s17 + $0x38] sm:$0xff]  ;;  %v177_v1 = vld [vmem:[%s165_s17 + $0x30] sm:$0xff]  ;;  %v176_v2 = vld [vmem:[%s165_s17 + $0x28] sm:$0xff]  ;;  %s1440_s24 = smov 122   ;;  %s1441_s29 = smov 120  }
  0x11   : > { %286 = vrot.lane.b32.xlu0 %v178_v0, %s1434_s18  ;;  %187 = vst.msk [vmem:[#allocation2 + $0x38] sm:$0xff] %vm179_vm0, %v178_v0  ;;  %284 = vrot.lane.b32.xlu1 %v177_v1, %s1434_s18  ;;  %186 = vst.msk [vmem:[#allocation2 + $0x30] sm:$0xff] %vm179_vm0, %v177_v1  ;;  %v175_v3 = vld [vmem:[%s165_s17 + $0x20] sm:$0xff]  ;;  %v1483_v4 = vld [vmem:[%s165_s17 + $0x18] sm:$0xff] }
  0x12   : > { %185 = vst.msk [vmem:[#allocation2 + $0x28] sm:$0xff] %vm179_vm0, %v176_v2  ;;  %184 = vst.msk [vmem:[#allocation2 + $0x20] sm:$0xff] %vm179_vm0, %v175_v3  ;;  %v1488_v5 = vld [vmem:[%s165_s17 + $0x10] sm:$0xff]  ;;  %v1490_v6 = vld [vmem:[%s165_s17 + $0x8] sm:$0xff] }
  0x13   : > { %183 = vst.msk [vmem:[#allocation2 + $0x18] sm:$0xff] %vm179_vm0, %v1483_v4  ;;  %v1492_v7 = vld [vmem:[%s165_s17] sm:$0xff]  ;;  %182 = vst.msk [vmem:[#allocation2 + $0x10] sm:$0xff] %vm179_vm0, %v1488_v5 }
  0x14   : > { %181 = vst.msk [vmem:[#allocation2 + $0x8] sm:$0xff] %vm179_vm0, %v1490_v6  ;;  %180 = vst.msk [vmem:[#allocation2] sm:$0xff] %vm179_vm0, %v1492_v7 }
  0x15   : > { %222 = vrot.lane.b32.xlu0 %v178_v0, %s1435_s19  ;;  %414 = vrot.lane.b32.xlu1 %v178_v0, %s1436_s20 }
  0x19   : > { %220 = vrot.lane.b32.xlu0 %v177_v1, %s1435_s19  ;;  %350 = vrot.lane.b32.xlu1 %v178_v0, %s1437_s21 }
  0x1d   : > { %412 = vrot.lane.b32.xlu1 %v177_v1, %s1436_s20  ;;  %278 = vrot.lane.b32.xlu0 %v176_v2, %s1434_s18 }
  0x21   : > { %348 = vrot.lane.b32.xlu1 %v177_v1, %s1437_s21  ;;  %212 = vrot.lane.b32.xlu0 %v176_v2, %s1435_s19 }
  0x25   : > { %406 = vrot.lane.b32.xlu1 %v176_v2, %s1436_s20  ;;  %276 = vrot.lane.b32.xlu0 %v175_v3, %s1434_s18 }
  0x29   : > { %342 = vrot.lane.b32.xlu1 %v176_v2, %s1437_s21  ;;  %210 = vrot.lane.b32.xlu0 %v175_v3, %s1435_s19 }
  0x2d   : > { %404 = vrot.lane.b32.xlu1 %v175_v3, %s1436_s20  ;;  %270 = vrot.lane.b32.xlu0 %v1483_v4, %s1434_s18 }
  0x31   : > { %340 = vrot.lane.b32.xlu1 %v175_v3, %s1437_s21  ;;  %202 = vrot.lane.b32.xlu0 %v1483_v4, %s1435_s19 }
  0x35   : > { %398 = vrot.lane.b32.xlu1 %v1483_v4, %s1436_s20  ;;  %268 = vrot.lane.b32.xlu0 %v1488_v5, %s1434_s18 }
  0x39   : > { %334 = vrot.lane.b32.xlu1 %v1483_v4, %s1437_s21  ;;  %200 = vrot.lane.b32.xlu0 %v1488_v5, %s1435_s19 }
  0x3d   : > { %396 = vrot.lane.b32.xlu1 %v1488_v5, %s1436_s20  ;;  %262 = vrot.lane.b32.xlu0 %v1490_v6, %s1434_s18 }
  0x41   : > { %332 = vrot.lane.b32.xlu1 %v1488_v5, %s1437_s21  ;;  %192 = vrot.lane.b32.xlu0 %v1490_v6, %s1435_s19 }
  0x45   : > { %390 = vrot.lane.b32.xlu1 %v1490_v6, %s1436_s20  ;;  %260 = vrot.lane.b32.xlu0 %v1492_v7, %s1434_s18 }
  0x49   : > { %326 = vrot.lane.b32.xlu1 %v1490_v6, %s1437_s21  ;;  %190 = vrot.lane.b32.xlu0 %v1492_v7, %s1435_s19 }
  0x4d   : > { %388 = vrot.lane.b32.xlu1 %v1492_v7, %s1436_s20  ;;  %254 = vrot.lane.b32.xlu0 %v178_v0, %s1438_s22 }
  0x51   : > { %252 = vrot.lane.b32.xlu1 %v177_v1, %s1438_s22  ;;  %324 = vrot.lane.b32.xlu0 %v1492_v7, %s1437_s21  ;;  %s1443_s21 = smov 1  }
  0x55   : > { %318 = vrot.lane.b32.xlu1 %v178_v0, %s1439_s23  ;;  %382 = vrot.lane.b32.xlu0 %v178_v0, %s1440_s24 }
  0x59   : > { %380 = vrot.lane.b32.xlu1 %v177_v1, %s1440_s24  ;;  %246 = vrot.lane.b32.xlu0 %v176_v2, %s1438_s22 }
  0x5d   : > { %244 = vrot.lane.b32.xlu1 %v175_v3, %s1438_s22  ;;  %316 = vrot.lane.b32.xlu0 %v177_v1, %s1439_s23 }
  0x61   : > { %310 = vrot.lane.b32.xlu1 %v176_v2, %s1439_s23  ;;  %374 = vrot.lane.b32.xlu0 %v176_v2, %s1440_s24 }
  0x65   : > { %372 = vrot.lane.b32.xlu1 %v175_v3, %s1440_s24  ;;  %238 = vrot.lane.b32.xlu0 %v1483_v4, %s1438_s22 }
  0x69   : > { %236 = vrot.lane.b32.xlu1 %v1488_v5, %s1438_s22  ;;  %308 = vrot.lane.b32.xlu0 %v175_v3, %s1439_s23 }
  0x6d   : > { %302 = vrot.lane.b32.xlu1 %v1483_v4, %s1439_s23  ;;  %366 = vrot.lane.b32.xlu0 %v1483_v4, %s1440_s24 }
  0x71   : > { %364 = vrot.lane.b32.xlu1 %v1488_v5, %s1440_s24  ;;  %230 = vrot.lane.b32.xlu0 %v1490_v6, %s1438_s22 }
  0x75   : > { %228 = vrot.lane.b32.xlu1 %v1492_v7, %s1438_s22  ;;  %300 = vrot.lane.b32.xlu0 %v1488_v5, %s1439_s23 }
  0x79   : > { %294 = vrot.lane.b32.xlu1 %v1490_v6, %s1439_s23  ;;  %358 = vrot.lane.b32.xlu0 %v1490_v6, %s1440_s24 }
  0x7d   : > { %292 = vrot.lane.b32.xlu1 %v1492_v7, %s1439_s23  ;;  %356 = vrot.lane.b32.xlu0 %v1492_v7, %s1440_s24 }
  0x81   : > { %430 = vrot.lane.b32.xlu0 %v1483_v4, %s1441_s29  ;;  %428 = vrot.lane.b32.xlu1 %v1488_v5, %s1441_s29 }
  0x83   : > { %v287_v10 = vpop.permute.xlu0 %286  ;;  %v285_v11 = vpop.permute.xlu1 %284 }
  0x84   : > { %291 = vst.msk [vmem:[#allocation2 + $0xf8] sm:$0xff] %vm179_vm0, %v287_v10  ;;  %290 = vst.msk [vmem:[#allocation2 + $0xf0] sm:$0xff] %vm179_vm0, %v285_v11 }
  0x85   : > { %422 = vrot.lane.b32.xlu0 %v1490_v6, %s1441_s29  ;;  %420 = vrot.lane.b32.xlu1 %v1492_v7, %s1441_s29 }
  0x87   : > { %v223_v12 = vpop.permute.xlu0 %222  ;;  %v415_v13 = vpop.permute.xlu1 %414 }
  0x88   : > { %227 = vst.msk [vmem:[#allocation2 + $0x78] sm:$0xff] %vm179_vm0, %v223_v12  ;;  %419 = vst.msk [vmem:[#allocation2 + $0x1f8] sm:$0xff] %vm179_vm0, %v415_v13 }
  0x89   : > { %522 = vperm.xlu0 %1424, %v452_v50   ;;  %527 = vperm.xlu1 %1425, %v453_v51  }
  0x8b   : > { %v221_v14 = vpop.permute.xlu0 %220  ;;  %v351_v15 = vpop.permute.xlu1 %350  ;;  %v1590_v16 = vld [vmem:[#allocation2 + $0xf8] sm:$0xff]  ;;  %v1602_v21 = vld [vmem:[#allocation2 + $0xf0] sm:$0xff] }
  0x8c   : > { %226 = vst.msk [vmem:[#allocation2 + $0x70] sm:$0xff] %vm179_vm0, %v221_v14  ;;  %355 = vst.msk [vmem:[#allocation2 + $0x178] sm:$0xff] %vm179_vm0, %v351_v15  ;;  %1230 = vmatprep.subr.mxu0 %v1590_v16 }
  0x8d   : > { %532 = vperm.xlu1 %1425, %v454_v53   ;;  %537 = vperm.xlu0 %1424, %v455_v58  }
  0x8f   : > { %v413_v17 = vpop.permute.xlu1 %412  ;;  %v279_v18 = vpop.permute.xlu0 %278  ;;  %v1595_v19 = vld [vmem:[#allocation2 + $0x78] sm:$0xff] }
  0x90   : > { %v1597_v20 = vld [vmem:[#allocation2 + $0x1f8] sm:$0xff]  ;;  %418 = vst.msk [vmem:[#allocation2 + $0x1f0] sm:$0xff] %vm179_vm0, %v413_v17  ;;  %283 = vst.msk [vmem:[#allocation2 + $0xe8] sm:$0xff] %vm179_vm0, %v279_v18  ;;  %1231 = vmatpush3.msra.mxu0 %v1595_v19 }
  0x91   : > { %1274 = vmatprep.subr.mxu1 %v1597_v20  ;;  %1232 = vmatprep.subr.mxu0 %v1602_v21  ;;  %v1722_v18 = vld [vmem:[#allocation2 + $0x38] sm:$0xff] }
  0x93   : > { %v349_v22 = vpop.permute.xlu1 %348  ;;  %v213_v23 = vpop.permute.xlu0 %212  ;;  %v1606_v24 = vld [vmem:[#allocation2 + $0x70] sm:$0xff]  ;;  %v1608_v25 = vld [vmem:[#allocation2 + $0x178] sm:$0xff] }
  0x94   : > { %354 = vst.msk [vmem:[#allocation2 + $0x170] sm:$0xff] %vm179_vm0, %v349_v22  ;;  %217 = vst.msk [vmem:[#allocation2 + $0x68] sm:$0xff] %vm179_vm0, %v213_v23  ;;  %1233 = vmatpush3.msra.mxu0 %v1606_v24  ;;  %1275 = vmatpush3.msra.mxu1 %v1608_v25 }
  0x97   : > { %v407_v26 = vpop.permute.xlu1 %406  ;;  %v277_v27 = vpop.permute.xlu0 %276  ;;  %v1614_v28 = vld [vmem:[#allocation2 + $0xe8] sm:$0xff]  ;;  %v1616_v29 = vld [vmem:[#allocation2 + $0x1f0] sm:$0xff] }
  0x98   : > { %411 = vst.msk [vmem:[#allocation2 + $0x1e8] sm:$0xff] %vm179_vm0, %v407_v26  ;;  %282 = vst.msk [vmem:[#allocation2 + $0xe0] sm:$0xff] %vm179_vm0, %v277_v27  ;;  %1234 = vmatprep.subr.mxu0 %v1614_v28  ;;  %1276 = vmatprep.subr.mxu1 %v1616_v29 }
  0x9b   : > { %v343_v30 = vpop.permute.xlu1 %342  ;;  %v211_v31 = vpop.permute.xlu0 %210  ;;  %v1622_v32 = vld [vmem:[#allocation2 + $0x68] sm:$0xff]  ;;  %v1624_v33 = vld [vmem:[#allocation2 + $0x170] sm:$0xff] }
  0x9c   : > { %347 = vst.msk [vmem:[#allocation2 + $0x168] sm:$0xff] %vm179_vm0, %v343_v30  ;;  %216 = vst.msk [vmem:[#allocation2 + $0x60] sm:$0xff] %vm179_vm0, %v211_v31  ;;  %1235 = vmatpush3.msra.mxu0 %v1622_v32  ;;  %1277 = vmatpush3.msra.mxu1 %v1624_v33  ;;  %v1733_v30 = vld [vmem:[#allocation2 + $0x30] sm:$0xff] }
  0x9f   : > { %v405_v34 = vpop.permute.xlu1 %404  ;;  %v271_v35 = vpop.permute.xlu0 %270  ;;  %v1630_v36 = vld [vmem:[#allocation2 + $0xe0] sm:$0xff]  ;;  %v1632_v37 = vld [vmem:[#allocation2 + $0x1e8] sm:$0xff] }
  0xa0   : > { %410 = vst.msk [vmem:[#allocation2 + $0x1e0] sm:$0xff] %vm179_vm0, %v405_v34  ;;  %275 = vst.msk [vmem:[#allocation2 + $0xd8] sm:$0xff] %vm179_vm0, %v271_v35  ;;  %1236 = vmatprep.subr.mxu0 %v1630_v36  ;;  %1278 = vmatprep.subr.mxu1 %v1632_v37 }
  0xa3   : > { %v341_v38 = vpop.permute.xlu1 %340  ;;  %v203_v39 = vpop.permute.xlu0 %202  ;;  %v1638_v40 = vld [vmem:[#allocation2 + $0x60] sm:$0xff]  ;;  %v1640_v41 = vld [vmem:[#allocation2 + $0x168] sm:$0xff] }
  0xa4   : > { %346 = vst.msk [vmem:[#allocation2 + $0x160] sm:$0xff] %vm179_vm0, %v341_v38  ;;  %207 = vst.msk [vmem:[#allocation2 + $0x58] sm:$0xff] %vm179_vm0, %v203_v39  ;;  %1237 = vmatpush3.msra.mxu0 %v1638_v40  ;;  %1279 = vmatpush3.msra.mxu1 %v1640_v41 }
  0xa7   : > { %v399_v42 = vpop.permute.xlu1 %398  ;;  %v269_v43 = vpop.permute.xlu0 %268  ;;  %v1646_v44 = vld [vmem:[#allocation2 + $0xd8] sm:$0xff]  ;;  %v1648_v45 = vld [vmem:[#allocation2 + $0x1e0] sm:$0xff] }
  0xa8   : > { %403 = vst.msk [vmem:[#allocation2 + $0x1d8] sm:$0xff] %vm179_vm0, %v399_v42  ;;  %274 = vst.msk [vmem:[#allocation2 + $0xd0] sm:$0xff] %vm179_vm0, %v269_v43  ;;  %1238 = vmatprep.subr.mxu0 %v1646_v44  ;;  %1280 = vmatprep.subr.mxu1 %v1648_v45 }
  0xab   : > { %v335_v46 = vpop.permute.xlu1 %334  ;;  %v201_v47 = vpop.permute.xlu0 %200  ;;  %v1654_v48 = vld [vmem:[#allocation2 + $0x58] sm:$0xff]  ;;  %v1656_v49 = vld [vmem:[#allocation2 + $0x160] sm:$0xff] }
  0xac   : > { %339 = vst.msk [vmem:[#allocation2 + $0x158] sm:$0xff] %vm179_vm0, %v335_v46  ;;  %206 = vst.msk [vmem:[#allocation2 + $0x50] sm:$0xff] %vm179_vm0, %v201_v47  ;;  %1239 = vmatpush3.msra.mxu0 %v1654_v48  ;;  %1281 = vmatpush3.msra.mxu1 %v1656_v49  ;;  %v1752_v47 = vld [vmem:[#allocation2 + $0x28] sm:$0xff] }
  0xaf   : > { %v397_v54 = vpop.permute.xlu1 %396  ;;  %v263_v55 = vpop.permute.xlu0 %262  ;;  %v1671_v56 = vld [vmem:[#allocation2 + $0xd0] sm:$0xff]  ;;  %v1673_v57 = vld [vmem:[#allocation2 + $0x1d8] sm:$0xff] }
  0xb0   : > { %402 = vst.msk [vmem:[#allocation2 + $0x1d0] sm:$0xff] %vm179_vm0, %v397_v54  ;;  %267 = vst.msk [vmem:[#allocation2 + $0xc8] sm:$0xff] %vm179_vm0, %v263_v55  ;;  %1240 = vmatprep.subr.mxu0 %v1671_v56  ;;  %1282 = vmatprep.subr.mxu1 %v1673_v57  ;;  %v1763_v54 = vld [vmem:[#allocation2 + $0x20] sm:$0xff] }
  0xb3   : > { %v333_v59 = vpop.permute.xlu1 %332  ;;  %v193_v60 = vpop.permute.xlu0 %192  ;;  %v1682_v61 = vld [vmem:[#allocation2 + $0x50] sm:$0xff]  ;;  %v1684_v62 = vld [vmem:[#allocation2 + $0x158] sm:$0xff] }
  0xb4   : > { %338 = vst.msk [vmem:[#allocation2 + $0x150] sm:$0xff] %vm179_vm0, %v333_v59  ;;  %197 = vst.msk [vmem:[#allocation2 + $0x48] sm:$0xff] %vm179_vm0, %v193_v60  ;;  %1241 = vmatpush3.msra.mxu0 %v1682_v61  ;;  %1283 = vmatpush3.msra.mxu1 %v1684_v62 }
  0xb7   : > { %v391_v63 = vpop.permute.xlu1 %390  ;;  %v261_v0 = vpop.permute.xlu0 %260  ;;  %v1690_v1 = vld [vmem:[#allocation2 + $0xc8] sm:$0xff]  ;;  %v1692_v2 = vld [vmem:[#allocation2 + $0x1d0] sm:$0xff] }
  0xb8   : > { %395 = vst.msk [vmem:[#allocation2 + $0x1c8] sm:$0xff] %vm179_vm0, %v391_v63  ;;  %266 = vst.msk [vmem:[#allocation2 + $0xc0] sm:$0xff] %vm179_vm0, %v261_v0  ;;  %1242 = vmatprep.subr.mxu0 %v1690_v1  ;;  %1284 = vmatprep.subr.mxu1 %v1692_v2 }
  0xbb   : > { %v327_v3 = vpop.permute.xlu1 %326  ;;  %v191_v4 = vpop.permute.xlu0 %190  ;;  %v1698_v5 = vld [vmem:[#allocation2 + $0x48] sm:$0xff]  ;;  %v1700_v6 = vld [vmem:[#allocation2 + $0x150] sm:$0xff] }
  0xbc   : > { %331 = vst.msk [vmem:[#allocation2 + $0x148] sm:$0xff] %vm179_vm0, %v327_v3  ;;  %196 = vst.msk [vmem:[#allocation2 + $0x40] sm:$0xff] %vm179_vm0, %v191_v4  ;;  %1243 = vmatpush3.msra.mxu0 %v1698_v5  ;;  %1285 = vmatpush3.msra.mxu1 %v1700_v6 }
  0xbf   : > { %v389_v7 = vpop.permute.xlu1 %388  ;;  %v255_v10 = vpop.permute.xlu0 %254  ;;  %v1706_v11 = vld [vmem:[#allocation2 + $0xc0] sm:$0xff]  ;;  %v1708_v12 = vld [vmem:[#allocation2 + $0x1c8] sm:$0xff] }
  0xc0   : > { %394 = vst.msk [vmem:[#allocation2 + $0x1c0] sm:$0xff] %vm179_vm0, %v389_v7  ;;  %259 = vst.msk [vmem:[#allocation2 + $0xb8] sm:$0xff] %vm179_vm0, %v255_v10  ;;  %1244 = vmatprep.subr.mxu0 %v1706_v11  ;;  %1286 = vmatprep.subr.mxu1 %v1708_v12  ;;  %v459_v7 = vld [vmem:[#allocation2 + $0x18] sm:$0xff] }
  0xc3   : > { %v253_v13 = vpop.permute.xlu1 %252  ;;  %v325_v14 = vpop.permute.xlu0 %324  ;;  %v1714_v15 = vld [vmem:[#allocation2 + $0x40] sm:$0xff]  ;;  %v1716_v17 = vld [vmem:[#allocation2 + $0x148] sm:$0xff] }
  0xc4   : > { %258 = vst.msk [vmem:[#allocation2 + $0xb0] sm:$0xff] %vm179_vm0, %v253_v13  ;;  %330 = vst.msk [vmem:[#allocation2 + $0x140] sm:$0xff] %vm179_vm0, %v325_v14  ;;  %1245 = vmatpush3.msra.mxu0 %v1714_v15  ;;  %1287 = vmatpush3.msra.mxu1 %v1716_v17 }
  0xc7   : > { %v319_v22 = vpop.permute.xlu1 %318  ;;  %v383_v23 = vpop.permute.xlu0 %382  ;;  %v1724_v26 = vld [vmem:[#allocation2 + $0xb8] sm:$0xff]  ;;  %v1726_v27 = vld [vmem:[#allocation2 + $0x1c0] sm:$0xff] }
  0xc8   : > { %323 = vst.msk [vmem:[#allocation2 + $0x138] sm:$0xff] %vm179_vm0, %v319_v22  ;;  %387 = vst.msk [vmem:[#allocation2 + $0x1b8] sm:$0xff] %vm179_vm0, %v383_v23  ;;  %1246 = vmatprep.subr.mxu0 %v1724_v26  ;;  %1288 = vmatprep.subr.mxu1 %v1726_v27  ;;  %v458_v23 = vld [vmem:[#allocation2 + $0x10] sm:$0xff] }
  0xc9   : > { %1247 = vmatpush3.msra.mxu0 %v1722_v18 }
  0xcb   : > { %v381_v31 = vpop.permute.xlu1 %380  ;;  %v247_v34 = vpop.permute.xlu0 %246  ;;  %v1735_v35 = vld [vmem:[#allocation2 + $0x140] sm:$0xff]  ;;  %v1737_v38 = vld [vmem:[#allocation2 + $0xb0] sm:$0xff] }
  0xcc   : > { %386 = vst.msk [vmem:[#allocation2 + $0x1b0] sm:$0xff] %vm179_vm0, %v381_v31  ;;  %251 = vst.msk [vmem:[#allocation2 + $0xa8] sm:$0xff] %vm179_vm0, %v247_v34  ;;  %1289 = vmatpush3.msra.mxu1 %v1735_v35  ;;  %1248 = vmatprep.subr.mxu0 %v1737_v38 }
  0xcd   : > { %1249 = vmatpush3.msra.mxu0 %v1733_v30 }
  0xcf   : > { %v245_v39 = vpop.permute.xlu1 %244  ;;  %v317_v42 = vpop.permute.xlu0 %316  ;;  %v1744_v43 = vld [vmem:[#allocation2 + $0x1b8] sm:$0xff] }
  0xd0   : > { %v1746_v46 = vld [vmem:[#allocation2 + $0x138] sm:$0xff]  ;;  %250 = vst.msk [vmem:[#allocation2 + $0xa0] sm:$0xff] %vm179_vm0, %v245_v39  ;;  %322 = vst.msk [vmem:[#allocation2 + $0x130] sm:$0xff] %vm179_vm0, %v317_v42  ;;  %1290 = vmatprep.subr.mxu1 %v1744_v43 }
  0xd1   : > { %1291 = vmatpush3.msra.mxu1 %v1746_v46 }
  0xd3   : > { %v311_v50 = vpop.permute.xlu1 %310  ;;  %v375_v51 = vpop.permute.xlu0 %374  ;;  %v1754_v52 = vld [vmem:[#allocation2 + $0xa8] sm:$0xff]  ;;  %v1756_v53 = vld [vmem:[#allocation2 + $0x1b0] sm:$0xff] }
  0xd4   : > { %315 = vst.msk [vmem:[#allocation2 + $0x128] sm:$0xff] %vm179_vm0, %v311_v50  ;;  %379 = vst.msk [vmem:[#allocation2 + $0x1a8] sm:$0xff] %vm179_vm0, %v375_v51  ;;  %1250 = vmatprep.subr.mxu0 %v1754_v52  ;;  %1292 = vmatprep.subr.mxu1 %v1756_v53 }
  0xd5   : > { %1251 = vmatpush3.msra.mxu0 %v1752_v47 }
  0xd7   : > { %v373_v55 = vpop.permute.xlu1 %372  ;;  %v239_v58 = vpop.permute.xlu0 %238  ;;  %v1765_v59 = vld [vmem:[#allocation2 + $0x130] sm:$0xff]  ;;  %v1767_v60 = vld [vmem:[#allocation2 + $0xa0] sm:$0xff] }
  0xd8   : > { %378 = vst.msk [vmem:[#allocation2 + $0x1a0] sm:$0xff] %vm179_vm0, %v373_v55  ;;  %243 = vst.msk [vmem:[#allocation2 + $0x98] sm:$0xff] %vm179_vm0, %v239_v58  ;;  %1293 = vmatpush3.msra.mxu1 %v1765_v59  ;;  %1252 = vmatprep.subr.mxu0 %v1767_v60 }
  0xd9   : > { %1253 = vmatpush3.msra.mxu0 %v1763_v54 }
  0xdb   : > { %v237_v63 = vpop.permute.xlu1 %236  ;;  %v309_v0 = vpop.permute.xlu0 %308  ;;  %v1774_v3 = vld [vmem:[#allocation2 + $0x1a8] sm:$0xff] }
  0xdc   : > { %1982 = vst [vmem:[#allocation3_spill] sm:$0xff] %v1774_v3  ;;  %v1776_v4 = vld [vmem:[#allocation2 + $0x128] sm:$0xff]  ;;  %242 = vst.msk [vmem:[#allocation2 + $0x90] sm:$0xff] %vm179_vm0, %v237_v63  ;;  %1294 = vmatprep.subr.mxu1 %v1774_v3 }
  0xdd   : > { %1983 = vst [vmem:[#allocation4_spill] sm:$0xff] %v1776_v4  ;;  %314 = vst.msk [vmem:[#allocation2 + $0x120] sm:$0xff] %vm179_vm0, %v309_v0  ;;  %1295 = vmatpush3.msra.mxu1 %v1776_v4  ;;  %v457_v63 = vld [vmem:[#allocation2 + $0x8] sm:$0xff] }
  0xdf   : > { %v303_v10 = vpop.permute.xlu1 %302  ;;  %v367_v13 = vpop.permute.xlu0 %366  ;;  %v475_v14 = vld [vmem:[#allocation2 + $0x98] sm:$0xff]  ;;  %v1782_v22 = vld [vmem:[#allocation2 + $0x1a0] sm:$0xff] }
  0xe0   : > { %1984 = vst [vmem:[#allocation5_spill] sm:$0xff] %v1782_v22  ;;  %307 = vst.msk [vmem:[#allocation2 + $0x118] sm:$0xff] %vm179_vm0, %v303_v10  ;;  %1254 = vmatprep.subr.mxu0 %v475_v14  ;;  %1296 = vmatprep.subr.mxu1 %v1782_v22 }
  0xe1   : > { %371 = vst.msk [vmem:[#allocation2 + $0x198] sm:$0xff] %vm179_vm0, %v367_v13  ;;  %1255 = vmatpush3.msra.mxu0 %v459_v7 }
  0xe3   : > { %v365_v31 = vpop.permute.xlu1 %364  ;;  %v231_v34 = vpop.permute.xlu0 %230  ;;  %v474_v42 = vld [vmem:[#allocation2 + $0x90] sm:$0xff] }
  0xe4   : > { %v1787_v39 = vld [vmem:[#allocation2 + $0x120] sm:$0xff]  ;;  %370 = vst.msk [vmem:[#allocation2 + $0x190] sm:$0xff] %vm179_vm0, %v365_v31  ;;  %235 = vst.msk [vmem:[#allocation2 + $0x88] sm:$0xff] %vm179_vm0, %v231_v34  ;;  %1256 = vmatprep.subr.mxu0 %v474_v42 }
  0xe5   : > { %1985 = vst [vmem:[#allocation6_spill] sm:$0xff] %v1787_v39  ;;  %1297 = vmatpush3.msra.mxu1 %v1787_v39  ;;  %1257 = vmatpush3.msra.mxu0 %v458_v23  ;;  %v456_v23 = vld [vmem:[#allocation2] sm:$0xff] }
  0xe6   : > { %v1802_v39 = vld [vmem:[%s1975_s1] sm:$0xff] }
  0xe7   : > { %v229_v50 = vpop.permute.xlu1 %228  ;;  %v301_v51 = vpop.permute.xlu0 %300  ;;  %v491_v58 = vld [vmem:[#allocation2 + $0x118] sm:$0xff] }
  0xe8   : > { %v1792_v55 = vld [vmem:[#allocation2 + $0x198] sm:$0xff]  ;;  %234 = vst.msk [vmem:[#allocation2 + $0x80] sm:$0xff] %vm179_vm0, %v229_v50  ;;  %306 = vst.msk [vmem:[#allocation2 + $0x110] sm:$0xff] %vm179_vm0, %v301_v51 }
  0xe9   : > { %1298 = vmatprep.subr.mxu1 %v1792_v55 }
  0xea   : > { %1299 = vmatpush3.msra.mxu1 %v491_v58 }
  0xeb   : > { %v295_v0 = vpop.permute.xlu1 %294  ;;  %v359_v7 = vpop.permute.xlu0 %358  ;;  %v473_v10 = vld [vmem:[#allocation2 + $0x88] sm:$0xff]  ;;  %v506_v13 = vld [vmem:[#allocation2 + $0x190] sm:$0xff] }
  0xec   : > { %299 = vst.msk [vmem:[#allocation2 + $0x108] sm:$0xff] %vm179_vm0, %v295_v0  ;;  %363 = vst.msk [vmem:[#allocation2 + $0x188] sm:$0xff] %vm179_vm0, %v359_v7  ;;  %1258 = vmatprep.subr.mxu0 %v473_v10  ;;  %1300 = vmatprep.subr.mxu1 %v506_v13 }
  0xed   : > { %1259 = vmatpush3.msra.mxu0 %v457_v63  ;;  %v1809_v63 = vld [vmem:[%s1975_s1 + $0x28] sm:$0xff] }
  0xef   : > { %v293_v31 = vpop.permute.xlu1 %292  ;;  %v357_v34 = vpop.permute.xlu0 %356  ;;  %v472_v50 = vld [vmem:[#allocation2 + $0x80] sm:$0xff]  ;;  %v490_v51 = vld [vmem:[#allocation2 + $0x110] sm:$0xff] }
  0xf0   : > { %298 = vst.msk [vmem:[#allocation2 + $0x100] sm:$0xff] %vm179_vm0, %v293_v31  ;;  %362 = vst.msk [vmem:[#allocation2 + $0x180] sm:$0xff] %vm179_vm0, %v357_v34  ;;  %1260 = vmatprep.subr.mxu0 %v472_v50  ;;  %1301 = vmatpush3.msra.mxu1 %v490_v51  ;;  %v1816_v31 = vld [vmem:[%s1975_s1 + $0x20] sm:$0xff] }
  0xf1   : > { %1261 = vmatpush3.msra.mxu0 %v456_v23 }
  0xf2   : > { %1318 = vmatprep.subr.mxu0 %v491_v58  ;;  %605 = vmatmul.mubr.f32.vlgmr.msra.gmra.mxu0 %v1802_v39 }
  0xf3   : > { %v431_v0 = vpop.permute.xlu0 %430  ;;  %1319 = vmatpush3.msra.mxu0 %v475_v14  ;;  %v505_v7 = vld [vmem:[#allocation2 + $0x188] sm:$0xff]  ;;  %v429_v22 = vpop.permute.xlu1 %428  ;;  %609 = vmatprep.mubr.f32.mxu0 %v1809_v63 }
  0xf4   : > { %v489_v4 = vld [vmem:[#allocation2 + $0x108] sm:$0xff]  ;;  %435 = vst.msk [vmem:[#allocation2 + $0x218] sm:$0xff] %vm179_vm0, %v431_v0  ;;  %1302 = vmatprep.subr.mxu1 %v505_v7  ;;  %1320 = vmatprep.subr.mxu0 %v490_v51  ;;  %434 = vst.msk [vmem:[#allocation2 + $0x210] sm:$0xff] %vm179_vm0, %v429_v22  ;;  %v1829_v51 = vld [vmem:[%s1975_s1 + $0x10] sm:$0xff] }
  0xf5   : > { %v1823_v14 = vld [vmem:[%s1975_s1 + $0x48] sm:$0xff]  ;;  %1321 = vmatpush3.msra.mxu0 %v474_v42  ;;  %1303 = vmatpush3.msra.mxu1 %v489_v4 }
  0xf6   : > { %1322 = vmatprep.subr.mxu0 %v489_v4  ;;  %610 = vmatmul.mubr.f32.gmra.mxu0 %v1816_v31  ;;  %v1837_v4 = vld [vmem:[%s1975_s1 + $0x38] sm:$0xff] }
  0xf7   : > { %v423_v58 = vpop.permute.xlu0 %422  ;;  %1323 = vmatpush3.msra.mxu0 %v473_v10  ;;  %v504_v23 = vld [vmem:[#allocation2 + $0x180] sm:$0xff]  ;;  %v421_v3 = vpop.permute.xlu1 %420  ;;  %614 = vmatprep.mubr.f32.mxu0 %v1823_v14 }
  0xf8   : > { %v750_v34 = vld [vmem:[#allocation2 + $0x100] sm:$0xff]  ;;  %427 = vst.msk [vmem:[#allocation2 + $0x208] sm:$0xff] %vm179_vm0, %v423_v58  ;;  %1304 = vmatprep.subr.mxu1 %v504_v23  ;;  %426 = vst.msk [vmem:[#allocation2 + $0x200] sm:$0xff] %vm179_vm0, %v421_v3 }
  0xf9   : > { %1324 = vmatprep.subr.mxu0 %v750_v34  ;;  %1305 = vmatpush3.msra.mxu1 %v750_v34 }
  0xfa   : > { %1325 = vmatpush3.msra.mxu0 %v472_v50  ;;  %690 = vmatmul.mubr.f32.vlgmr.msra.gmra.mxu1 %v1829_v51 }
  0xfb   : > { %1326 = vmatprep.subr.mxu0 %v1590_v16  ;;  %v785_v22 = vld [vmem:[#allocation2 + $0x218] sm:$0xff]  ;;  %v784_v42 = vld [vmem:[#allocation2 + $0x210] sm:$0xff]  ;;  %694 = vmatprep.mubr.f32.mxu1 %v1837_v4 }
  0xfc   : > { %1327 = vmatpush3.msra.mxu0 %v1595_v19  ;;  %1362 = vmatprep.subr.mxu1 %v785_v22  ;;  %v442_v19 = vld [vmem:[%s1975_s1 + $0x30] sm:$0xff] }
  0xfd   : > { %1328 = vmatprep.subr.mxu0 %v1602_v21  ;;  %1363 = vmatpush3.msra.mxu1 %v1792_v55  ;;  %v447_v21 = vld [vmem:[%s1975_s1 + $0x58] sm:$0xff] }
  0xfe   : > { %1329 = vmatpush3.msra.mxu0 %v1606_v24  ;;  %1364 = vmatprep.subr.mxu1 %v784_v42  ;;  %v446_v24 = vld [vmem:[%s1975_s1 + $0x50] sm:$0xff] }
  0xff   : > { %1330 = vmatprep.subr.mxu0 %v1614_v28  ;;  %1365 = vmatpush3.msra.mxu1 %v506_v13  ;;  %v783_v16 = vld [vmem:[#allocation2 + $0x208] sm:$0xff]  ;;  %v782_v3 = vld [vmem:[#allocation2 + $0x200] sm:$0xff] }
 0x100   : > { %1331 = vmatpush3.msra.mxu0 %v1622_v32  ;;  %1366 = vmatprep.subr.mxu1 %v783_v16  ;;  %v448_v28 = vld [vmem:[%s1975_s1 + $0x60] sm:$0xff]  ;;  %v450_v32 = vld [vmem:[%s1975_s1 + $0x70] sm:$0xff] }
 0x101   : > { %1332 = vmatprep.subr.mxu0 %v1630_v36  ;;  %1367 = vmatpush3.msra.mxu1 %v505_v7  ;;  %v1987_v36 = vld [vmem:[#allocation4_spill] sm:$0xff] }
 0x102   : > { %1333 = vmatpush3.msra.mxu0 %v1638_v40  ;;  %1368 = vmatprep.subr.mxu1 %v782_v3 }
 0x103   : > { %1334 = vmatprep.subr.mxu0 %v1646_v44  ;;  %1369 = vmatpush3.msra.mxu1 %v504_v23 }
 0x104   : > { %1335 = vmatpush3.msra.mxu0 %v1654_v48  ;;  %1370 = vmatprep.subr.mxu1 %v1597_v20  ;;  %v444_v20 = vld [vmem:[%s1975_s1 + $0x40] sm:$0xff] }
 0x105   : > { %1336 = vmatprep.subr.mxu0 %v1671_v56  ;;  %1371 = vmatpush3.msra.mxu1 %v1608_v25  ;;  %v449_v25 = vld [vmem:[%s1975_s1 + $0x68] sm:$0xff] }
 0x106   : > { %1337 = vmatpush3.msra.mxu0 %v1682_v61  ;;  %1372 = vmatprep.subr.mxu1 %v1616_v29  ;;  %v451_v29 = vld [vmem:[%s1975_s1 + $0x78] sm:$0xff] }
 0x107   : > { %1338 = vmatprep.subr.mxu0 %v1690_v1  ;;  %1373 = vmatpush3.msra.mxu1 %v1624_v33  ;;  %v1986_v33 = vld [vmem:[#allocation3_spill] sm:$0xff] }
 0x108   : > { %1339 = vmatpush3.msra.mxu0 %v1698_v5  ;;  %1374 = vmatprep.subr.mxu1 %v1632_v37  ;;  %v1988_v37 = vld [vmem:[#allocation5_spill] sm:$0xff] }
 0x109   : > { %1340 = vmatprep.subr.mxu0 %v1706_v11  ;;  %1375 = vmatpush3.msra.mxu1 %v1640_v41 }
 0x10a   : > { %1341 = vmatpush3.msra.mxu0 %v1714_v15  ;;  %1376 = vmatprep.subr.mxu1 %v1648_v45 }
 0x10b   : > { %1342 = vmatprep.subr.mxu0 %v1724_v26  ;;  %1377 = vmatpush3.msra.mxu1 %v1656_v49 }
 0x10c   : > { %1343 = vmatpush3.msra.mxu0 %v1722_v18  ;;  %695 = vmatmul.mubr.f32.gmra.mxu1 %v442_v19 }
 0x10d   : > { %1344 = vmatprep.subr.mxu0 %v1737_v38  ;;  %1378 = vmatprep.subr.mxu1 %v1673_v57 }
 0x10e   : > { %1345 = vmatpush3.msra.mxu0 %v1733_v30  ;;  %1379 = vmatpush3.msra.mxu1 %v1684_v62 }
 0x10f   : > { %615 = vmatmul.mubr.f32.gmra.mxu0 %v444_v20  ;;  %1346 = vmatprep.subr.mxu0 %v1754_v52 }
 0x110   : > { %1380 = vmatprep.subr.mxu1 %v1692_v2  ;;  %699 = vmatprep.mubr.f32.mxu1 %v447_v21 }
 0x111   : > { %1347 = vmatpush3.msra.mxu0 %v1752_v47  ;;  %1381 = vmatpush3.msra.mxu1 %v1700_v6 }
 0x112   : > { %1348 = vmatprep.subr.mxu0 %v1767_v60  ;;  %700 = vmatmul.mubr.f32.gmra.mxu1 %v446_v24 }
 0x113   : > { %1382 = vmatprep.subr.mxu1 %v1708_v12  ;;  %619 = vmatprep.mubr.f32.mxu0 %v449_v25 }
 0x114   : > { %1383 = vmatpush3.msra.mxu1 %v1716_v17  ;;  %620 = vmatmul.mubr.f32.gmra.mxu0 %v448_v28 }
 0x115   : > { %1384 = vmatprep.subr.mxu1 %v1726_v27  ;;  %704 = vmatprep.mubr.f32.mxu1 %v451_v29 }
 0x116   : > { %1385 = vmatpush3.msra.mxu1 %v1735_v35  ;;  %1349 = vmatpush3.msra.mxu0 %v1763_v54  ;;  %v528_v35 = vpop.permute.xlu1 %527 }
 0x117   : > { %705 = vmatmul.mubr.f32.gmra.mxu1 %v450_v32  ;;  %1386 = vmatprep.subr.mxu1 %v1744_v43  ;;  %v523_v43 = vpop.permute.xlu0 %522 }
 0x118   : > { %850 = vmatprep.mubr.f32.mxu0 %v1559_v8  ;;  %1387 = vmatpush3.msra.mxu1 %v1746_v46  ;;  %v1989_v8 = vld [vmem:[#allocation6_spill] sm:$0xff] }
 0x119   : > { %851 = vmatmul.mubr.f32.vlgmr.msra.gmra.mxu0 %v1802_v39  ;;  %1388 = vmatprep.subr.mxu1 %v1756_v53 }
 0x11a   : > { %855 = vmatprep.mubr.f32.mxu0 %v1809_v63  ;;  %1389 = vmatpush3.msra.mxu1 %v1765_v59  ;;  %v533_v7 = vpop.permute.xlu1 %532 }
 0x11b   : > { %935 = vmatprep.mubr.f32.mxu1 %v1569_v9  ;;  %1390 = vmatprep.subr.mxu1 %v1986_v33 }
 0x11c   : > { %1391 = vmatpush3.msra.mxu1 %v1987_v36 }
 0x11d   : > { %856 = vmatmul.mubr.f32.gmra.mxu0 %v1816_v31  ;;  %1392 = vmatprep.subr.mxu1 %v1988_v37 }
 0x11e   : > { %860 = vmatprep.mubr.f32.mxu0 %v1823_v14  ;;  %1393 = vmatpush3.msra.mxu1 %v1989_v8 }
 0x11f   : > { %936 = vmatmul.mubr.f32.vlgmr.msra.gmra.mxu1 %v1829_v51 }
 0x120   : > { %940 = vmatprep.mubr.f32.mxu1 %v1837_v4 }
 0x121   : > { %861 = vmatmul.mubr.f32.gmra.mxu0 %v444_v20 }
 0x122   : > { %865 = vmatprep.mubr.f32.mxu0 %v449_v25  ;;  %v538_v25 = vpop.permute.xlu0 %537 }
 0x123   : > { %941 = vmatmul.mubr.f32.gmra.mxu1 %v442_v19 }
 0x124   : > { %945 = vmatprep.mubr.f32.mxu1 %v447_v21 }
 0x125   : > { %866 = vmatmul.mubr.f32.gmra.mxu0 %v448_v28 }
 0x127   : > { %946 = vmatmul.mubr.f32.gmra.mxu1 %v446_v24 }
 0x128   : > { %950 = vmatprep.mubr.f32.mxu1 %v451_v29 }
 0x12b   : > { %951 = vmatmul.mubr.f32.gmra.mxu1 %v450_v32 }
 0x1b2   : > { %v1262_v9 = vpop.f32.mrf.mxu0 }
 0x1b4   : > { %v1263_v40 = vpop.f32.mrf.mxu0 }
 0x1b5   : > { %v1264_v30 = vadd.f32 %v1263_v40, %v1262_v9 }
 0x1b6   : > { %v1265_v44 = vpop.f32.mrf.mxu0 }
 0x1b7   : > { %v607_v55 = vadd.f32 %v1264_v30, %v523_v43 }
 0x1b8   : > { %v1266_v48 = vpop.f32.mrf.mxu0 }
 0x1b9   : > { %v1267_v59 = vadd.f32 %v1266_v48, %v1265_v44 }
 0x1ba   : > { %v1306_v41 = vpop.f32.mrf.mxu1 }
 0x1bb   : > { %v612_v23 = vadd.f32 %v1267_v59, %v528_v35 }
 0x1bc   : > { %v1307_v45 = vpop.f32.mrf.mxu1 }
 0x1bd   : > { %v1308_v39 = vadd.f32 %v1307_v45, %v1306_v41 }
 0x1bf   : > { %v692_v4 = vadd.f32 %v1308_v39, %v607_v55 }
 0x1c1   : > { %vm710_vm3 = vcmp.ge.f32.partialorder %v692_v4, 0.0  ;;  %v714_v8 = vmul.f32 0.02, %v692_v4 }
 0x1cc   : > { %v1309_v49 = vpop.f32.mrf.mxu1 }
 0x1ce   : > { %v1310_v57 = vpop.f32.mrf.mxu1 }
 0x1cf   : > { %v1268_v56 = vpop.f32.mrf.mxu0  ;;  %v1311_v22 = vadd.f32 %v1310_v57, %v1309_v49 }
 0x1d1   : > { %v1269_v61 = vpop.f32.mrf.mxu0  ;;  %v697_v9 = vadd.f32 %v1311_v22, %v612_v23 }
 0x1d2   : > { %v1312_v62 = vpop.f32.mrf.mxu1  ;;  %v1270_v50 = vadd.f32 %v1269_v61, %v1268_v56 }
 0x1d3   : > { %vm711_vm6 = vcmp.ge.f32.partialorder %v697_v9, 0.0 }
 0x1d4   : > { %v1271_v1 = vpop.f32.mrf.mxu0  ;;  %v1313_v2 = vpop.f32.mrf.mxu1  ;;  %v617_v3 = vadd.f32 %v1270_v50, %v533_v7 }
 0x1d5   : > { %v1314_v19 = vadd.f32 %v1313_v2, %v1312_v62  ;;  %v715_v62 = vmul.f32 0.02, %v697_v9 }
 0x1d6   : > { %v1272_v5 = vpop.f32.mrf.mxu0 }
 0x1d7   : > { %v1315_v11 = vpop.f32.mrf.mxu1  ;;  %v1273_v20 = vadd.f32 %v1272_v5, %v1271_v1  ;;  %v702_v40 = vadd.f32 %v1314_v19, %v617_v3  ;;  %v718_v5 = vsel %vm710_vm3, %v692_v4, %v714_v8 }
 0x1d9   : > { %v1350_v6 = vpop.f32.mrf.mxu0  ;;  %v1316_v17 = vpop.f32.mrf.mxu1  ;;  %v622_v44 = vadd.f32 %v1273_v20, %v538_v25  ;;  %v716_v1 = vmul.f32 0.02, %v702_v40  ;;  %vm712_vm7 = vcmp.ge.f32.partialorder %v702_v40, 0.0 }
 0x1da   : > { %v1317_v41 = vadd.f32 %v1316_v17, %v1315_v11 }
 0x1db   : > { %v1351_v12 = vpop.f32.mrf.mxu0  ;;  %v720_v17 = vsel %vm712_vm7, %v702_v40, %v716_v1 }
 0x1dc   : > { %v1352_v18 = vadd.f32 %v1351_v12, %v1350_v6  ;;  %v707_v2 = vadd.f32 %v1317_v41, %v622_v44  ;;  %v968_v12 = vsel %vm179_vm0, %v718_v5, -inf }
 0x1dd   : > { %v1353_v15 = vpop.f32.mrf.mxu0 }
 0x1de   : > { %v853_v47 = vadd.f32 %v1352_v18, %v523_v43  ;;  %v717_v18 = vmul.f32 0.02, %v707_v2  ;;  %vm713_vm8 = vcmp.ge.f32.partialorder %v707_v2, 0.0 }
 0x1df   : > { %v1354_v26 = vpop.f32.mrf.mxu0  ;;  %v1394_v27 = vpop.f32.mrf.mxu1 }
 0x1e0   : > { %v1355_v52 = vadd.f32 %v1354_v26, %v1353_v15  ;;  %v719_v15 = vsel %vm711_vm6, %v697_v9, %v715_v62  ;;  %v721_v30 = vsel %vm713_vm8, %v707_v2, %v717_v18 }
 0x1e1   : > { %v1356_v38 = vpop.f32.mrf.mxu0  ;;  %v1395_v46 = vpop.f32.mrf.mxu1  ;;  %v969_v26 = vsel %vm179_vm0, %v719_v15, -inf }
 0x1e2   : > { %v1396_v53 = vadd.f32 %v1395_v46, %v1394_v27  ;;  %v858_v31 = vadd.f32 %v1355_v52, %v528_v35  ;;  %v970_v27 = vsel %vm179_vm0, %v720_v17, -inf  ;;  %v971_v35 = vsel %vm179_vm0, %v721_v30, -inf }
 0x1e3   : > { %v1357_v54 = vpop.f32.mrf.mxu0  ;;  %v1397_v60 = vpop.f32.mrf.mxu1 }
 0x1e4   : > { %v938_v10 = vadd.f32 %v1396_v53, %v853_v47  ;;  %v1358_v63 = vadd.f32 %v1357_v54, %v1356_v38 }
 0x1e5   : > { %v1359_v13 = vpop.f32.mrf.mxu0  ;;  %v1398_v0 = vpop.f32.mrf.mxu1 }
 0x1e6   : > { %v1399_v14 = vadd.f32 %v1398_v0, %v1397_v60  ;;  %vm956_vm1 = vcmp.ge.f32.partialorder %v938_v10, 0.0  ;;  %v960_v58 = vmul.f32 0.02, %v938_v10  ;;  %v863_v21 = vadd.f32 %v1358_v63, %v533_v7 }
 0x1e7   : > { %v1360_v34 = vpop.f32.mrf.mxu0  ;;  %v1400_v51 = vpop.f32.mrf.mxu1 }
 0x1e8   : > { %v943_v42 = vadd.f32 %v1399_v14, %v858_v31  ;;  %v964_v16 = vsel %vm956_vm1, %v938_v10, %v960_v58  ;;  %v1361_v28 = vadd.f32 %v1360_v34, %v1359_v13 }
 0x1e9   : > { %v1401_v24 = vpop.f32.mrf.mxu1  ;;  %976 = vrot.lane.b32.xlu1 %v964_v16, %s1443_s21 }
 0x1ea   : > { %v1402_v29 = vadd.f32 %v1401_v24, %v1400_v51  ;;  %vm957_vm2 = vcmp.ge.f32.partialorder %v943_v42, 0.0  ;;  %v961_v32 = vmul.f32 0.02, %v943_v42  ;;  %v868_v48 = vadd.f32 %v1361_v28, %v538_v25 }
 0x1eb   : > { %v1403_v33 = vpop.f32.mrf.mxu1 }
 0x1ec   : > { %v948_v36 = vadd.f32 %v1402_v29, %v863_v21  ;;  %v965_v37 = vsel %vm957_vm2, %v943_v42, %v961_v32 }
 0x1ed   : > { %v1404_v45 = vpop.f32.mrf.mxu1  ;;  %978 = vrot.lane.b32.xlu0 %v965_v37, %s1443_s21 }
 0x1ee   : > { %v1405_v49 = vadd.f32 %v1404_v45, %v1403_v33  ;;  %vm958_vm4 = vcmp.ge.f32.partialorder %v948_v36, 0.0  ;;  %v962_v56 = vmul.f32 0.02, %v948_v36 }
 0x1f0   : > { %v953_v57 = vadd.f32 %v1405_v49, %v868_v48  ;;  %v966_v61 = vsel %vm958_vm4, %v948_v36, %v962_v56 }
 0x1f1   : > { %980 = vrot.lane.b32.xlu1 %v966_v61, %s1443_s21 }
 0x1f2   : > { %vm959_vm5 = vcmp.ge.f32.partialorder %v953_v57, 0.0  ;;  %v963_v6 = vmul.f32 0.02, %v953_v57 }
 0x1f4   : > { %v967_v11 = vsel %vm959_vm5, %v953_v57, %v963_v6 }
 0x1f5   : > { %982 = vrot.lane.b32.xlu0 %v967_v11, %s1443_s21  ;;  %997 = vrot.lane.b32.xlu1 %v968_v12, %s1435_s19 }
 0x1f9   : > { %999 = vrot.lane.b32.xlu0 %v969_v26, %s1435_s19  ;;  %1001 = vrot.lane.b32.xlu1 %v970_v27, %s1435_s19 }
 0x1fd   : > { %1003 = vrot.lane.b32.xlu0 %v971_v35, %s1435_s19 }
 0x25b   : > { %v977_v38 = vpop.permute.xlu1 %976 }
 0x25c   : > { %v989_v43 = vsel %vm988_vm9, -inf, %v977_v38 }
 0x25d   : > { %1077 = vrot.lane.b32.xlu1 %v989_v43, %s1435_s19 }
 0x25f   : > { %v979_v46 = vpop.permute.xlu0 %978 }
 0x260   : > { %v990_v47 = vsel %vm988_vm9, -inf, %v979_v46 }
 0x261   : > { %1079 = vrot.lane.b32.xlu0 %v990_v47, %s1435_s19 }
 0x263   : > { %v981_v52 = vpop.permute.xlu1 %980 }
 0x264   : > { %v991_v53 = vsel %vm988_vm9, -inf, %v981_v52 }
 0x265   : > { %1081 = vrot.lane.b32.xlu1 %v991_v53, %s1435_s19 }
 0x267   : > { %v983_v54 = vpop.permute.xlu0 %982  ;;  %v998_v59 = vpop.permute.xlu1 %997 }
 0x268   : > { %v992_v60 = vsel %vm988_vm9, -inf, %v983_v54  ;;  %v1009_v39 = vmax.f32 %v968_v12, %v998_v59 }
 0x269   : > { %1083 = vrot.lane.b32.xlu0 %v992_v60, %s1435_s19  ;;  %s1229_s19 = sshll.u32 %s1991_s13, 5 }
 0x26a   : > { %1017 = vrot.lane.b32.xlu1 %v1009_v39, %s1438_s22  ;;  %s170_s24 = scalar_lea.vmem %s1977_s3, %s1229_s19 }
 0x26b   : > { %v1000_v55 = vpop.permute.xlu0 %999  ;;  %v1002_v10 = vpop.permute.xlu1 %1001 }
 0x26c   : > { %v1010_v13 = vmax.f32 %v969_v26, %v1000_v55  ;;  %v1011_v50 = vmax.f32 %v970_v27, %v1002_v10 }
 0x26e   : > { %1019 = vrot.lane.b32.xlu0 %v1010_v13, %s1438_s22  ;;  %1021 = vrot.lane.b32.xlu1 %v1011_v50, %s1438_s22 }
 0x26f   : > { %v1004_v63 = vpop.permute.xlu0 %1003 }
 0x270   : > { %v1012_v0 = vmax.f32 %v971_v35, %v1004_v63 }
 0x272   : > { %1023 = vrot.lane.b32.xlu0 %v1012_v0, %s1438_s22 }
 0x2cf   : > { %v1078_v7 = vpop.permute.xlu1 %1077 }
 0x2d0   : > { %v1089_v31 = vmax.f32 %v989_v43, %v1078_v7 }
 0x2d2   : > { %1097 = vrot.lane.b32.xlu1 %v1089_v31, %s1438_s22 }
 0x2d3   : > { %v1080_v14 = vpop.permute.xlu0 %1079 }
 0x2d4   : > { %v1090_v58 = vmax.f32 %v990_v47, %v1080_v14 }
 0x2d6   : > { %1099 = vrot.lane.b32.xlu0 %v1090_v58, %s1438_s22 }
 0x2d7   : > { %v1082_v23 = vpop.permute.xlu1 %1081 }
 0x2d8   : > { %v1091_v34 = vmax.f32 %v991_v53, %v1082_v23 }
 0x2da   : > { %1101 = vrot.lane.b32.xlu1 %v1091_v34, %s1438_s22 }
 0x2db   : > { %v1084_v51 = vpop.permute.xlu0 %1083 }
 0x2dc   : > { %v1092_v4 = vmax.f32 %v992_v60, %v1084_v51  ;;  %v1018_v22 = vpop.permute.xlu1 %1017 }
 0x2dd   : > { %v1029_v42 = vmax.f32 %v1009_v39, %v1018_v22 }
 0x2de   : > { %1103 = vrot.lane.b32.xlu0 %v1092_v4, %s1438_s22 }
 0x2df   : > { %1037 = vrot.lane.b32.xlu1 %v1029_v42, %s1439_s23 }
 0x2e0   : > { %v1020_v16 = vpop.permute.xlu0 %1019  ;;  %v1022_v3 = vpop.permute.xlu1 %1021 }
 0x2e1   : > { %v1030_v19 = vmax.f32 %v1010_v13, %v1020_v16  ;;  %v1031_v20 = vmax.f32 %v1011_v50, %v1022_v3 }
 0x2e3   : > { %1039 = vrot.lane.b32.xlu0 %v1030_v19, %s1439_s23  ;;  %1041 = vrot.lane.b32.xlu1 %v1031_v20, %s1439_s23 }
 0x2e4   : > { %v1024_v21 = vpop.permute.xlu0 %1023 }
 0x2e5   : > { %v1032_v24 = vmax.f32 %v1012_v0, %v1024_v21 }
 0x2e7   : > { %1043 = vrot.lane.b32.xlu0 %v1032_v24, %s1439_s23 }
 0x344   : > { %v1098_v25 = vpop.permute.xlu1 %1097 }
 0x345   : > { %v1109_v28 = vmax.f32 %v1089_v31, %v1098_v25 }
 0x347   : > { %1117 = vrot.lane.b32.xlu1 %v1109_v28, %s1439_s23 }
 0x348   : > { %v1100_v29 = vpop.permute.xlu0 %1099 }
 0x349   : > { %v1110_v32 = vmax.f32 %v1090_v58, %v1100_v29 }
 0x34b   : > { %1119 = vrot.lane.b32.xlu0 %v1110_v32, %s1439_s23 }
 0x34c   : > { %v1102_v33 = vpop.permute.xlu1 %1101 }
 0x34d   : > { %v1111_v36 = vmax.f32 %v1091_v34, %v1102_v33 }
 0x34f   : > { %1121 = vrot.lane.b32.xlu1 %v1111_v36, %s1439_s23 }
 0x350   : > { %v1104_v37 = vpop.permute.xlu0 %1103 }
 0x351   : > { %v1112_v8 = vmax.f32 %v1092_v4, %v1104_v37  ;;  %v1038_v9 = vpop.permute.xlu1 %1037 }
 0x352   : > { %v1049_v40 = vmax.f32 %v1029_v42, %v1038_v9 }
 0x353   : > { %1123 = vrot.lane.b32.xlu0 %v1112_v8, %s1439_s23 }
 0x354   : > { %1057 = vrot.lane.b32.xlu1 %v1049_v40, %s1441_s29 }
 0x355   : > { %v1040_v41 = vpop.permute.xlu0 %1039  ;;  %v1042_v44 = vpop.permute.xlu1 %1041 }
 0x356   : > { %v1050_v45 = vmax.f32 %v1030_v19, %v1040_v41  ;;  %v1051_v48 = vmax.f32 %v1031_v20, %v1042_v44 }
 0x358   : > { %1059 = vrot.lane.b32.xlu0 %v1050_v45, %s1441_s29  ;;  %1061 = vrot.lane.b32.xlu1 %v1051_v48, %s1441_s29 }
 0x359   : > { %v1044_v49 = vpop.permute.xlu0 %1043 }
 0x35a   : > { %v1052_v56 = vmax.f32 %v1032_v24, %v1044_v49 }
 0x35c   : > { %1063 = vrot.lane.b32.xlu0 %v1052_v56, %s1441_s29 }
 0x3b9   : > { %v1118_v57 = vpop.permute.xlu1 %1117 }
 0x3ba   : > { %v1129_v61 = vmax.f32 %v1109_v28, %v1118_v57 }
 0x3bc   : > { %1137 = vrot.lane.b32.xlu1 %v1129_v61, %s1441_s29 }
 0x3bd   : > { %v1120_v62 = vpop.permute.xlu0 %1119 }
 0x3be   : > { %v1130_v1 = vmax.f32 %v1110_v32, %v1120_v62 }
 0x3c0   : > { %1139 = vrot.lane.b32.xlu0 %v1130_v1, %s1441_s29 }
 0x3c1   : > { %v1122_v2 = vpop.permute.xlu1 %1121 }
 0x3c2   : > { %v1131_v5 = vmax.f32 %v1111_v36, %v1122_v2 }
 0x3c4   : > { %1141 = vrot.lane.b32.xlu1 %v1131_v5, %s1441_s29 }
 0x3c5   : > { %v1124_v6 = vpop.permute.xlu0 %1123 }
 0x3c6   : > { %v1132_v11 = vmax.f32 %v1112_v8, %v1124_v6  ;;  %v1058_v12 = vpop.permute.xlu1 %1057 }
 0x3c7   : > { %v1069_v27 = vmax.f32 %v1049_v40, %v1058_v12 }
 0x3c8   : > { %1143 = vrot.lane.b32.xlu0 %v1132_v11, %s1441_s29 }
 0x3ca   : > { %v1060_v15 = vpop.permute.xlu0 %1059  ;;  %v1062_v17 = vpop.permute.xlu1 %1061 }
 0x3cb   : > { %v1070_v43 = vmax.f32 %v1050_v45, %v1060_v15  ;;  %v1071_v53 = vmax.f32 %v1051_v48, %v1062_v17 }
 0x3ce   : > { %v1064_v18 = vpop.permute.xlu0 %1063 }
 0x3cf   : > { %v1072_v39 = vmax.f32 %v1052_v56, %v1064_v18 }
 0x42e   : > { %v1138_v26 = vpop.permute.xlu1 %1137 }
 0x42f   : > { %v1149_v30 = vmax.f32 %v1129_v61, %v1138_v26 }
 0x431   : > { %v1153_v35 = vmax.f32 %v1069_v27, %v1149_v30 }
 0x432   : > { %v1140_v38 = vpop.permute.xlu0 %1139 }
 0x433   : > { %1158 = vst.msk [vmem:[%s170_s24] sm:$0xff] %vm1157_vm10, %v1153_v35  ;;  %v1150_v46 = vmax.f32 %v1130_v1, %v1140_v38 }
 0x435   : > { %v1154_v47 = vmax.f32 %v1070_v43, %v1150_v46 }
 0x436   : > { %v1142_v52 = vpop.permute.xlu1 %1141 }
 0x437   : > { %1159 = vst.msk [vmem:[%s170_s24 + $0x8] sm:$0xff] %vm1157_vm10, %v1154_v47  ;;  %v1151_v54 = vmax.f32 %v1131_v5, %v1142_v52 }
 0x439   : > { %v1155_v59 = vmax.f32 %v1071_v53, %v1151_v54 }
 0x43a   : > { %v1144_v60 = vpop.permute.xlu0 %1143 }
 0x43b   : > { %1160 = vst.msk [vmem:[%s170_s24 + $0x10] sm:$0xff] %vm1157_vm10, %v1155_v59  ;;  %v1152_v55 = vmax.f32 %v1132_v11, %v1144_v60 }
 0x43d   : > { %v1156_v10 = vmax.f32 %v1072_v39, %v1152_v55 }
 0x43f   : > { %1161 = vst.msk [vmem:[%s170_s24 + $0x18] sm:$0xff] %vm1157_vm10, %v1156_v10 }
 0x440 PF: > { %s13_s12 = sadd.s32 1, %s1432_s12  }
 0x441   : > { %p10_p4 = scmp.ge.s32.totalorder %s13_s12, 4  }
 0x443   :  { %12 = sbr.rel (!%p10_p4) target bundleno = 1 (0x1), region = 62 }

// kernel: downsample_fft_full.5
= control target key start
LH: loop header
LB: loop body
LE: loop exit
PB: predicated region body
PF: predicated region fallthrough
CT: control target
= control target key end

     0   :  { %s2082_s12 = smov 0   ;;  %s3107_s0 = inlined_call_operand.vmem [shape: f32[2,64,28], index: 0, kind: input, shape index: {}]   ;;  %s3108_s1 = inlined_call_operand.vmem [shape: f32[128,1024], index: 1, kind: input, shape index: {}]   ;;  %s3109_s2 = inlined_call_operand.vmem [shape: f32[128,1], index: 2, kind: input, shape index: {}]   ;;  %s3110_s3 = inlined_call_operand.vmem [shape: f32[2,128,13], index: 3, kind: output, shape index: {}]  }
   0x1 LB: > { %s1679_s13 = sadd.s32 4294967295, %s2044_s12   ;;  %p1683_p0 = scmp.ge.s32.totalorder %s2044_s12, 1  ;;  %s2044_s12 = sphi %s2082_s12, %s13_s12  }
   0x2   : > { %p137_p1 = scmp.lt.s32.totalorder %s2044_s12, 3 }
   0x4   : > { %p138_p2 = pnand %p1683_p0, %p137_p1 }
   0x6   : > { %141 = sbr.rel (%p138_p2) target bundleno = 639 (0x27f), region = 32 }
   0xb   : > { %p161_p3 = scmp.lt.s32.totalorder %s1679_s13, 1  ;;  %vm179_vm0 = vcmask 105472   ;;  %s2046_s18 = smov 125   ;;  %v677_v8 = vld [vmem:[%s3108_s1 + $0x8] sm:$0xff]  ;;  %v679_v11 = vld [vmem:[%s3108_s1 + $0x18] sm:$0xff] }
   0xc   : > { %s2047_s19 = smov 127   ;;  %s2048_s20 = smov 121   ;;  %1092 = vmatprep.mubr.f32.mxu0 %v677_v8  ;;  %1237 = vmatprep.mubr.f32.mxu1 %v679_v11 }
   0xd   : > { %s3142_s13 = smov (!%p161_p3, %s1679_s13), 1  ;;  %s2049_s21 = smov 123  }
   0xe   : > { %s1690_s14 = sshll.u32 %s3142_s13, 6  ;;  %s2050_s22 = smov 126  }
   0xf   : > { %s165_s17 = scalar_lea.vmem %s3107_s0, %s1690_s14  ;;  %s2051_s23 = smov 122  }
  0x10   : > { %v2096_v0 = vld [vmem:[%s165_s17 + $0x38] sm:$0xff]  ;;  %v2098_v1 = vld [vmem:[%s165_s17 + $0x30] sm:$0xff]  ;;  %v2100_v2 = vld [vmem:[%s165_s17 + $0x28] sm:$0xff]  ;;  %s2052_s24 = smov 124   ;;  %s2053_s27 = smov 117  }
  0x11   : > { %282 = vrot.lane.b32.xlu0 %v2096_v0, %s2046_s18  ;;  %280 = vrot.lane.b32.xlu1 %v2098_v1, %s2046_s18  ;;  %v2106_v3 = vld [vmem:[%s165_s17 + $0x20] sm:$0xff]  ;;  %v2108_v4 = vld [vmem:[%s165_s17 + $0x18] sm:$0xff]  ;;  %185 = vst.msk [vmem:[#allocation2 + $0x28] sm:$0xff] %vm179_vm0, %v2100_v2  ;;  %186 = vst.msk [vmem:[#allocation2 + $0x30] sm:$0xff] %vm179_vm0, %v2098_v1  ;;  %s2054_s28 = smov 119   ;;  %s2055_s4 = smov 113  }
  0x12   : > { %187 = vst.msk [vmem:[#allocation2 + $0x38] sm:$0xff] %vm179_vm0, %v2096_v0  ;;  %v2116_v5 = vld [vmem:[%s165_s17 + $0x10] sm:$0xff]  ;;  %v2118_v6 = vld [vmem:[%s165_s17 + $0x8] sm:$0xff]  ;;  %v2120_v7 = vld [vmem:[%s165_s17] sm:$0xff]  ;;  %s2056_s5 = smov 115   ;;  %s2057_s6 = smov 118  }
  0x13   : > { %183 = vst.msk [vmem:[#allocation2 + $0x18] sm:$0xff] %vm179_vm0, %v2108_v4  ;;  %184 = vst.msk [vmem:[#allocation2 + $0x20] sm:$0xff] %vm179_vm0, %v2106_v3  ;;  %s2058_s7 = smov 120   ;;  %s2059_s8 = smov 114  }
  0x14   : > { %180 = vst.msk [vmem:[#allocation2] sm:$0xff] %vm179_vm0, %v2120_v7  ;;  %181 = vst.msk [vmem:[#allocation2 + $0x8] sm:$0xff] %vm179_vm0, %v2118_v6  ;;  %s2060_s9 = smov 116  }
  0x15   : > { %182 = vst.msk [vmem:[#allocation2 + $0x10] sm:$0xff] %vm179_vm0, %v2116_v5  ;;  %218 = vrot.lane.b32.xlu0 %v2096_v0, %s2047_s19  ;;  %410 = vrot.lane.b32.xlu1 %v2096_v0, %s2048_s20 }
  0x19   : > { %216 = vrot.lane.b32.xlu0 %v2098_v1, %s2047_s19  ;;  %346 = vrot.lane.b32.xlu1 %v2096_v0, %s2049_s21 }
  0x1d   : > { %278 = vrot.lane.b32.xlu0 %v2100_v2, %s2046_s18  ;;  %408 = vrot.lane.b32.xlu1 %v2098_v1, %s2048_s20 }
  0x21   : > { %214 = vrot.lane.b32.xlu0 %v2100_v2, %s2047_s19  ;;  %344 = vrot.lane.b32.xlu1 %v2098_v1, %s2049_s21 }
  0x25   : > { %276 = vrot.lane.b32.xlu0 %v2106_v3, %s2046_s18  ;;  %406 = vrot.lane.b32.xlu1 %v2100_v2, %s2048_s20 }
  0x29   : > { %212 = vrot.lane.b32.xlu0 %v2106_v3, %s2047_s19  ;;  %342 = vrot.lane.b32.xlu1 %v2100_v2, %s2049_s21 }
  0x2d   : > { %266 = vrot.lane.b32.xlu0 %v2108_v4, %s2046_s18  ;;  %404 = vrot.lane.b32.xlu1 %v2106_v3, %s2048_s20 }
  0x31   : > { %198 = vrot.lane.b32.xlu0 %v2108_v4, %s2047_s19  ;;  %340 = vrot.lane.b32.xlu1 %v2106_v3, %s2049_s21 }
  0x35   : > { %264 = vrot.lane.b32.xlu0 %v2116_v5, %s2046_s18  ;;  %394 = vrot.lane.b32.xlu1 %v2108_v4, %s2048_s20 }
  0x39   : > { %196 = vrot.lane.b32.xlu0 %v2116_v5, %s2047_s19  ;;  %330 = vrot.lane.b32.xlu1 %v2108_v4, %s2049_s21 }
  0x3d   : > { %262 = vrot.lane.b32.xlu0 %v2118_v6, %s2046_s18  ;;  %392 = vrot.lane.b32.xlu1 %v2116_v5, %s2048_s20 }
  0x41   : > { %194 = vrot.lane.b32.xlu0 %v2118_v6, %s2047_s19  ;;  %328 = vrot.lane.b32.xlu1 %v2116_v5, %s2049_s21 }
  0x45   : > { %260 = vrot.lane.b32.xlu0 %v2120_v7, %s2046_s18  ;;  %390 = vrot.lane.b32.xlu1 %v2118_v6, %s2048_s20 }
  0x49   : > { %192 = vrot.lane.b32.xlu0 %v2120_v7, %s2047_s19  ;;  %326 = vrot.lane.b32.xlu1 %v2118_v6, %s2049_s21 }
  0x4d   : > { %250 = vrot.lane.b32.xlu0 %v2096_v0, %s2050_s22  ;;  %388 = vrot.lane.b32.xlu1 %v2120_v7, %s2048_s20 }
  0x51   : > { %324 = vrot.lane.b32.xlu0 %v2120_v7, %s2049_s21  ;;  %248 = vrot.lane.b32.xlu1 %v2098_v1, %s2050_s22  ;;  %s1691_s21 = sshll.u32 %s3142_s13, 7 }
  0x55   : > { %378 = vrot.lane.b32.xlu0 %v2096_v0, %s2051_s23  ;;  %314 = vrot.lane.b32.xlu1 %v2096_v0, %s2052_s24 }
  0x59   : > { %246 = vrot.lane.b32.xlu0 %v2100_v2, %s2050_s22  ;;  %376 = vrot.lane.b32.xlu1 %v2098_v1, %s2051_s23 }
  0x5d   : > { %312 = vrot.lane.b32.xlu0 %v2098_v1, %s2052_s24  ;;  %244 = vrot.lane.b32.xlu1 %v2106_v3, %s2050_s22 }
  0x61   : > { %374 = vrot.lane.b32.xlu0 %v2100_v2, %s2051_s23  ;;  %310 = vrot.lane.b32.xlu1 %v2100_v2, %s2052_s24 }
  0x65   : > { %234 = vrot.lane.b32.xlu0 %v2108_v4, %s2050_s22  ;;  %372 = vrot.lane.b32.xlu1 %v2106_v3, %s2051_s23 }
  0x69   : > { %308 = vrot.lane.b32.xlu0 %v2106_v3, %s2052_s24  ;;  %232 = vrot.lane.b32.xlu1 %v2116_v5, %s2050_s22 }
  0x6d   : > { %362 = vrot.lane.b32.xlu0 %v2108_v4, %s2051_s23  ;;  %298 = vrot.lane.b32.xlu1 %v2108_v4, %s2052_s24 }
  0x71   : > { %230 = vrot.lane.b32.xlu0 %v2118_v6, %s2050_s22  ;;  %360 = vrot.lane.b32.xlu1 %v2116_v5, %s2051_s23 }
  0x75   : > { %296 = vrot.lane.b32.xlu0 %v2116_v5, %s2052_s24  ;;  %228 = vrot.lane.b32.xlu1 %v2120_v7, %s2050_s22 }
  0x79   : > { %358 = vrot.lane.b32.xlu0 %v2118_v6, %s2051_s23  ;;  %294 = vrot.lane.b32.xlu1 %v2118_v6, %s2052_s24 }
  0x7d   : > { %356 = vrot.lane.b32.xlu0 %v2120_v7, %s2051_s23  ;;  %292 = vrot.lane.b32.xlu1 %v2120_v7, %s2052_s24  ;;  %s3016_s24 = scalar_lea.vmem %s3110_s3, %s1691_s21 }
  0x81   : > { %538 = vrot.lane.b32.xlu0 %v2096_v0, %s2053_s27  ;;  %474 = vrot.lane.b32.xlu1 %v2096_v0, %s2054_s28 }
  0x83   : > { %v283_v9 = vpop.permute.xlu0 %282  ;;  %v281_v10 = vpop.permute.xlu1 %280 }
  0x84   : > { %291 = vst.msk [vmem:[#allocation2 + $0xf8] sm:$0xff] %vm179_vm0, %v283_v9  ;;  %290 = vst.msk [vmem:[#allocation2 + $0xf0] sm:$0xff] %vm179_vm0, %v281_v10 }
  0x85   : > { %536 = vrot.lane.b32.xlu0 %v2098_v1, %s2053_s27  ;;  %666 = vrot.lane.b32.xlu1 %v2096_v0, %s2055_s4 }
  0x87   : > { %v219_v12 = vpop.permute.xlu0 %218  ;;  %v411_v13 = vpop.permute.xlu1 %410 }
  0x88   : > { %227 = vst.msk [vmem:[#allocation2 + $0x78] sm:$0xff] %vm179_vm0, %v219_v12  ;;  %419 = vst.msk [vmem:[#allocation2 + $0x1f8] sm:$0xff] %vm179_vm0, %v411_v13 }
  0x89   : > { %472 = vrot.lane.b32.xlu0 %v2098_v1, %s2054_s28  ;;  %602 = vrot.lane.b32.xlu1 %v2096_v0, %s2056_s5 }
  0x8b   : > { %v217_v14 = vpop.permute.xlu0 %216  ;;  %v851_v15 = vld [vmem:[#allocation2 + $0xf8] sm:$0xff]  ;;  %v347_v16 = vpop.permute.xlu1 %346  ;;  %v850_v21 = vld [vmem:[#allocation2 + $0xf0] sm:$0xff] }
  0x8c   : > { %226 = vst.msk [vmem:[#allocation2 + $0x70] sm:$0xff] %vm179_vm0, %v217_v14  ;;  %1692 = vmatprep.subr.mxu0 %v851_v15  ;;  %355 = vst.msk [vmem:[#allocation2 + $0x178] sm:$0xff] %vm179_vm0, %v347_v16 }
  0x8d   : > { %534 = vrot.lane.b32.xlu0 %v2100_v2, %s2053_s27  ;;  %664 = vrot.lane.b32.xlu1 %v2098_v1, %s2055_s4 }
  0x8f   : > { %v279_v17 = vpop.permute.xlu0 %278  ;;  %v835_v18 = vld [vmem:[#allocation2 + $0x78] sm:$0xff]  ;;  %v409_v19 = vpop.permute.xlu1 %408 }
  0x90   : > { %v883_v20 = vld [vmem:[#allocation2 + $0x1f8] sm:$0xff]  ;;  %289 = vst.msk [vmem:[#allocation2 + $0xe8] sm:$0xff] %vm179_vm0, %v279_v17  ;;  %1693 = vmatpush3.msra.mxu0 %v835_v18  ;;  %418 = vst.msk [vmem:[#allocation2 + $0x1f0] sm:$0xff] %vm179_vm0, %v409_v19 }
  0x91   : > { %1772 = vmatprep.subr.mxu1 %v883_v20  ;;  %1694 = vmatprep.subr.mxu0 %v850_v21  ;;  %v827_v18 = vld [vmem:[#allocation2 + $0x38] sm:$0xff] }
  0x92   : > { %470 = vrot.lane.b32.xlu0 %v2100_v2, %s2054_s28  ;;  %600 = vrot.lane.b32.xlu1 %v2098_v1, %s2056_s5 }
  0x93   : > { %v215_v22 = vpop.permute.xlu0 %214  ;;  %v834_v23 = vld [vmem:[#allocation2 + $0x70] sm:$0xff]  ;;  %v345_v24 = vpop.permute.xlu1 %344  ;;  %v867_v25 = vld [vmem:[#allocation2 + $0x178] sm:$0xff] }
  0x94   : > { %225 = vst.msk [vmem:[#allocation2 + $0x68] sm:$0xff] %vm179_vm0, %v215_v22  ;;  %1695 = vmatpush3.msra.mxu0 %v834_v23  ;;  %354 = vst.msk [vmem:[#allocation2 + $0x170] sm:$0xff] %vm179_vm0, %v345_v24  ;;  %1773 = vmatpush3.msra.mxu1 %v867_v25  ;;  %v826_v23 = vld [vmem:[#allocation2 + $0x30] sm:$0xff] }
  0x96   : > { %532 = vrot.lane.b32.xlu0 %v2106_v3, %s2053_s27  ;;  %662 = vrot.lane.b32.xlu1 %v2100_v2, %s2055_s4 }
  0x97   : > { %v277_v26 = vpop.permute.xlu0 %276  ;;  %v407_v27 = vpop.permute.xlu1 %406  ;;  %v849_v28 = vld [vmem:[#allocation2 + $0xe8] sm:$0xff]  ;;  %v882_v29 = vld [vmem:[#allocation2 + $0x1f0] sm:$0xff] }
  0x98   : > { %288 = vst.msk [vmem:[#allocation2 + $0xe0] sm:$0xff] %vm179_vm0, %v277_v26  ;;  %417 = vst.msk [vmem:[#allocation2 + $0x1e8] sm:$0xff] %vm179_vm0, %v407_v27  ;;  %1696 = vmatprep.subr.mxu0 %v849_v28  ;;  %1774 = vmatprep.subr.mxu1 %v882_v29 }
  0x9a   : > { %468 = vrot.lane.b32.xlu0 %v2106_v3, %s2054_s28  ;;  %598 = vrot.lane.b32.xlu1 %v2100_v2, %s2056_s5 }
  0x9b   : > { %v213_v30 = vpop.permute.xlu0 %212  ;;  %v343_v31 = vpop.permute.xlu1 %342  ;;  %v833_v32 = vld [vmem:[#allocation2 + $0x68] sm:$0xff]  ;;  %v866_v33 = vld [vmem:[#allocation2 + $0x170] sm:$0xff] }
  0x9c   : > { %224 = vst.msk [vmem:[#allocation2 + $0x60] sm:$0xff] %vm179_vm0, %v213_v30  ;;  %353 = vst.msk [vmem:[#allocation2 + $0x168] sm:$0xff] %vm179_vm0, %v343_v31  ;;  %1697 = vmatpush3.msra.mxu0 %v833_v32  ;;  %1775 = vmatpush3.msra.mxu1 %v866_v33  ;;  %v825_v31 = vld [vmem:[#allocation2 + $0x28] sm:$0xff] }
  0x9e   : > { %522 = vrot.lane.b32.xlu0 %v2108_v4, %s2053_s27  ;;  %660 = vrot.lane.b32.xlu1 %v2106_v3, %s2055_s4 }
  0x9f   : > { %v267_v34 = vpop.permute.xlu0 %266  ;;  %v405_v35 = vpop.permute.xlu1 %404  ;;  %v848_v36 = vld [vmem:[#allocation2 + $0xe0] sm:$0xff]  ;;  %v881_v37 = vld [vmem:[#allocation2 + $0x1e8] sm:$0xff] }
  0xa0   : > { %275 = vst.msk [vmem:[#allocation2 + $0xd8] sm:$0xff] %vm179_vm0, %v267_v34  ;;  %416 = vst.msk [vmem:[#allocation2 + $0x1e0] sm:$0xff] %vm179_vm0, %v405_v35  ;;  %1698 = vmatprep.subr.mxu0 %v848_v36  ;;  %1776 = vmatprep.subr.mxu1 %v881_v37  ;;  %v824_v36 = vld [vmem:[#allocation2 + $0x20] sm:$0xff] }
  0xa2   : > { %458 = vrot.lane.b32.xlu0 %v2108_v4, %s2054_s28  ;;  %596 = vrot.lane.b32.xlu1 %v2106_v3, %s2056_s5 }
  0xa3   : > { %v199_v38 = vpop.permute.xlu0 %198  ;;  %v341_v39 = vpop.permute.xlu1 %340  ;;  %v832_v40 = vld [vmem:[#allocation2 + $0x60] sm:$0xff]  ;;  %v865_v41 = vld [vmem:[#allocation2 + $0x168] sm:$0xff] }
  0xa4   : > { %207 = vst.msk [vmem:[#allocation2 + $0x58] sm:$0xff] %vm179_vm0, %v199_v38  ;;  %352 = vst.msk [vmem:[#allocation2 + $0x160] sm:$0xff] %vm179_vm0, %v341_v39  ;;  %1699 = vmatpush3.msra.mxu0 %v832_v40  ;;  %1777 = vmatpush3.msra.mxu1 %v865_v41 }
  0xa6   : > { %520 = vrot.lane.b32.xlu0 %v2116_v5, %s2053_s27  ;;  %650 = vrot.lane.b32.xlu1 %v2108_v4, %s2055_s4 }
  0xa7   : > { %v265_v42 = vpop.permute.xlu0 %264  ;;  %v395_v43 = vpop.permute.xlu1 %394  ;;  %v847_v44 = vld [vmem:[#allocation2 + $0xd8] sm:$0xff]  ;;  %v880_v45 = vld [vmem:[#allocation2 + $0x1e0] sm:$0xff] }
  0xa8   : > { %274 = vst.msk [vmem:[#allocation2 + $0xd0] sm:$0xff] %vm179_vm0, %v265_v42  ;;  %403 = vst.msk [vmem:[#allocation2 + $0x1d8] sm:$0xff] %vm179_vm0, %v395_v43  ;;  %1700 = vmatprep.subr.mxu0 %v847_v44  ;;  %1778 = vmatprep.subr.mxu1 %v880_v45  ;;  %v823_v44 = vld [vmem:[#allocation2 + $0x18] sm:$0xff] }
  0xaa   : > { %456 = vrot.lane.b32.xlu0 %v2116_v5, %s2054_s28  ;;  %586 = vrot.lane.b32.xlu1 %v2108_v4, %s2056_s5 }
  0xab   : > { %v197_v46 = vpop.permute.xlu0 %196  ;;  %v331_v47 = vpop.permute.xlu1 %330  ;;  %v831_v48 = vld [vmem:[#allocation2 + $0x58] sm:$0xff]  ;;  %v864_v49 = vld [vmem:[#allocation2 + $0x160] sm:$0xff] }
  0xac   : > { %206 = vst.msk [vmem:[#allocation2 + $0x50] sm:$0xff] %vm179_vm0, %v197_v46  ;;  %339 = vst.msk [vmem:[#allocation2 + $0x158] sm:$0xff] %vm179_vm0, %v331_v47  ;;  %1701 = vmatpush3.msra.mxu0 %v831_v48  ;;  %1779 = vmatpush3.msra.mxu1 %v864_v49  ;;  %v822_v48 = vld [vmem:[#allocation2 + $0x10] sm:$0xff] }
  0xae   : > { %518 = vrot.lane.b32.xlu0 %v2118_v6, %s2053_s27  ;;  %648 = vrot.lane.b32.xlu1 %v2116_v5, %s2055_s4 }
  0xaf   : > { %v263_v50 = vpop.permute.xlu0 %262  ;;  %v393_v51 = vpop.permute.xlu1 %392  ;;  %v846_v52 = vld [vmem:[#allocation2 + $0xd0] sm:$0xff]  ;;  %v879_v53 = vld [vmem:[#allocation2 + $0x1d8] sm:$0xff] }
  0xb0   : > { %273 = vst.msk [vmem:[#allocation2 + $0xc8] sm:$0xff] %vm179_vm0, %v263_v50  ;;  %402 = vst.msk [vmem:[#allocation2 + $0x1d0] sm:$0xff] %vm179_vm0, %v393_v51  ;;  %1702 = vmatprep.subr.mxu0 %v846_v52  ;;  %1780 = vmatprep.subr.mxu1 %v879_v53 }
  0xb2   : > { %454 = vrot.lane.b32.xlu0 %v2118_v6, %s2054_s28  ;;  %584 = vrot.lane.b32.xlu1 %v2116_v5, %s2056_s5 }
  0xb3   : > { %v195_v54 = vpop.permute.xlu0 %194  ;;  %v329_v55 = vpop.permute.xlu1 %328  ;;  %v830_v56 = vld [vmem:[#allocation2 + $0x50] sm:$0xff]  ;;  %v863_v57 = vld [vmem:[#allocation2 + $0x158] sm:$0xff] }
  0xb4   : > { %205 = vst.msk [vmem:[#allocation2 + $0x48] sm:$0xff] %vm179_vm0, %v195_v54  ;;  %338 = vst.msk [vmem:[#allocation2 + $0x150] sm:$0xff] %vm179_vm0, %v329_v55  ;;  %1703 = vmatpush3.msra.mxu0 %v830_v56  ;;  %1781 = vmatpush3.msra.mxu1 %v863_v57  ;;  %v821_v56 = vld [vmem:[#allocation2 + $0x8] sm:$0xff] }
  0xb6   : > { %516 = vrot.lane.b32.xlu0 %v2120_v7, %s2053_s27  ;;  %646 = vrot.lane.b32.xlu1 %v2118_v6, %s2055_s4 }
  0xb7   : > { %v261_v58 = vpop.permute.xlu0 %260  ;;  %v391_v59 = vpop.permute.xlu1 %390  ;;  %v845_v60 = vld [vmem:[#allocation2 + $0xc8] sm:$0xff]  ;;  %v878_v61 = vld [vmem:[#allocation2 + $0x1d0] sm:$0xff] }
  0xb8   : > { %272 = vst.msk [vmem:[#allocation2 + $0xc0] sm:$0xff] %vm179_vm0, %v261_v58  ;;  %401 = vst.msk [vmem:[#allocation2 + $0x1c8] sm:$0xff] %vm179_vm0, %v391_v59  ;;  %1704 = vmatprep.subr.mxu0 %v845_v60  ;;  %1782 = vmatprep.subr.mxu1 %v878_v61  ;;  %v820_v61 = vld [vmem:[#allocation2] sm:$0xff] }
  0xba   : > { %452 = vrot.lane.b32.xlu0 %v2120_v7, %s2054_s28  ;;  %582 = vrot.lane.b32.xlu1 %v2118_v6, %s2056_s5 }
  0xbb   : > { %v193_v62 = vpop.permute.xlu0 %192  ;;  %v327_v63 = vpop.permute.xlu1 %326  ;;  %v829_v8 = vld [vmem:[#allocation2 + $0x48] sm:$0xff]  ;;  %v862_v9 = vld [vmem:[#allocation2 + $0x150] sm:$0xff] }
  0xbc   : > { %204 = vst.msk [vmem:[#allocation2 + $0x40] sm:$0xff] %vm179_vm0, %v193_v62  ;;  %337 = vst.msk [vmem:[#allocation2 + $0x148] sm:$0xff] %vm179_vm0, %v327_v63  ;;  %1705 = vmatpush3.msra.mxu0 %v829_v8  ;;  %1783 = vmatpush3.msra.mxu1 %v862_v9  ;;  %v676_v9 = vld [vmem:[%s3108_s1] sm:$0xff] }
  0xbe   : > { %506 = vrot.lane.b32.xlu0 %v2096_v0, %s2057_s6  ;;  %644 = vrot.lane.b32.xlu1 %v2120_v7, %s2055_s4 }
  0xbf   : > { %v251_v10 = vpop.permute.xlu0 %250  ;;  %v389_v11 = vpop.permute.xlu1 %388  ;;  %v844_v12 = vld [vmem:[#allocation2 + $0xc0] sm:$0xff]  ;;  %v877_v13 = vld [vmem:[#allocation2 + $0x1c8] sm:$0xff] }
  0xc0   : > { %259 = vst.msk [vmem:[#allocation2 + $0xb8] sm:$0xff] %vm179_vm0, %v251_v10  ;;  %400 = vst.msk [vmem:[#allocation2 + $0x1c0] sm:$0xff] %vm179_vm0, %v389_v11  ;;  %1706 = vmatprep.subr.mxu0 %v844_v12  ;;  %1784 = vmatprep.subr.mxu1 %v877_v13  ;;  %v685_v10 = vld [vmem:[%s3108_s1 + $0x48] sm:$0xff] }
  0xc2   : > { %442 = vrot.lane.b32.xlu0 %v2096_v0, %s2058_s7  ;;  %580 = vrot.lane.b32.xlu1 %v2120_v7, %s2056_s5 }
  0xc3   : > { %v325_v14 = vpop.permute.xlu0 %324  ;;  %v249_v15 = vpop.permute.xlu1 %248  ;;  %v828_v16 = vld [vmem:[#allocation2 + $0x40] sm:$0xff]  ;;  %v861_v17 = vld [vmem:[#allocation2 + $0x148] sm:$0xff] }
  0xc4   : > { %336 = vst.msk [vmem:[#allocation2 + $0x140] sm:$0xff] %vm179_vm0, %v325_v14  ;;  %258 = vst.msk [vmem:[#allocation2 + $0xb0] sm:$0xff] %vm179_vm0, %v249_v15  ;;  %1707 = vmatpush3.msra.mxu0 %v828_v16  ;;  %1785 = vmatpush3.msra.mxu1 %v861_v17  ;;  %v684_v15 = vld [vmem:[%s3108_s1 + $0x40] sm:$0xff]  ;;  %v693_v16 = vld [vmem:[%s3108_s1 + $0x88] sm:$0xff] }
  0xc6   : > { %504 = vrot.lane.b32.xlu0 %v2098_v1, %s2057_s6  ;;  %634 = vrot.lane.b32.xlu1 %v2096_v0, %s2059_s8 }
  0xc7   : > { %v379_v19 = vpop.permute.xlu0 %378  ;;  %v315_v20 = vpop.permute.xlu1 %314  ;;  %v843_v21 = vld [vmem:[#allocation2 + $0xb8] sm:$0xff]  ;;  %v876_v22 = vld [vmem:[#allocation2 + $0x1c0] sm:$0xff] }
  0xc8   : > { %387 = vst.msk [vmem:[#allocation2 + $0x1b8] sm:$0xff] %vm179_vm0, %v379_v19  ;;  %323 = vst.msk [vmem:[#allocation2 + $0x138] sm:$0xff] %vm179_vm0, %v315_v20  ;;  %1708 = vmatprep.subr.mxu0 %v843_v21  ;;  %1786 = vmatprep.subr.mxu1 %v876_v22  ;;  %v678_v20 = vld [vmem:[%s3108_s1 + $0x10] sm:$0xff]  ;;  %v692_v21 = vld [vmem:[%s3108_s1 + $0x80] sm:$0xff] }
  0xc9   : > { %1709 = vmatpush3.msra.mxu0 %v827_v18  ;;  %v687_v22 = vld [vmem:[%s3108_s1 + $0x58] sm:$0xff] }
  0xca   : > { %440 = vrot.lane.b32.xlu0 %v2098_v1, %s2058_s7  ;;  %570 = vrot.lane.b32.xlu1 %v2096_v0, %s2060_s9 }
  0xcb   : > { %v247_v24 = vpop.permute.xlu0 %246  ;;  %v377_v25 = vpop.permute.xlu1 %376  ;;  %v860_v26 = vld [vmem:[#allocation2 + $0x140] sm:$0xff]  ;;  %v842_v27 = vld [vmem:[#allocation2 + $0xb0] sm:$0xff] }
  0xcc   : > { %257 = vst.msk [vmem:[#allocation2 + $0xa8] sm:$0xff] %vm179_vm0, %v247_v24  ;;  %386 = vst.msk [vmem:[#allocation2 + $0x1b0] sm:$0xff] %vm179_vm0, %v377_v25  ;;  %1787 = vmatpush3.msra.mxu1 %v860_v26  ;;  %1710 = vmatprep.subr.mxu0 %v842_v27 }
  0xcd   : > { %1711 = vmatpush3.msra.mxu0 %v826_v23  ;;  %v701_v23 = vld [vmem:[%s3108_s1 + $0xc8] sm:$0xff] }
  0xce   : > { %502 = vrot.lane.b32.xlu0 %v2100_v2, %s2057_s6  ;;  %632 = vrot.lane.b32.xlu1 %v2098_v1, %s2059_s8 }
  0xcf   : > { %v313_v28 = vpop.permute.xlu0 %312  ;;  %v245_v0 = vpop.permute.xlu1 %244  ;;  %v875_v29 = vld [vmem:[#allocation2 + $0x1b8] sm:$0xff] }
  0xd0   : > { %v859_v30 = vld [vmem:[#allocation2 + $0x138] sm:$0xff]  ;;  %322 = vst.msk [vmem:[#allocation2 + $0x130] sm:$0xff] %vm179_vm0, %v313_v28  ;;  %256 = vst.msk [vmem:[#allocation2 + $0xa0] sm:$0xff] %vm179_vm0, %v245_v0  ;;  %1788 = vmatprep.subr.mxu1 %v875_v29  ;;  %v686_v28 = vld [vmem:[%s3108_s1 + $0x50] sm:$0xff] }
  0xd1   : > { %1789 = vmatpush3.msra.mxu1 %v859_v30  ;;  %v695_v0 = vld [vmem:[%s3108_s1 + $0x98] sm:$0xff]  ;;  %v694_v29 = vld [vmem:[%s3108_s1 + $0x90] sm:$0xff]  ;;  %v709_v30 = vld [vmem:[%s3108_s1 + $0x108] sm:$0xff] }
  0xd2   : > { %438 = vrot.lane.b32.xlu0 %v2100_v2, %s2058_s7  ;;  %568 = vrot.lane.b32.xlu1 %v2098_v1, %s2060_s9 }
  0xd3   : > { %v375_v32 = vpop.permute.xlu0 %374  ;;  %v311_v33 = vpop.permute.xlu1 %310  ;;  %v841_v34 = vld [vmem:[#allocation2 + $0xa8] sm:$0xff]  ;;  %v874_v35 = vld [vmem:[#allocation2 + $0x1b0] sm:$0xff] }
  0xd4   : > { %385 = vst.msk [vmem:[#allocation2 + $0x1a8] sm:$0xff] %vm179_vm0, %v375_v32  ;;  %321 = vst.msk [vmem:[#allocation2 + $0x128] sm:$0xff] %vm179_vm0, %v311_v33  ;;  %1712 = vmatprep.subr.mxu0 %v841_v34  ;;  %1790 = vmatprep.subr.mxu1 %v874_v35  ;;  %v804_v35 = vld [vmem:[%s3109_s2] sm:$0xff] }
  0xd5   : > { %1713 = vmatpush3.msra.mxu0 %v825_v31 }
  0xd6   : > { %500 = vrot.lane.b32.xlu0 %v2106_v3, %s2057_s6  ;;  %630 = vrot.lane.b32.xlu1 %v2100_v2, %s2059_s8 }
  0xd7   : > { %v235_v1 = vpop.permute.xlu0 %234  ;;  %v373_v37 = vpop.permute.xlu1 %372  ;;  %v858_v38 = vld [vmem:[#allocation2 + $0x130] sm:$0xff]  ;;  %v840_v39 = vld [vmem:[#allocation2 + $0xa0] sm:$0xff] }
  0xd8   : > { %243 = vst.msk [vmem:[#allocation2 + $0x98] sm:$0xff] %vm179_vm0, %v235_v1  ;;  %384 = vst.msk [vmem:[#allocation2 + $0x1a0] sm:$0xff] %vm179_vm0, %v373_v37  ;;  %1791 = vmatpush3.msra.mxu1 %v858_v38  ;;  %1714 = vmatprep.subr.mxu0 %v840_v39  ;;  %v2061_v1 = vmov 0   ;;  %v702_v37 = vld [vmem:[%s3108_s1 + $0xd0] sm:$0xff]  ;;  %v717_v38 = vld [vmem:[%s3108_s1 + $0x148] sm:$0xff] }
  0xd9   : > { %1715 = vmatpush3.msra.mxu0 %v824_v36  ;;  %v703_v36 = vld [vmem:[%s3108_s1 + $0xd8] sm:$0xff]  ;;  %2036 = vset.pattern.permute.xlu0 %v2061_v1 }
  0xda   : > { %436 = vrot.lane.b32.xlu0 %v2106_v3, %s2058_s7  ;;  %566 = vrot.lane.b32.xlu1 %v2100_v2, %s2060_s9 }
  0xdb   : > { %v309_v40 = vpop.permute.xlu0 %308  ;;  %v233_v41 = vpop.permute.xlu1 %232  ;;  %v873_v42 = vld [vmem:[#allocation2 + $0x1a8] sm:$0xff]  ;;  %2037 = vset.pattern.permute.xlu1 %v2061_v1 }
  0xdc   : > { %v857_v43 = vld [vmem:[#allocation2 + $0x128] sm:$0xff]  ;;  %320 = vst.msk [vmem:[#allocation2 + $0x120] sm:$0xff] %vm179_vm0, %v309_v40  ;;  %242 = vst.msk [vmem:[#allocation2 + $0x90] sm:$0xff] %vm179_vm0, %v233_v41  ;;  %1792 = vmatprep.subr.mxu1 %v873_v42 }
  0xdd   : > { %1793 = vmatpush3.msra.mxu1 %v857_v43  ;;  %v805_v42 = vld [vmem:[%s3109_s2 + $0x8] sm:$0xff] }
  0xde   : > { %490 = vrot.lane.b32.xlu0 %v2108_v4, %s2057_s6  ;;  %628 = vrot.lane.b32.xlu1 %v2106_v3, %s2059_s8  ;;  %v773_v1 = vld [vmem:[%s3108_s1 + $0x308] sm:$0xff] }
  0xdf   : > { %v363_v45 = vpop.permute.xlu0 %362  ;;  %v299_v46 = vpop.permute.xlu1 %298  ;;  %v839_v2 = vld [vmem:[#allocation2 + $0x98] sm:$0xff]  ;;  %v872_v47 = vld [vmem:[#allocation2 + $0x1a0] sm:$0xff] }
  0xe0   : > { %371 = vst.msk [vmem:[#allocation2 + $0x198] sm:$0xff] %vm179_vm0, %v363_v45  ;;  %307 = vst.msk [vmem:[#allocation2 + $0x118] sm:$0xff] %vm179_vm0, %v299_v46  ;;  %1716 = vmatprep.subr.mxu0 %v839_v2  ;;  %1794 = vmatprep.subr.mxu1 %v872_v47  ;;  %v711_v45 = vld [vmem:[%s3108_s1 + $0x118] sm:$0xff]  ;;  %v710_v46 = vld [vmem:[%s3108_s1 + $0x110] sm:$0xff] }
  0xe1   : > { %1717 = vmatpush3.msra.mxu0 %v823_v44  ;;  %v716_v44 = vld [vmem:[%s3108_s1 + $0x140] sm:$0xff]  ;;  %v725_v2 = vld [vmem:[%s3108_s1 + $0x188] sm:$0xff] }
  0xe2   : > { %426 = vrot.lane.b32.xlu0 %v2108_v4, %s2058_s7  ;;  %564 = vrot.lane.b32.xlu1 %v2106_v3, %s2060_s9 }
  0xe3   : > { %v231_v49 = vpop.permute.xlu0 %230  ;;  %v361_v50 = vpop.permute.xlu1 %360  ;;  %v856_v51 = vld [vmem:[#allocation2 + $0x120] sm:$0xff]  ;;  %v838_v52 = vld [vmem:[#allocation2 + $0x90] sm:$0xff] }
  0xe4   : > { %241 = vst.msk [vmem:[#allocation2 + $0x88] sm:$0xff] %vm179_vm0, %v231_v49  ;;  %370 = vst.msk [vmem:[#allocation2 + $0x190] sm:$0xff] %vm179_vm0, %v361_v50  ;;  %1795 = vmatpush3.msra.mxu1 %v856_v51  ;;  %1718 = vmatprep.subr.mxu0 %v838_v52  ;;  %v806_v50 = vld [vmem:[%s3109_s2 + $0x10] sm:$0xff]  ;;  %v724_v52 = vld [vmem:[%s3108_s1 + $0x180] sm:$0xff] }
  0xe5   : > { %1719 = vmatpush3.msra.mxu0 %v822_v48 }
  0xe6   : > { %488 = vrot.lane.b32.xlu0 %v2116_v5, %s2057_s6  ;;  %618 = vrot.lane.b32.xlu1 %v2108_v4, %s2059_s8 }
  0xe7   : > { %v297_v53 = vpop.permute.xlu0 %296  ;;  %v229_v3 = vpop.permute.xlu1 %228  ;;  %v871_v54 = vld [vmem:[#allocation2 + $0x198] sm:$0xff] }
  0xe8   : > { %v855_v55 = vld [vmem:[#allocation2 + $0x118] sm:$0xff]  ;;  %306 = vst.msk [vmem:[#allocation2 + $0x110] sm:$0xff] %vm179_vm0, %v297_v53  ;;  %240 = vst.msk [vmem:[#allocation2 + $0x80] sm:$0xff] %vm179_vm0, %v229_v3  ;;  %1796 = vmatprep.subr.mxu1 %v871_v54  ;;  %v733_v3 = vld [vmem:[%s3108_s1 + $0x1c8] sm:$0xff] }
  0xe9   : > { %1797 = vmatpush3.msra.mxu1 %v855_v55  ;;  %v719_v53 = vld [vmem:[%s3108_s1 + $0x158] sm:$0xff] }
  0xea   : > { %424 = vrot.lane.b32.xlu0 %v2116_v5, %s2058_s7  ;;  %554 = vrot.lane.b32.xlu1 %v2108_v4, %s2060_s9  ;;  %v807_v54 = vld [vmem:[%s3109_s2 + $0x18] sm:$0xff] }
  0xeb   : > { %v359_v57 = vpop.permute.xlu0 %358  ;;  %v295_v58 = vpop.permute.xlu1 %294  ;;  %v837_v59 = vld [vmem:[#allocation2 + $0x88] sm:$0xff]  ;;  %v870_v60 = vld [vmem:[#allocation2 + $0x190] sm:$0xff] }
  0xec   : > { %369 = vst.msk [vmem:[#allocation2 + $0x188] sm:$0xff] %vm179_vm0, %v359_v57  ;;  %305 = vst.msk [vmem:[#allocation2 + $0x108] sm:$0xff] %vm179_vm0, %v295_v58  ;;  %1720 = vmatprep.subr.mxu0 %v837_v59  ;;  %1798 = vmatprep.subr.mxu1 %v870_v60  ;;  %v718_v57 = vld [vmem:[%s3108_s1 + $0x150] sm:$0xff]  ;;  %v732_v60 = vld [vmem:[%s3108_s1 + $0x1c0] sm:$0xff] }
  0xed   : > { %1721 = vmatpush3.msra.mxu0 %v821_v56 }
  0xee   : > { %486 = vrot.lane.b32.xlu0 %v2118_v6, %s2057_s6  ;;  %616 = vrot.lane.b32.xlu1 %v2116_v5, %s2059_s8 }
  0xef   : > { %v357_v4 = vpop.permute.xlu0 %356  ;;  %v293_v62 = vpop.permute.xlu1 %292  ;;  %v854_v63 = vld [vmem:[#allocation2 + $0x110] sm:$0xff]  ;;  %v836_v8 = vld [vmem:[#allocation2 + $0x80] sm:$0xff] }
  0xf0   : > { %368 = vst.msk [vmem:[#allocation2 + $0x180] sm:$0xff] %vm179_vm0, %v357_v4  ;;  %304 = vst.msk [vmem:[#allocation2 + $0x100] sm:$0xff] %vm179_vm0, %v293_v62  ;;  %1799 = vmatpush3.msra.mxu1 %v854_v63  ;;  %1722 = vmatprep.subr.mxu0 %v836_v8  ;;  %v741_v4 = vld [vmem:[%s3108_s1 + $0x208] sm:$0xff]  ;;  %v808_v62 = vld [vmem:[%s3109_s2 + $0x20] sm:$0xff] }
  0xf1   : > { %1723 = vmatpush3.msra.mxu0 %v820_v61  ;;  %v727_v61 = vld [vmem:[%s3108_s1 + $0x198] sm:$0xff] }
  0xf2   : > { %422 = vrot.lane.b32.xlu0 %v2118_v6, %s2058_s7  ;;  %552 = vrot.lane.b32.xlu1 %v2116_v5, %s2060_s9 }
  0xf3   : > { %1093 = vmatmul.mubr.f32.vlgmr.msra.gmra.mxu0 %v676_v9  ;;  %v539_v11 = vpop.permute.xlu0 %538  ;;  %v475_v12 = vpop.permute.xlu1 %474  ;;  %v869_v13 = vld [vmem:[#allocation2 + $0x188] sm:$0xff]  ;;  %v726_v9 = vld [vmem:[%s3108_s1 + $0x190] sm:$0xff] }
  0xf4   : > { %v853_v14 = vld [vmem:[#allocation2 + $0x108] sm:$0xff]  ;;  %1097 = vmatprep.mubr.f32.mxu0 %v685_v10  ;;  %547 = vst.msk [vmem:[#allocation2 + $0x2f8] sm:$0xff] %vm179_vm0, %v539_v11  ;;  %483 = vst.msk [vmem:[#allocation2 + $0x278] sm:$0xff] %vm179_vm0, %v475_v12  ;;  %1800 = vmatprep.subr.mxu1 %v869_v13  ;;  %v740_v12 = vld [vmem:[%s3108_s1 + $0x200] sm:$0xff] }
  0xf5   : > { %1801 = vmatpush3.msra.mxu1 %v853_v14  ;;  %v735_v13 = vld [vmem:[%s3108_s1 + $0x1d8] sm:$0xff]  ;;  %v749_v14 = vld [vmem:[%s3108_s1 + $0x248] sm:$0xff] }
  0xf6   : > { %484 = vrot.lane.b32.xlu0 %v2120_v7, %s2057_s6  ;;  %614 = vrot.lane.b32.xlu1 %v2118_v6, %s2059_s8 }
  0xf7   : > { %1098 = vmatmul.mubr.f32.gmra.mxu0 %v684_v15  ;;  %v537_v5 = vpop.permute.xlu0 %536  ;;  %v667_v17 = vpop.permute.xlu1 %666  ;;  %v868_v18 = vld [vmem:[#allocation2 + $0x180] sm:$0xff]  ;;  %v809_v15 = vld [vmem:[%s3109_s2 + $0x28] sm:$0xff] }
  0xf8   : > { %v852_v19 = vld [vmem:[#allocation2 + $0x100] sm:$0xff]  ;;  %1102 = vmatprep.mubr.f32.mxu0 %v693_v16  ;;  %546 = vst.msk [vmem:[#allocation2 + $0x2f0] sm:$0xff] %vm179_vm0, %v537_v5  ;;  %675 = vst.msk [vmem:[#allocation2 + $0x3f8] sm:$0xff] %vm179_vm0, %v667_v17  ;;  %1802 = vmatprep.subr.mxu1 %v868_v18  ;;  %v734_v17 = vld [vmem:[%s3108_s1 + $0x1d0] sm:$0xff] }
  0xf9   : > { %1803 = vmatpush3.msra.mxu1 %v852_v19 }
  0xfa   : > { %420 = vrot.lane.b32.xlu0 %v2120_v7, %s2058_s7  ;;  %550 = vrot.lane.b32.xlu1 %v2118_v6, %s2060_s9  ;;  %v700_v6 = vld [vmem:[%s3108_s1 + $0xc0] sm:$0xff] }
  0xfb   : > { %1238 = vmatmul.mubr.f32.vlgmr.msra.gmra.mxu1 %v678_v20  ;;  %v473_v24 = vpop.permute.xlu0 %472  ;;  %v603_v25 = vpop.permute.xlu1 %602  ;;  %v915_v26 = vld [vmem:[#allocation2 + $0x2f8] sm:$0xff]  ;;  %1103 = vmatmul.mubr.f32.gmra.mxu0 %v692_v21  ;;  %v748_v20 = vld [vmem:[%s3108_s1 + $0x240] sm:$0xff] }
  0xfc   : > { %v899_v27 = vld [vmem:[#allocation2 + $0x278] sm:$0xff]  ;;  %1242 = vmatprep.mubr.f32.mxu1 %v687_v22  ;;  %482 = vst.msk [vmem:[#allocation2 + $0x270] sm:$0xff] %vm179_vm0, %v473_v24  ;;  %611 = vst.msk [vmem:[#allocation2 + $0x378] sm:$0xff] %vm179_vm0, %v603_v25  ;;  %1852 = vmatprep.subr.mxu0 %v915_v26  ;;  %v757_v22 = vld [vmem:[%s3108_s1 + $0x288] sm:$0xff] }
  0xfd   : > { %1107 = vmatprep.mubr.f32.mxu0 %v701_v23  ;;  %1853 = vmatpush3.msra.mxu0 %v899_v27  ;;  %v743_v21 = vld [vmem:[%s3108_s1 + $0x218] sm:$0xff]  ;;  %v810_v23 = vld [vmem:[%s3109_s2 + $0x30] sm:$0xff] }
  0xfe   : > { %612 = vrot.lane.b32.xlu0 %v2120_v7, %s2059_s8  ;;  %548 = vrot.lane.b32.xlu1 %v2120_v7, %s2060_s9  ;;  %v708_v7 = vld [vmem:[%s3108_s1 + $0x100] sm:$0xff]  ;;  %v742_v26 = vld [vmem:[%s3108_s1 + $0x210] sm:$0xff] }
  0xff   : > { %1243 = vmatmul.mubr.f32.gmra.mxu1 %v686_v28  ;;  %v535_v31 = vpop.permute.xlu0 %534  ;;  %v665_v32 = vpop.permute.xlu1 %664  ;;  %v914_v33 = vld [vmem:[#allocation2 + $0x2f0] sm:$0xff]  ;;  %v947_v34 = vld [vmem:[#allocation2 + $0x3f8] sm:$0xff]  ;;  %1108 = vmatmul.mubr.f32.gmra.mxu0 %v700_v6  ;;  %v756_v6 = vld [vmem:[%s3108_s1 + $0x280] sm:$0xff] }
 0x100   : > { %1247 = vmatprep.mubr.f32.mxu1 %v695_v0  ;;  %545 = vst.msk [vmem:[#allocation2 + $0x2e8] sm:$0xff] %vm179_vm0, %v535_v31  ;;  %674 = vst.msk [vmem:[#allocation2 + $0x3f0] sm:$0xff] %vm179_vm0, %v665_v32  ;;  %1854 = vmatprep.subr.mxu0 %v914_v33  ;;  %v751_v0 = vld [vmem:[%s3108_s1 + $0x258] sm:$0xff]  ;;  %v750_v33 = vld [vmem:[%s3108_s1 + $0x250] sm:$0xff] }
 0x101   : > { %1932 = vmatprep.subr.mxu1 %v947_v34  ;;  %1112 = vmatprep.mubr.f32.mxu0 %v709_v30  ;;  %v811_v30 = vld [vmem:[%s3109_s2 + $0x38] sm:$0xff] }
 0x102   : > { %950 = vperm.xlu0 %2036, %v804_v35   ;;  %955 = vperm.xlu1 %2037, %v805_v42  }
 0x103   : > { %1248 = vmatmul.mubr.f32.gmra.mxu1 %v694_v29  ;;  %v898_v40 = vld [vmem:[#allocation2 + $0x270] sm:$0xff]  ;;  %v931_v41 = vld [vmem:[#allocation2 + $0x378] sm:$0xff]  ;;  %1113 = vmatmul.mubr.f32.gmra.mxu0 %v708_v7  ;;  %v765_v29 = vld [vmem:[%s3108_s1 + $0x2c8] sm:$0xff] }
 0x104   : > { %v471_v39 = vpop.permute.xlu0 %470  ;;  %1252 = vmatprep.mubr.f32.mxu1 %v703_v36  ;;  %v601_v43 = vpop.permute.xlu1 %600  ;;  %1855 = vmatpush3.msra.mxu0 %v898_v40  ;;  %v764_v7 = vld [vmem:[%s3108_s1 + $0x2c0] sm:$0xff]  ;;  %v759_v36 = vld [vmem:[%s3108_s1 + $0x298] sm:$0xff]  ;;  %v758_v40 = vld [vmem:[%s3108_s1 + $0x290] sm:$0xff] }
 0x105   : > { %481 = vst.msk [vmem:[#allocation2 + $0x268] sm:$0xff] %vm179_vm0, %v471_v39  ;;  %1933 = vmatpush3.msra.mxu1 %v931_v41  ;;  %610 = vst.msk [vmem:[#allocation2 + $0x370] sm:$0xff] %vm179_vm0, %v601_v43  ;;  %1117 = vmatprep.mubr.f32.mxu0 %v717_v38  ;;  %v772_v43 = vld [vmem:[%s3108_s1 + $0x300] sm:$0xff] }
 0x106   : > { %960 = vperm.xlu1 %2037, %v806_v50   ;;  %965 = vperm.xlu0 %2036, %v807_v54  }
 0x107   : > { %1253 = vmatmul.mubr.f32.gmra.mxu1 %v702_v37  ;;  %v913_v48 = vld [vmem:[#allocation2 + $0x2e8] sm:$0xff]  ;;  %v946_v49 = vld [vmem:[#allocation2 + $0x3f0] sm:$0xff]  ;;  %1118 = vmatmul.mubr.f32.gmra.mxu0 %v716_v44  ;;  %v812_v37 = vld [vmem:[%s3109_s2 + $0x40] sm:$0xff] }
 0x108   : > { %v533_v47 = vpop.permute.xlu0 %532  ;;  %1257 = vmatprep.mubr.f32.mxu1 %v711_v45  ;;  %v663_v51 = vpop.permute.xlu1 %662  ;;  %1856 = vmatprep.subr.mxu0 %v913_v48  ;;  %v767_v44 = vld [vmem:[%s3108_s1 + $0x2d8] sm:$0xff]  ;;  %v781_v45 = vld [vmem:[%s3108_s1 + $0x348] sm:$0xff]  ;;  %v766_v48 = vld [vmem:[%s3108_s1 + $0x2d0] sm:$0xff] }
 0x109   : > { %544 = vst.msk [vmem:[#allocation2 + $0x2e0] sm:$0xff] %vm179_vm0, %v533_v47  ;;  %1934 = vmatprep.subr.mxu1 %v946_v49  ;;  %673 = vst.msk [vmem:[#allocation2 + $0x3e8] sm:$0xff] %vm179_vm0, %v663_v51  ;;  %1122 = vmatprep.mubr.f32.mxu0 %v725_v2  ;;  %v780_v51 = vld [vmem:[%s3108_s1 + $0x340] sm:$0xff] }
 0x10a   : > { %970 = vperm.xlu1 %2037, %v808_v62   ;;  %975 = vperm.xlu0 %2036, %v809_v15  }
 0x10b   : > { %1258 = vmatmul.mubr.f32.gmra.mxu1 %v710_v46  ;;  %1123 = vmatmul.mubr.f32.gmra.mxu0 %v724_v52  ;;  %v813_v46 = vld [vmem:[%s3109_s2 + $0x48] sm:$0xff]  ;;  %v775_v52 = vld [vmem:[%s3108_s1 + $0x318] sm:$0xff] }
 0x10c   : > { %v469_v55 = vpop.permute.xlu0 %468  ;;  %v897_v56 = vld [vmem:[#allocation2 + $0x268] sm:$0xff]  ;;  %1262 = vmatprep.mubr.f32.mxu1 %v719_v53  ;;  %v599_v58 = vpop.permute.xlu1 %598  ;;  %v930_v59 = vld [vmem:[#allocation2 + $0x370] sm:$0xff]  ;;  %1127 = vmatprep.mubr.f32.mxu0 %v733_v3 }
 0x10d   : > { %480 = vst.msk [vmem:[#allocation2 + $0x260] sm:$0xff] %vm179_vm0, %v469_v55  ;;  %1857 = vmatpush3.msra.mxu0 %v897_v56  ;;  %609 = vst.msk [vmem:[#allocation2 + $0x368] sm:$0xff] %vm179_vm0, %v599_v58  ;;  %1935 = vmatpush3.msra.mxu1 %v930_v59  ;;  %v789_v53 = vld [vmem:[%s3108_s1 + $0x388] sm:$0xff]  ;;  %v814_v3 = vld [vmem:[%s3109_s2 + $0x50] sm:$0xff] }
 0x10e   : > { %980 = vperm.xlu1 %2037, %v810_v23   ;;  %985 = vperm.xlu0 %2036, %v811_v30   ;;  %v774_v56 = vld [vmem:[%s3108_s1 + $0x310] sm:$0xff]  ;;  %v788_v59 = vld [vmem:[%s3108_s1 + $0x380] sm:$0xff] }
 0x10f   : > { %1263 = vmatmul.mubr.f32.gmra.mxu1 %v718_v57  ;;  %1128 = vmatmul.mubr.f32.gmra.mxu0 %v732_v60  ;;  %v783_v60 = vld [vmem:[%s3108_s1 + $0x358] sm:$0xff]  ;;  %v798_v23 = vld [vmem:[%s3108_s1 + $0x3d0] sm:$0xff] }
 0x110   : > { %v523_v63 = vpop.permute.xlu0 %522  ;;  %v912_v8 = vld [vmem:[#allocation2 + $0x2e0] sm:$0xff]  ;;  %1267 = vmatprep.mubr.f32.mxu1 %v727_v61  ;;  %v661_v10 = vpop.permute.xlu1 %660  ;;  %v945_v11 = vld [vmem:[#allocation2 + $0x3e8] sm:$0xff]  ;;  %1132 = vmatprep.mubr.f32.mxu0 %v741_v4  ;;  %v815_v4 = vld [vmem:[%s3109_s2 + $0x58] sm:$0xff] }
 0x111   : > { %531 = vst.msk [vmem:[#allocation2 + $0x2d8] sm:$0xff] %vm179_vm0, %v523_v63  ;;  %1858 = vmatprep.subr.mxu0 %v912_v8  ;;  %672 = vst.msk [vmem:[#allocation2 + $0x3e0] sm:$0xff] %vm179_vm0, %v661_v10  ;;  %1936 = vmatprep.subr.mxu1 %v945_v11  ;;  %v797_v61 = vld [vmem:[%s3108_s1 + $0x3c8] sm:$0xff]  ;;  %v782_v8 = vld [vmem:[%s3108_s1 + $0x350] sm:$0xff] }
 0x112   : > { %990 = vperm.xlu1 %2037, %v812_v37   ;;  %995 = vperm.xlu0 %2036, %v813_v46   ;;  %v796_v11 = vld [vmem:[%s3108_s1 + $0x3c0] sm:$0xff] }
 0x113   : > { %1268 = vmatmul.mubr.f32.gmra.mxu1 %v726_v9  ;;  %1133 = vmatmul.mubr.f32.gmra.mxu0 %v740_v12  ;;  %v791_v12 = vld [vmem:[%s3108_s1 + $0x398] sm:$0xff] }
 0x114   : > { %v459_v16 = vpop.permute.xlu0 %458  ;;  %v896_v5 = vld [vmem:[#allocation2 + $0x260] sm:$0xff]  ;;  %1272 = vmatprep.mubr.f32.mxu1 %v735_v13  ;;  %v597_v18 = vpop.permute.xlu1 %596  ;;  %v929_v19 = vld [vmem:[#allocation2 + $0x368] sm:$0xff]  ;;  %1137 = vmatprep.mubr.f32.mxu0 %v749_v14 }
 0x115   : > { %467 = vst.msk [vmem:[#allocation2 + $0x258] sm:$0xff] %vm179_vm0, %v459_v16  ;;  %1859 = vmatpush3.msra.mxu0 %v896_v5  ;;  %608 = vst.msk [vmem:[#allocation2 + $0x360] sm:$0xff] %vm179_vm0, %v597_v18  ;;  %1937 = vmatpush3.msra.mxu1 %v929_v19  ;;  %v681_v13 = vld [vmem:[%s3108_s1 + $0x28] sm:$0xff]  ;;  %v816_v14 = vld [vmem:[%s3109_s2 + $0x60] sm:$0xff] }
 0x116   : > { %1000 = vperm.xlu1 %2037, %v814_v3   ;;  %1005 = vperm.xlu0 %2036, %v815_v4   ;;  %v790_v5 = vld [vmem:[%s3108_s1 + $0x390] sm:$0xff]  ;;  %v799_v19 = vld [vmem:[%s3108_s1 + $0x3d8] sm:$0xff] }
 0x117   : > { %1273 = vmatmul.mubr.f32.gmra.mxu1 %v734_v17  ;;  %1138 = vmatmul.mubr.f32.gmra.mxu0 %v748_v20  ;;  %v817_v20 = vld [vmem:[%s3109_s2 + $0x68] sm:$0xff] }
 0x118   : > { %v521_v24 = vpop.permute.xlu0 %520  ;;  %v911_v25 = vld [vmem:[#allocation2 + $0x2d8] sm:$0xff]  ;;  %1277 = vmatprep.mubr.f32.mxu1 %v743_v21  ;;  %v651_v27 = vpop.permute.xlu1 %650  ;;  %v944_v28 = vld [vmem:[#allocation2 + $0x3e0] sm:$0xff]  ;;  %1142 = vmatprep.mubr.f32.mxu0 %v757_v22 }
 0x119   : > { %530 = vst.msk [vmem:[#allocation2 + $0x2d0] sm:$0xff] %vm179_vm0, %v521_v24  ;;  %1860 = vmatprep.subr.mxu0 %v911_v25  ;;  %659 = vst.msk [vmem:[#allocation2 + $0x3d8] sm:$0xff] %vm179_vm0, %v651_v27  ;;  %1938 = vmatprep.subr.mxu1 %v944_v28  ;;  %v818_v27 = vld [vmem:[%s3109_s2 + $0x70] sm:$0xff]  ;;  %v819_v28 = vld [vmem:[%s3109_s2 + $0x78] sm:$0xff] }
 0x11a   : > { %1010 = vperm.xlu1 %2037, %v816_v14   ;;  %1015 = vperm.xlu0 %2036, %v817_v20  }
 0x11b   : > { %1278 = vmatmul.mubr.f32.gmra.mxu1 %v742_v26  ;;  %1143 = vmatmul.mubr.f32.gmra.mxu0 %v756_v6  ;;  %v683_v26 = vld [vmem:[%s3108_s1 + $0x38] sm:$0xff] }
 0x11c   : > { %v457_v31 = vpop.permute.xlu0 %456  ;;  %v895_v32 = vld [vmem:[#allocation2 + $0x258] sm:$0xff]  ;;  %1282 = vmatprep.mubr.f32.mxu1 %v751_v0  ;;  %v587_v34 = vpop.permute.xlu1 %586  ;;  %v928_v35 = vld [vmem:[#allocation2 + $0x360] sm:$0xff]  ;;  %1147 = vmatprep.mubr.f32.mxu0 %v765_v29 }
 0x11d   : > { %466 = vst.msk [vmem:[#allocation2 + $0x250] sm:$0xff] %vm179_vm0, %v457_v31  ;;  %1861 = vmatpush3.msra.mxu0 %v895_v32  ;;  %595 = vst.msk [vmem:[#allocation2 + $0x358] sm:$0xff] %vm179_vm0, %v587_v34  ;;  %1939 = vmatpush3.msra.mxu1 %v928_v35 }
 0x11e   : > { %1020 = vperm.xlu1 %2037, %v818_v27   ;;  %1025 = vperm.xlu0 %2036, %v819_v28   ;;  %v689_v27 = vld [vmem:[%s3108_s1 + $0x68] sm:$0xff] }
 0x11f   : > { %1283 = vmatmul.mubr.f32.gmra.mxu1 %v750_v33  ;;  %1148 = vmatmul.mubr.f32.gmra.mxu0 %v764_v7 }
 0x120   : > { %v519_v38 = vpop.permute.xlu0 %518  ;;  %v910_v39 = vld [vmem:[#allocation2 + $0x2d0] sm:$0xff]  ;;  %1287 = vmatprep.mubr.f32.mxu1 %v759_v36  ;;  %v649_v41 = vpop.permute.xlu1 %648  ;;  %v943_v42 = vld [vmem:[#allocation2 + $0x3d8] sm:$0xff]  ;;  %1152 = vmatprep.mubr.f32.mxu0 %v773_v1 }
 0x121   : > { %529 = vst.msk [vmem:[#allocation2 + $0x2c8] sm:$0xff] %vm179_vm0, %v519_v38  ;;  %1862 = vmatprep.subr.mxu0 %v910_v39  ;;  %658 = vst.msk [vmem:[#allocation2 + $0x3d0] sm:$0xff] %vm179_vm0, %v649_v41  ;;  %1940 = vmatprep.subr.mxu1 %v943_v42 }
 0x123   : > { %1288 = vmatmul.mubr.f32.gmra.mxu1 %v758_v40  ;;  %1153 = vmatmul.mubr.f32.gmra.mxu0 %v772_v43 }
 0x124   : > { %v455_v2 = vpop.permute.xlu0 %454  ;;  %v894_v47 = vld [vmem:[#allocation2 + $0x250] sm:$0xff]  ;;  %1292 = vmatprep.mubr.f32.mxu1 %v767_v44  ;;  %v585_v49 = vpop.permute.xlu1 %584  ;;  %v927_v50 = vld [vmem:[#allocation2 + $0x358] sm:$0xff]  ;;  %1157 = vmatprep.mubr.f32.mxu0 %v781_v45 }
 0x125   : > { %465 = vst.msk [vmem:[#allocation2 + $0x248] sm:$0xff] %vm179_vm0, %v455_v2  ;;  %1863 = vmatpush3.msra.mxu0 %v894_v47  ;;  %594 = vst.msk [vmem:[#allocation2 + $0x350] sm:$0xff] %vm179_vm0, %v585_v49  ;;  %1941 = vmatpush3.msra.mxu1 %v927_v50 }
 0x127   : > { %1293 = vmatmul.mubr.f32.gmra.mxu1 %v766_v48  ;;  %1158 = vmatmul.mubr.f32.gmra.mxu0 %v780_v51 }
 0x128   : > { %v517_v54 = vpop.permute.xlu0 %516  ;;  %v909_v55 = vld [vmem:[#allocation2 + $0x2c8] sm:$0xff]  ;;  %1297 = vmatprep.mubr.f32.mxu1 %v775_v52  ;;  %v647_v57 = vpop.permute.xlu1 %646  ;;  %v942_v58 = vld [vmem:[#allocation2 + $0x3d0] sm:$0xff]  ;;  %1162 = vmatprep.mubr.f32.mxu0 %v789_v53 }
 0x129   : > { %528 = vst.msk [vmem:[#allocation2 + $0x2c0] sm:$0xff] %vm179_vm0, %v517_v54  ;;  %1864 = vmatprep.subr.mxu0 %v909_v55  ;;  %657 = vst.msk [vmem:[#allocation2 + $0x3c8] sm:$0xff] %vm179_vm0, %v647_v57  ;;  %1942 = vmatprep.subr.mxu1 %v942_v58 }
 0x12b   : > { %1298 = vmatmul.mubr.f32.gmra.mxu1 %v774_v56  ;;  %1163 = vmatmul.mubr.f32.gmra.mxu0 %v788_v59 }
 0x12c   : > { %v453_v62 = vpop.permute.xlu0 %452  ;;  %v893_v63 = vld [vmem:[#allocation2 + $0x248] sm:$0xff]  ;;  %1302 = vmatprep.mubr.f32.mxu1 %v783_v60  ;;  %v583_v9 = vpop.permute.xlu1 %582  ;;  %v926_v10 = vld [vmem:[#allocation2 + $0x350] sm:$0xff]  ;;  %1167 = vmatprep.mubr.f32.mxu0 %v797_v61 }
 0x12d   : > { %464 = vst.msk [vmem:[#allocation2 + $0x240] sm:$0xff] %vm179_vm0, %v453_v62  ;;  %1865 = vmatpush3.msra.mxu0 %v893_v63  ;;  %593 = vst.msk [vmem:[#allocation2 + $0x348] sm:$0xff] %vm179_vm0, %v583_v9  ;;  %1943 = vmatpush3.msra.mxu1 %v926_v10 }
 0x12f   : > { %1303 = vmatmul.mubr.f32.gmra.mxu1 %v782_v8  ;;  %1168 = vmatmul.mubr.f32.gmra.mxu0 %v796_v11 }
 0x130   : > { %v507_v15 = vpop.permute.xlu0 %506  ;;  %v908_v16 = vld [vmem:[#allocation2 + $0x2c0] sm:$0xff]  ;;  %1307 = vmatprep.mubr.f32.mxu1 %v791_v12  ;;  %v645_v17 = vpop.permute.xlu1 %644  ;;  %v941_v18 = vld [vmem:[#allocation2 + $0x3c8] sm:$0xff]  ;;  %1382 = vmatprep.mubr.f32.mxu0 %v681_v13 }
 0x131   : > { %515 = vst.msk [vmem:[#allocation2 + $0x2b8] sm:$0xff] %vm179_vm0, %v507_v15  ;;  %1866 = vmatprep.subr.mxu0 %v908_v16  ;;  %656 = vst.msk [vmem:[#allocation2 + $0x3c0] sm:$0xff] %vm179_vm0, %v645_v17  ;;  %1944 = vmatprep.subr.mxu1 %v941_v18 }
 0x133   : > { %1308 = vmatmul.mubr.f32.gmra.mxu1 %v790_v5 }
 0x134   : > { %v443_v21 = vpop.permute.xlu0 %442  ;;  %v892_v22 = vld [vmem:[#allocation2 + $0x240] sm:$0xff]  ;;  %1312 = vmatprep.mubr.f32.mxu1 %v799_v19  ;;  %v581_v24 = vpop.permute.xlu1 %580  ;;  %v925_v25 = vld [vmem:[#allocation2 + $0x348] sm:$0xff] }
 0x135   : > { %451 = vst.msk [vmem:[#allocation2 + $0x238] sm:$0xff] %vm179_vm0, %v443_v21  ;;  %1867 = vmatpush3.msra.mxu0 %v892_v22  ;;  %592 = vst.msk [vmem:[#allocation2 + $0x340] sm:$0xff] %vm179_vm0, %v581_v24  ;;  %1945 = vmatpush3.msra.mxu1 %v925_v25  ;;  %v680_v25 = vld [vmem:[%s3108_s1 + $0x20] sm:$0xff] }
 0x137   : > { %1313 = vmatmul.mubr.f32.gmra.mxu1 %v798_v23 }
 0x138   : > { %v505_v6 = vpop.permute.xlu0 %504  ;;  %v907_v0 = vld [vmem:[#allocation2 + $0x2b8] sm:$0xff]  ;;  %1527 = vmatprep.mubr.f32.mxu1 %v683_v26  ;;  %v635_v29 = vpop.permute.xlu1 %634  ;;  %v940_v30 = vld [vmem:[#allocation2 + $0x3c0] sm:$0xff] }
 0x139   : > { %514 = vst.msk [vmem:[#allocation2 + $0x2b0] sm:$0xff] %vm179_vm0, %v505_v6  ;;  %1868 = vmatprep.subr.mxu0 %v907_v0  ;;  %643 = vst.msk [vmem:[#allocation2 + $0x3b8] sm:$0xff] %vm179_vm0, %v635_v29  ;;  %1946 = vmatprep.subr.mxu1 %v940_v30  ;;  %v688_v6 = vld [vmem:[%s3108_s1 + $0x60] sm:$0xff]  ;;  %v682_v29 = vld [vmem:[%s3108_s1 + $0x30] sm:$0xff] }
 0x13a   : > { %v697_v30 = vld [vmem:[%s3108_s1 + $0xa8] sm:$0xff] }
 0x13c   : > { %v441_v31 = vpop.permute.xlu0 %440  ;;  %v891_v32 = vld [vmem:[#allocation2 + $0x238] sm:$0xff]  ;;  %v571_v33 = vpop.permute.xlu1 %570  ;;  %v924_v34 = vld [vmem:[#allocation2 + $0x340] sm:$0xff] }
 0x13d   : > { %450 = vst.msk [vmem:[#allocation2 + $0x230] sm:$0xff] %vm179_vm0, %v441_v31  ;;  %1869 = vmatpush3.msra.mxu0 %v891_v32  ;;  %579 = vst.msk [vmem:[#allocation2 + $0x338] sm:$0xff] %vm179_vm0, %v571_v33  ;;  %1947 = vmatpush3.msra.mxu1 %v924_v34  ;;  %v691_v32 = vld [vmem:[%s3108_s1 + $0x78] sm:$0xff]  ;;  %v696_v33 = vld [vmem:[%s3108_s1 + $0xa0] sm:$0xff] }
 0x13e   : > { %v690_v34 = vld [vmem:[%s3108_s1 + $0x70] sm:$0xff] }
 0x140   : > { %v503_v35 = vpop.permute.xlu0 %502  ;;  %v906_v7 = vld [vmem:[#allocation2 + $0x2b0] sm:$0xff]  ;;  %v633_v36 = vpop.permute.xlu1 %632  ;;  %v939_v1 = vld [vmem:[#allocation2 + $0x3b8] sm:$0xff] }
 0x141   : > { %513 = vst.msk [vmem:[#allocation2 + $0x2a8] sm:$0xff] %vm179_vm0, %v503_v35  ;;  %1870 = vmatprep.subr.mxu0 %v906_v7  ;;  %642 = vst.msk [vmem:[#allocation2 + $0x3b0] sm:$0xff] %vm179_vm0, %v633_v36  ;;  %1948 = vmatprep.subr.mxu1 %v939_v1  ;;  %v705_v35 = vld [vmem:[%s3108_s1 + $0xe8] sm:$0xff]  ;;  %v699_v7 = vld [vmem:[%s3108_s1 + $0xb8] sm:$0xff] }
 0x142   : > { %v704_v36 = vld [vmem:[%s3108_s1 + $0xe0] sm:$0xff]  ;;  %v698_v1 = vld [vmem:[%s3108_s1 + $0xb0] sm:$0xff] }
 0x144   : > { %v439_v37 = vpop.permute.xlu0 %438  ;;  %v890_v38 = vld [vmem:[#allocation2 + $0x230] sm:$0xff]  ;;  %v569_v39 = vpop.permute.xlu1 %568  ;;  %v923_v40 = vld [vmem:[#allocation2 + $0x338] sm:$0xff] }
 0x145   : > { %449 = vst.msk [vmem:[#allocation2 + $0x228] sm:$0xff] %vm179_vm0, %v439_v37  ;;  %1871 = vmatpush3.msra.mxu0 %v890_v38  ;;  %578 = vst.msk [vmem:[#allocation2 + $0x330] sm:$0xff] %vm179_vm0, %v569_v39  ;;  %1949 = vmatpush3.msra.mxu1 %v923_v40  ;;  %v713_v37 = vld [vmem:[%s3108_s1 + $0x128] sm:$0xff]  ;;  %v707_v38 = vld [vmem:[%s3108_s1 + $0xf8] sm:$0xff] }
 0x146   : > { %v712_v39 = vld [vmem:[%s3108_s1 + $0x120] sm:$0xff]  ;;  %v706_v40 = vld [vmem:[%s3108_s1 + $0xf0] sm:$0xff] }
 0x148   : > { %v501_v41 = vpop.permute.xlu0 %500  ;;  %v905_v42 = vld [vmem:[#allocation2 + $0x2a8] sm:$0xff]  ;;  %v631_v43 = vpop.permute.xlu1 %630  ;;  %v938_v44 = vld [vmem:[#allocation2 + $0x3b0] sm:$0xff] }
 0x149   : > { %512 = vst.msk [vmem:[#allocation2 + $0x2a0] sm:$0xff] %vm179_vm0, %v501_v41  ;;  %1872 = vmatprep.subr.mxu0 %v905_v42  ;;  %641 = vst.msk [vmem:[#allocation2 + $0x3a8] sm:$0xff] %vm179_vm0, %v631_v43  ;;  %1950 = vmatprep.subr.mxu1 %v938_v44  ;;  %v721_v41 = vld [vmem:[%s3108_s1 + $0x168] sm:$0xff]  ;;  %v715_v42 = vld [vmem:[%s3108_s1 + $0x138] sm:$0xff] }
 0x14a   : > { %v720_v43 = vld [vmem:[%s3108_s1 + $0x160] sm:$0xff]  ;;  %v714_v44 = vld [vmem:[%s3108_s1 + $0x130] sm:$0xff] }
 0x14c   : > { %v437_v45 = vpop.permute.xlu0 %436  ;;  %v889_v46 = vld [vmem:[#allocation2 + $0x228] sm:$0xff]  ;;  %v567_v2 = vpop.permute.xlu1 %566  ;;  %v922_v47 = vld [vmem:[#allocation2 + $0x330] sm:$0xff] }
 0x14d   : > { %448 = vst.msk [vmem:[#allocation2 + $0x220] sm:$0xff] %vm179_vm0, %v437_v45  ;;  %1873 = vmatpush3.msra.mxu0 %v889_v46  ;;  %577 = vst.msk [vmem:[#allocation2 + $0x328] sm:$0xff] %vm179_vm0, %v567_v2  ;;  %1951 = vmatpush3.msra.mxu1 %v922_v47  ;;  %v729_v45 = vld [vmem:[%s3108_s1 + $0x1a8] sm:$0xff]  ;;  %v723_v46 = vld [vmem:[%s3108_s1 + $0x178] sm:$0xff] }
 0x14e   : > { %v728_v2 = vld [vmem:[%s3108_s1 + $0x1a0] sm:$0xff]  ;;  %v722_v47 = vld [vmem:[%s3108_s1 + $0x170] sm:$0xff] }
 0x150   : > { %v491_v48 = vpop.permute.xlu0 %490  ;;  %v904_v49 = vld [vmem:[#allocation2 + $0x2a0] sm:$0xff]  ;;  %v629_v50 = vpop.permute.xlu1 %628  ;;  %v937_v51 = vld [vmem:[#allocation2 + $0x3a8] sm:$0xff] }
 0x151   : > { %499 = vst.msk [vmem:[#allocation2 + $0x298] sm:$0xff] %vm179_vm0, %v491_v48  ;;  %1874 = vmatprep.subr.mxu0 %v904_v49  ;;  %640 = vst.msk [vmem:[#allocation2 + $0x3a0] sm:$0xff] %vm179_vm0, %v629_v50  ;;  %1952 = vmatprep.subr.mxu1 %v937_v51  ;;  %v737_v48 = vld [vmem:[%s3108_s1 + $0x1e8] sm:$0xff]  ;;  %v731_v49 = vld [vmem:[%s3108_s1 + $0x1b8] sm:$0xff] }
 0x152   : > { %v736_v50 = vld [vmem:[%s3108_s1 + $0x1e0] sm:$0xff]  ;;  %v730_v51 = vld [vmem:[%s3108_s1 + $0x1b0] sm:$0xff] }
 0x154   : > { %v427_v52 = vpop.permute.xlu0 %426  ;;  %v888_v53 = vld [vmem:[#allocation2 + $0x220] sm:$0xff]  ;;  %v565_v3 = vpop.permute.xlu1 %564  ;;  %v921_v54 = vld [vmem:[#allocation2 + $0x328] sm:$0xff] }
 0x155   : > { %435 = vst.msk [vmem:[#allocation2 + $0x218] sm:$0xff] %vm179_vm0, %v427_v52  ;;  %1875 = vmatpush3.msra.mxu0 %v888_v53  ;;  %576 = vst.msk [vmem:[#allocation2 + $0x320] sm:$0xff] %vm179_vm0, %v565_v3  ;;  %1953 = vmatpush3.msra.mxu1 %v921_v54  ;;  %v745_v52 = vld [vmem:[%s3108_s1 + $0x228] sm:$0xff]  ;;  %v739_v53 = vld [vmem:[%s3108_s1 + $0x1f8] sm:$0xff] }
 0x156   : > { %v744_v3 = vld [vmem:[%s3108_s1 + $0x220] sm:$0xff]  ;;  %v738_v54 = vld [vmem:[%s3108_s1 + $0x1f0] sm:$0xff] }
 0x158   : > { %v489_v55 = vpop.permute.xlu0 %488  ;;  %v903_v56 = vld [vmem:[#allocation2 + $0x298] sm:$0xff]  ;;  %v619_v57 = vpop.permute.xlu1 %618  ;;  %v936_v58 = vld [vmem:[#allocation2 + $0x3a0] sm:$0xff] }
 0x159   : > { %498 = vst.msk [vmem:[#allocation2 + $0x290] sm:$0xff] %vm179_vm0, %v489_v55  ;;  %1876 = vmatprep.subr.mxu0 %v903_v56  ;;  %627 = vst.msk [vmem:[#allocation2 + $0x398] sm:$0xff] %vm179_vm0, %v619_v57  ;;  %1954 = vmatprep.subr.mxu1 %v936_v58  ;;  %v753_v55 = vld [vmem:[%s3108_s1 + $0x268] sm:$0xff]  ;;  %v747_v56 = vld [vmem:[%s3108_s1 + $0x238] sm:$0xff] }
 0x15a   : > { %v752_v57 = vld [vmem:[%s3108_s1 + $0x260] sm:$0xff]  ;;  %v746_v58 = vld [vmem:[%s3108_s1 + $0x230] sm:$0xff] }
 0x15c   : > { %v425_v59 = vpop.permute.xlu0 %424  ;;  %v887_v60 = vld [vmem:[#allocation2 + $0x218] sm:$0xff]  ;;  %v555_v61 = vpop.permute.xlu1 %554  ;;  %v920_v4 = vld [vmem:[#allocation2 + $0x320] sm:$0xff] }
 0x15d   : > { %434 = vst.msk [vmem:[#allocation2 + $0x210] sm:$0xff] %vm179_vm0, %v425_v59  ;;  %1877 = vmatpush3.msra.mxu0 %v887_v60  ;;  %563 = vst.msk [vmem:[#allocation2 + $0x318] sm:$0xff] %vm179_vm0, %v555_v61  ;;  %1955 = vmatpush3.msra.mxu1 %v920_v4  ;;  %v761_v59 = vld [vmem:[%s3108_s1 + $0x2a8] sm:$0xff]  ;;  %v755_v60 = vld [vmem:[%s3108_s1 + $0x278] sm:$0xff] }
 0x15e   : > { %v760_v61 = vld [vmem:[%s3108_s1 + $0x2a0] sm:$0xff]  ;;  %v754_v4 = vld [vmem:[%s3108_s1 + $0x270] sm:$0xff] }
 0x160   : > { %v487_v62 = vpop.permute.xlu0 %486  ;;  %v902_v63 = vld [vmem:[#allocation2 + $0x290] sm:$0xff]  ;;  %v617_v8 = vpop.permute.xlu1 %616  ;;  %v935_v9 = vld [vmem:[#allocation2 + $0x398] sm:$0xff] }
 0x161   : > { %497 = vst.msk [vmem:[#allocation2 + $0x288] sm:$0xff] %vm179_vm0, %v487_v62  ;;  %1878 = vmatprep.subr.mxu0 %v902_v63  ;;  %626 = vst.msk [vmem:[#allocation2 + $0x390] sm:$0xff] %vm179_vm0, %v617_v8  ;;  %1956 = vmatprep.subr.mxu1 %v935_v9  ;;  %v769_v62 = vld [vmem:[%s3108_s1 + $0x2e8] sm:$0xff]  ;;  %v763_v63 = vld [vmem:[%s3108_s1 + $0x2b8] sm:$0xff] }
 0x162   : > { %v768_v8 = vld [vmem:[%s3108_s1 + $0x2e0] sm:$0xff]  ;;  %v762_v9 = vld [vmem:[%s3108_s1 + $0x2b0] sm:$0xff] }
 0x164   : > { %v423_v10 = vpop.permute.xlu0 %422  ;;  %v886_v11 = vld [vmem:[#allocation2 + $0x210] sm:$0xff]  ;;  %v553_v12 = vpop.permute.xlu1 %552  ;;  %v919_v13 = vld [vmem:[#allocation2 + $0x318] sm:$0xff] }
 0x165   : > { %433 = vst.msk [vmem:[#allocation2 + $0x208] sm:$0xff] %vm179_vm0, %v423_v10  ;;  %1879 = vmatpush3.msra.mxu0 %v886_v11  ;;  %562 = vst.msk [vmem:[#allocation2 + $0x310] sm:$0xff] %vm179_vm0, %v553_v12  ;;  %1957 = vmatpush3.msra.mxu1 %v919_v13  ;;  %v777_v10 = vld [vmem:[%s3108_s1 + $0x328] sm:$0xff]  ;;  %v771_v11 = vld [vmem:[%s3108_s1 + $0x2f8] sm:$0xff] }
 0x166   : > { %v776_v12 = vld [vmem:[%s3108_s1 + $0x320] sm:$0xff]  ;;  %v770_v13 = vld [vmem:[%s3108_s1 + $0x2f0] sm:$0xff] }
 0x168   : > { %v485_v14 = vpop.permute.xlu0 %484  ;;  %v901_v15 = vld [vmem:[#allocation2 + $0x288] sm:$0xff]  ;;  %v615_v16 = vpop.permute.xlu1 %614  ;;  %v934_v5 = vld [vmem:[#allocation2 + $0x390] sm:$0xff] }
 0x169   : > { %496 = vst.msk [vmem:[#allocation2 + $0x280] sm:$0xff] %vm179_vm0, %v485_v14  ;;  %1880 = vmatprep.subr.mxu0 %v901_v15  ;;  %625 = vst.msk [vmem:[#allocation2 + $0x388] sm:$0xff] %vm179_vm0, %v615_v16  ;;  %1958 = vmatprep.subr.mxu1 %v934_v5  ;;  %v785_v14 = vld [vmem:[%s3108_s1 + $0x368] sm:$0xff]  ;;  %v779_v15 = vld [vmem:[%s3108_s1 + $0x338] sm:$0xff] }
 0x16a   : > { %v784_v16 = vld [vmem:[%s3108_s1 + $0x360] sm:$0xff]  ;;  %v778_v5 = vld [vmem:[%s3108_s1 + $0x330] sm:$0xff] }
 0x16c   : > { %v421_v17 = vpop.permute.xlu0 %420  ;;  %v885_v18 = vld [vmem:[#allocation2 + $0x208] sm:$0xff]  ;;  %v551_v19 = vpop.permute.xlu1 %550  ;;  %v918_v20 = vld [vmem:[#allocation2 + $0x310] sm:$0xff] }
 0x16d   : > { %432 = vst.msk [vmem:[#allocation2 + $0x200] sm:$0xff] %vm179_vm0, %v421_v17  ;;  %1881 = vmatpush3.msra.mxu0 %v885_v18  ;;  %561 = vst.msk [vmem:[#allocation2 + $0x308] sm:$0xff] %vm179_vm0, %v551_v19  ;;  %1959 = vmatpush3.msra.mxu1 %v918_v20  ;;  %v793_v17 = vld [vmem:[%s3108_s1 + $0x3a8] sm:$0xff]  ;;  %v787_v18 = vld [vmem:[%s3108_s1 + $0x378] sm:$0xff] }
 0x16e   : > { %v792_v19 = vld [vmem:[%s3108_s1 + $0x3a0] sm:$0xff]  ;;  %v786_v20 = vld [vmem:[%s3108_s1 + $0x370] sm:$0xff] }
 0x170   : > { %v613_v21 = vpop.permute.xlu0 %612  ;;  %v900_v22 = vld [vmem:[#allocation2 + $0x280] sm:$0xff]  ;;  %v549_v23 = vpop.permute.xlu1 %548  ;;  %v933_v24 = vld [vmem:[#allocation2 + $0x388] sm:$0xff] }
 0x171   : > { %624 = vst.msk [vmem:[#allocation2 + $0x380] sm:$0xff] %vm179_vm0, %v613_v21  ;;  %1882 = vmatprep.subr.mxu0 %v900_v22  ;;  %560 = vst.msk [vmem:[#allocation2 + $0x300] sm:$0xff] %vm179_vm0, %v549_v23  ;;  %1960 = vmatprep.subr.mxu1 %v933_v24  ;;  %v801_v21 = vld [vmem:[%s3108_s1 + $0x3e8] sm:$0xff]  ;;  %v795_v22 = vld [vmem:[%s3108_s1 + $0x3b8] sm:$0xff] }
 0x172   : > { %v800_v23 = vld [vmem:[%s3108_s1 + $0x3e0] sm:$0xff]  ;;  %v794_v24 = vld [vmem:[%s3108_s1 + $0x3b0] sm:$0xff] }
 0x174   : > { %v884_v26 = vld [vmem:[#allocation2 + $0x200] sm:$0xff]  ;;  %v917_v28 = vld [vmem:[#allocation2 + $0x308] sm:$0xff] }
 0x175   : > { %1883 = vmatpush3.msra.mxu0 %v884_v26  ;;  %1961 = vmatpush3.msra.mxu1 %v917_v28  ;;  %v802_v26 = vld [vmem:[%s3108_s1 + $0x3f0] sm:$0xff] }
 0x176   : > { %1383 = vmatmul.mubr.f32.vlgmr.msra.gmra.mxu0 %v680_v25  ;;  %v803_v25 = vld [vmem:[%s3108_s1 + $0x3f8] sm:$0xff] }
 0x177   : > { %1387 = vmatprep.mubr.f32.mxu0 %v689_v27 }
 0x178   : > { %v932_v0 = vld [vmem:[#allocation2 + $0x380] sm:$0xff] }
 0x179   : > { %1962 = vmatprep.subr.mxu1 %v932_v0  ;;  %v916_v31 = vld [vmem:[#allocation2 + $0x300] sm:$0xff] }
 0x17a   : > { %1388 = vmatmul.mubr.f32.gmra.mxu0 %v688_v6  ;;  %1963 = vmatpush3.msra.mxu1 %v916_v31 }
 0x17b   : > { %1528 = vmatmul.mubr.f32.vlgmr.msra.gmra.mxu1 %v682_v29  ;;  %1392 = vmatprep.mubr.f32.mxu0 %v697_v30 }
 0x17c   : > { %1532 = vmatprep.mubr.f32.mxu1 %v691_v32 }
 0x17e   : > { %1393 = vmatmul.mubr.f32.gmra.mxu0 %v696_v33 }
 0x17f   : > { %1533 = vmatmul.mubr.f32.gmra.mxu1 %v690_v34  ;;  %1397 = vmatprep.mubr.f32.mxu0 %v705_v35 }
 0x180   : > { %1537 = vmatprep.mubr.f32.mxu1 %v699_v7 }
 0x182   : > { %1398 = vmatmul.mubr.f32.gmra.mxu0 %v704_v36 }
 0x183   : > { %1538 = vmatmul.mubr.f32.gmra.mxu1 %v698_v1  ;;  %1402 = vmatprep.mubr.f32.mxu0 %v713_v37 }
 0x184   : > { %1542 = vmatprep.mubr.f32.mxu1 %v707_v38 }
 0x186   : > { %1403 = vmatmul.mubr.f32.gmra.mxu0 %v712_v39 }
 0x187   : > { %1543 = vmatmul.mubr.f32.gmra.mxu1 %v706_v40  ;;  %1407 = vmatprep.mubr.f32.mxu0 %v721_v41 }
 0x188   : > { %1547 = vmatprep.mubr.f32.mxu1 %v715_v42 }
 0x18a   : > { %1408 = vmatmul.mubr.f32.gmra.mxu0 %v720_v43 }
 0x18b   : > { %1548 = vmatmul.mubr.f32.gmra.mxu1 %v714_v44  ;;  %1412 = vmatprep.mubr.f32.mxu0 %v729_v45 }
 0x18c   : > { %1552 = vmatprep.mubr.f32.mxu1 %v723_v46 }
 0x18e   : > { %1413 = vmatmul.mubr.f32.gmra.mxu0 %v728_v2 }
 0x18f   : > { %1553 = vmatmul.mubr.f32.gmra.mxu1 %v722_v47  ;;  %1417 = vmatprep.mubr.f32.mxu0 %v737_v48 }
 0x190   : > { %1557 = vmatprep.mubr.f32.mxu1 %v731_v49 }
 0x192   : > { %1418 = vmatmul.mubr.f32.gmra.mxu0 %v736_v50 }
 0x193   : > { %1558 = vmatmul.mubr.f32.gmra.mxu1 %v730_v51  ;;  %1422 = vmatprep.mubr.f32.mxu0 %v745_v52 }
 0x194   : > { %1562 = vmatprep.mubr.f32.mxu1 %v739_v53 }
 0x196   : > { %1423 = vmatmul.mubr.f32.gmra.mxu0 %v744_v3 }
 0x197   : > { %1563 = vmatmul.mubr.f32.gmra.mxu1 %v738_v54  ;;  %1427 = vmatprep.mubr.f32.mxu0 %v753_v55 }
 0x198   : > { %1567 = vmatprep.mubr.f32.mxu1 %v747_v56 }
 0x19a   : > { %1428 = vmatmul.mubr.f32.gmra.mxu0 %v752_v57 }
 0x19b   : > { %1568 = vmatmul.mubr.f32.gmra.mxu1 %v746_v58  ;;  %1432 = vmatprep.mubr.f32.mxu0 %v761_v59 }
 0x19c   : > { %1572 = vmatprep.mubr.f32.mxu1 %v755_v60 }
 0x19e   : > { %1433 = vmatmul.mubr.f32.gmra.mxu0 %v760_v61 }
 0x19f   : > { %1573 = vmatmul.mubr.f32.gmra.mxu1 %v754_v4  ;;  %1437 = vmatprep.mubr.f32.mxu0 %v769_v62 }
 0x1a0   : > { %1577 = vmatprep.mubr.f32.mxu1 %v763_v63 }
 0x1a2   : > { %1438 = vmatmul.mubr.f32.gmra.mxu0 %v768_v8 }
 0x1a3   : > { %1578 = vmatmul.mubr.f32.gmra.mxu1 %v762_v9  ;;  %1442 = vmatprep.mubr.f32.mxu0 %v777_v10 }
 0x1a4   : > { %1582 = vmatprep.mubr.f32.mxu1 %v771_v11 }
 0x1a6   : > { %1443 = vmatmul.mubr.f32.gmra.mxu0 %v776_v12 }
 0x1a7   : > { %1583 = vmatmul.mubr.f32.gmra.mxu1 %v770_v13  ;;  %1447 = vmatprep.mubr.f32.mxu0 %v785_v14 }
 0x1a8   : > { %1587 = vmatprep.mubr.f32.mxu1 %v779_v15 }
 0x1aa   : > { %1448 = vmatmul.mubr.f32.gmra.mxu0 %v784_v16 }
 0x1ab   : > { %1588 = vmatmul.mubr.f32.gmra.mxu1 %v778_v5  ;;  %1452 = vmatprep.mubr.f32.mxu0 %v793_v17 }
 0x1ac   : > { %1592 = vmatprep.mubr.f32.mxu1 %v787_v18 }
 0x1ae   : > { %1453 = vmatmul.mubr.f32.gmra.mxu0 %v792_v19 }
 0x1af   : > { %1593 = vmatmul.mubr.f32.gmra.mxu1 %v786_v20  ;;  %1457 = vmatprep.mubr.f32.mxu0 %v801_v21 }
 0x1b0   : > { %1597 = vmatprep.mubr.f32.mxu1 %v795_v22 }
 0x1b2   : > { %1458 = vmatmul.mubr.f32.gmra.mxu0 %v800_v23 }
 0x1b3   : > { %1598 = vmatmul.mubr.f32.gmra.mxu1 %v794_v24  ;;  %v2880_v27 = vpop.f32.mrf.mxu0 }
 0x1b4   : > { %1602 = vmatprep.mubr.f32.mxu1 %v803_v25 }
 0x1b5   : > { %v1725_v28 = vpop.f32.mrf.mxu0 }
 0x1b6   : > { %v1726_v25 = vadd.f32 %v1725_v28, %v2880_v27 }
 0x1b7   : > { %1603 = vmatmul.mubr.f32.gmra.mxu1 %v802_v26  ;;  %v2884_v0 = vpop.f32.mrf.mxu0  ;;  %v951_v26 = vpop.permute.xlu0 %950 }
 0x1b9   : > { %v1728_v30 = vpop.f32.mrf.mxu0 }
 0x1bb   : > { %v2882_v6 = vpop.f32.mrf.mxu1  ;;  %v2890_v32 = vpop.f32.mrf.mxu0 }
 0x1bd   : > { %v2886_v29 = vpop.f32.mrf.mxu1  ;;  %v2894_v34 = vpop.f32.mrf.mxu0 }
 0x1be   : > { %v1732_v27 = vadd.f32 %v2894_v34, %v2890_v32 }
 0x1bf   : > { %v2888_v31 = vpop.f32.mrf.mxu1  ;;  %v2898_v7 = vpop.f32.mrf.mxu0 }
 0x1c1   : > { %v2892_v33 = vpop.f32.mrf.mxu1  ;;  %v2902_v1 = vpop.f32.mrf.mxu0 }
 0x1c3   : > { %v2896_v35 = vpop.f32.mrf.mxu1  ;;  %v2906_v38 = vpop.f32.mrf.mxu0 }
 0x1c5   : > { %v2900_v36 = vpop.f32.mrf.mxu1  ;;  %v2910_v40 = vpop.f32.mrf.mxu0 }
 0x1c7   : > { %v2904_v37 = vpop.f32.mrf.mxu1  ;;  %v2914_v42 = vpop.f32.mrf.mxu0 }
 0x1c9   : > { %v2908_v39 = vpop.f32.mrf.mxu1  ;;  %v2918_v44 = vpop.f32.mrf.mxu0 }
 0x1cb   : > { %v2912_v41 = vpop.f32.mrf.mxu1  ;;  %v2922_v46 = vpop.f32.mrf.mxu0 }
 0x1cd   : > { %v2916_v43 = vpop.f32.mrf.mxu1  ;;  %v2926_v47 = vpop.f32.mrf.mxu0 }
 0x1cf   : > { %v2920_v45 = vpop.f32.mrf.mxu1  ;;  %v2930_v49 = vpop.f32.mrf.mxu0 }
 0x1d1   : > { %v2924_v2 = vpop.f32.mrf.mxu1  ;;  %v2934_v51 = vpop.f32.mrf.mxu0 }
 0x1d3   : > { %v2928_v48 = vpop.f32.mrf.mxu1  ;;  %v2938_v53 = vpop.f32.mrf.mxu0 }
 0x1d5   : > { %v2932_v50 = vpop.f32.mrf.mxu1  ;;  %v2942_v54 = vpop.f32.mrf.mxu0 }
 0x1d7   : > { %v2936_v52 = vpop.f32.mrf.mxu1  ;;  %v2946_v56 = vpop.f32.mrf.mxu0 }
 0x1d9   : > { %v2940_v3 = vpop.f32.mrf.mxu1  ;;  %v2950_v58 = vpop.f32.mrf.mxu0 }
 0x1db   : > { %v2944_v55 = vpop.f32.mrf.mxu1  ;;  %v2954_v60 = vpop.f32.mrf.mxu0 }
 0x1dd   : > { %v2948_v57 = vpop.f32.mrf.mxu1  ;;  %v2958_v4 = vpop.f32.mrf.mxu0 }
 0x1df   : > { %v2952_v59 = vpop.f32.mrf.mxu1  ;;  %v2962_v63 = vpop.f32.mrf.mxu0 }
 0x1e1   : > { %v2956_v61 = vpop.f32.mrf.mxu1  ;;  %v2966_v9 = vpop.f32.mrf.mxu0 }
 0x1e3   : > { %v2960_v62 = vpop.f32.mrf.mxu1  ;;  %v2970_v11 = vpop.f32.mrf.mxu0 }
 0x1e5   : > { %v2964_v8 = vpop.f32.mrf.mxu1  ;;  %v2974_v13 = vpop.f32.mrf.mxu0 }
 0x1e7   : > { %v2968_v10 = vpop.f32.mrf.mxu1  ;;  %v2978_v15 = vpop.f32.mrf.mxu0 }
 0x1e8   : > { %3113 = vst [vmem:[#allocation5_spill] sm:$0xff] %v2978_v15 }
 0x1e9   : > { %v2972_v12 = vpop.f32.mrf.mxu1  ;;  %v2982_v5 = vpop.f32.mrf.mxu0 }
 0x1ea   : > { %3111 = vst [vmem:[#allocation3_spill] sm:$0xff] %v2972_v12  ;;  %3115 = vst [vmem:[#allocation7_spill] sm:$0xff] %v2982_v5 }
 0x1eb   : > { %v2976_v14 = vpop.f32.mrf.mxu1  ;;  %v2986_v18 = vpop.f32.mrf.mxu0 }
 0x1ec   : > { %3112 = vst [vmem:[#allocation4_spill] sm:$0xff] %v2976_v14  ;;  %3117 = vst [vmem:[#allocation9_spill] sm:$0xff] %v2986_v18 }
 0x1ed   : > { %v2980_v16 = vpop.f32.mrf.mxu1  ;;  %v2990_v20 = vpop.f32.mrf.mxu0 }
 0x1ee   : > { %3114 = vst [vmem:[#allocation6_spill] sm:$0xff] %v2980_v16  ;;  %3119 = vst [vmem:[#allocation11_spill] sm:$0xff] %v2990_v20  ;;  %v1806_v20 = vadd.f32 %v2886_v29, %v2882_v6 }
 0x1ef   : > { %v2984_v17 = vpop.f32.mrf.mxu1  ;;  %v2994_v22 = vpop.f32.mrf.mxu0 }
 0x1f0   : > { %3116 = vst [vmem:[#allocation8_spill] sm:$0xff] %v2984_v17  ;;  %3121 = vst [vmem:[#allocation13_spill] sm:$0xff] %v2994_v22  ;;  %v956_v17 = vpop.permute.xlu1 %955 }
 0x1f1   : > { %v2988_v19 = vpop.f32.mrf.mxu1  ;;  %v2998_v24 = vpop.f32.mrf.mxu0 }
 0x1f2   : > { %3118 = vst [vmem:[#allocation10_spill] sm:$0xff] %v2988_v19  ;;  %3123 = vst [vmem:[#allocation15_spill] sm:$0xff] %v2998_v24  ;;  %v1729_v19 = vadd.f32 %v1728_v30, %v2884_v0 }
 0x1f3   : > { %v2992_v21 = vpop.f32.mrf.mxu1 }
 0x1f4   : > { %3120 = vst [vmem:[#allocation12_spill] sm:$0xff] %v2992_v21  ;;  %v1095_v21 = vadd.f32 %v1726_v25, %v951_v26  ;;  %v1100_v15 = vadd.f32 %v1729_v19, %v956_v17  ;;  %v961_v12 = vpop.permute.xlu1 %960 }
 0x1f5   : > { %v2996_v23 = vpop.f32.mrf.mxu1 }
 0x1f6   : > { %3122 = vst [vmem:[#allocation14_spill] sm:$0xff] %v2996_v23  ;;  %v1240_v24 = vadd.f32 %v1806_v20, %v1095_v21 }
 0x1f7   : > { %v3001_v16 = vpop.f32.mrf.mxu1 }
 0x1f8   : > { %3124 = vst [vmem:[#allocation16_spill] sm:$0xff] %v3001_v16  ;;  %v1809_v16 = vadd.f32 %v2892_v33, %v2888_v31  ;;  %v1735_v31 = vadd.f32 %v2902_v1, %v2898_v7  ;;  %v1812_v33 = vadd.f32 %v2900_v36, %v2896_v35  ;;  %v1815_v7 = vadd.f32 %v2908_v39, %v2904_v37  ;;  %v971_v36 = vpop.permute.xlu1 %970 }
 0x1f9   : > { %v3006_v22 = vpop.f32.mrf.mxu1  ;;  %v1818_v37 = vadd.f32 %v2916_v43, %v2912_v41 }
 0x1fa   : > { %3125 = vst [vmem:[#allocation17_spill] sm:$0xff] %v3006_v22  ;;  %v1105_v22 = vadd.f32 %v1732_v27, %v961_v12  ;;  %v1245_v34 = vadd.f32 %v1809_v16, %v1100_v15  ;;  %v1738_v15 = vadd.f32 %v2910_v40, %v2906_v38  ;;  %v1741_v40 = vadd.f32 %v2918_v44, %v2914_v42 }
 0x1fb   : > { %v1821_v42 = vadd.f32 %v2924_v2, %v2920_v45  ;;  %v1824_v45 = vadd.f32 %v2932_v50, %v2928_v48 }
 0x1fc   : > { %v981_v43 = vpop.permute.xlu1 %980 }
 0x200   : > { %v991_v50 = vpop.permute.xlu1 %990 }
 0x236   : > { %v1884_v18 = vpop.f32.mrf.mxu0 }
 0x238   : > { %v1885_v14 = vpop.f32.mrf.mxu0 }
 0x239   : > { %v1886_v23 = vadd.f32 %v1885_v14, %v1884_v18 }
 0x23a   : > { %v1887_v5 = vpop.f32.mrf.mxu0 }
 0x23b   : > { %v1964_v28 = vpop.f32.mrf.mxu1  ;;  %v1385_v6 = vadd.f32 %v1886_v23, %v1240_v24  ;;  %v1250_v23 = vadd.f32 %v1812_v33, %v1105_v22 }
 0x23c   : > { %v1888_v0 = vpop.f32.mrf.mxu0 }
 0x23d   : > { %v1965_v30 = vpop.f32.mrf.mxu1  ;;  %v1889_v29 = vadd.f32 %v1888_v0, %v1887_v5  ;;  %v966_v5 = vpop.permute.xlu0 %965 }
 0x23e   : > { %v1966_v25 = vadd.f32 %v1965_v30, %v1964_v28  ;;  %v1890_v26 = vpop.f32.mrf.mxu0  ;;  %v1110_v35 = vadd.f32 %v1735_v31, %v966_v5 }
 0x23f   : > { %v1967_v32 = vpop.f32.mrf.mxu1  ;;  %v1390_v12 = vadd.f32 %v1889_v29, %v1245_v34  ;;  %v1115_v29 = vadd.f32 %v1738_v15, %v971_v36 }
 0x240   : > { %v1530_v14 = vadd.f32 %v1966_v25, %v1385_v6  ;;  %v1891_v17 = vpop.f32.mrf.mxu0  ;;  %v1255_v38 = vadd.f32 %v1815_v7, %v1110_v35 }
 0x241   : > { %v1968_v18 = vpop.f32.mrf.mxu1  ;;  %v1892_v19 = vadd.f32 %v1891_v17, %v1890_v26  ;;  %v976_v26 = vpop.permute.xlu0 %975  ;;  %v1744_v17 = vadd.f32 %v2926_v47, %v2922_v46  ;;  %v1747_v47 = vadd.f32 %v2934_v51, %v2930_v49  ;;  %v1827_v49 = vadd.f32 %v2940_v3, %v2936_v52 }
 0x242   : > { %1608 = vst.msk [vmem:[%s3016_s24] sm:$0xff] %vm179_vm0, %v1530_v14  ;;  %v1969_v20 = vadd.f32 %v1968_v18, %v1967_v32  ;;  %v1893_v21 = vpop.f32.mrf.mxu0  ;;  %v1260_v18 = vadd.f32 %v1818_v37, %v1115_v29  ;;  %v1120_v41 = vadd.f32 %v1741_v40, %v976_v26  ;;  %v1830_v52 = vadd.f32 %v2948_v57, %v2944_v55  ;;  %v1001_v57 = vpop.permute.xlu1 %1000 }
 0x243   : > { %v1970_v16 = vpop.f32.mrf.mxu1  ;;  %v1395_v28 = vadd.f32 %v1892_v19, %v1250_v23  ;;  %v1125_v23 = vadd.f32 %v1744_v17, %v981_v43 }
 0x244   : > { %v1535_v1 = vadd.f32 %v1969_v20, %v1390_v12  ;;  %v1894_v24 = vpop.f32.mrf.mxu0  ;;  %v1265_v46 = vadd.f32 %v1821_v42, %v1120_v41  ;;  %v1756_v42 = vadd.f32 %v2958_v4, %v2954_v60  ;;  %v1759_v4 = vadd.f32 %v2966_v9, %v2962_v63  ;;  %v3126_v63 = vld [vmem:[#allocation3_spill] sm:$0xff] }
 0x245   : > { %v1971_v27 = vpop.f32.mrf.mxu1  ;;  %v1895_v0 = vadd.f32 %v1894_v24, %v1893_v21  ;;  %v986_v36 = vpop.permute.xlu0 %985  ;;  %v1270_v29 = vadd.f32 %v1824_v45, %v1125_v23  ;;  %v1839_v9 = vadd.f32 %v3126_v63, %v2968_v10  ;;  %v3130_v10 = vld [vmem:[#allocation6_spill] sm:$0xff]  ;;  %v3139_v63 = vld [vmem:[#allocation16_spill] sm:$0xff] }
 0x246   : > { %1609 = vst.msk [vmem:[%s3016_s24 + $0x8] sm:$0xff] %vm179_vm0, %v1535_v1  ;;  %v1972_v30 = vadd.f32 %v1971_v27, %v1970_v16  ;;  %v1896_v6 = vpop.f32.mrf.mxu0  ;;  %v1130_v48 = vadd.f32 %v1747_v47, %v986_v36 }
 0x247   : > { %v1973_v25 = vpop.f32.mrf.mxu1  ;;  %v1400_v34 = vadd.f32 %v1895_v0, %v1255_v38 }
 0x248   : > { %v1540_v39 = vadd.f32 %v1972_v30, %v1395_v28  ;;  %v1897_v22 = vpop.f32.mrf.mxu0  ;;  %v1750_v30 = vadd.f32 %v2942_v54, %v2938_v53  ;;  %v1275_v53 = vadd.f32 %v1827_v49, %v1130_v48  ;;  %v1753_v54 = vadd.f32 %v2950_v58, %v2946_v56 }
 0x249   : > { %v1974_v32 = vpop.f32.mrf.mxu1  ;;  %v1898_v31 = vadd.f32 %v1897_v22, %v1896_v6  ;;  %v1833_v56 = vadd.f32 %v2956_v61, %v2952_v59  ;;  %v1836_v59 = vadd.f32 %v2964_v8, %v2960_v62  ;;  %v1011_v8 = vpop.permute.xlu1 %1010 }
 0x24a   : > { %1610 = vst.msk [vmem:[%s3016_s24 + $0x10] sm:$0xff] %vm179_vm0, %v1540_v39  ;;  %v1975_v33 = vadd.f32 %v1974_v32, %v1973_v25  ;;  %v1899_v14 = vpop.f32.mrf.mxu0  ;;  %v1135_v26 = vadd.f32 %v1750_v30, %v991_v50 }
 0x24b   : > { %v1976_v5 = vpop.f32.mrf.mxu1  ;;  %v1405_v20 = vadd.f32 %v1898_v31, %v1260_v18  ;;  %v996_v31 = vpop.permute.xlu0 %995 }
 0x24c   : > { %v1545_v44 = vadd.f32 %v1975_v33, %v1400_v34  ;;  %v1900_v12 = vpop.f32.mrf.mxu0  ;;  %v1280_v43 = vadd.f32 %v1830_v52, %v1135_v26  ;;  %v1140_v55 = vadd.f32 %v1753_v54, %v996_v31  ;;  %v3132_v31 = vld [vmem:[#allocation11_spill] sm:$0xff] }
 0x24d   : > { %v1977_v19 = vpop.f32.mrf.mxu1  ;;  %v1901_v21 = vadd.f32 %v1900_v12, %v1899_v14 }
 0x24e   : > { %1611 = vst.msk [vmem:[%s3016_s24 + $0x18] sm:$0xff] %vm179_vm0, %v1545_v44  ;;  %v1978_v15 = vadd.f32 %v1977_v19, %v1976_v5  ;;  %v1902_v16 = vpop.f32.mrf.mxu0  ;;  %v1285_v60 = vadd.f32 %v1833_v56, %v1140_v55 }
 0x24f   : > { %v1979_v7 = vpop.f32.mrf.mxu1  ;;  %v1410_v24 = vadd.f32 %v1901_v21, %v1265_v46  ;;  %v1006_v46 = vpop.permute.xlu0 %1005 }
 0x250   : > { %v1550_v2 = vadd.f32 %v1978_v15, %v1405_v20  ;;  %v1903_v35 = vpop.f32.mrf.mxu0  ;;  %v1150_v62 = vadd.f32 %v1759_v4, %v1006_v46  ;;  %v3137_v4 = vld [vmem:[#allocation12_spill] sm:$0xff] }
 0x251   : > { %v1980_v1 = vpop.f32.mrf.mxu1  ;;  %v1904_v27 = vadd.f32 %v1903_v35, %v1902_v16  ;;  %v1145_v16 = vadd.f32 %v1756_v42, %v1001_v57 }
 0x252   : > { %1612 = vst.msk [vmem:[%s3016_s24 + $0x20] sm:$0xff] %vm179_vm0, %v1550_v2  ;;  %v1981_v28 = vadd.f32 %v1980_v1, %v1979_v7  ;;  %v1905_v0 = vpop.f32.mrf.mxu0  ;;  %v1762_v1 = vadd.f32 %v2974_v13, %v2970_v11  ;;  %v1295_v11 = vadd.f32 %v1839_v9, %v1150_v62  ;;  %v3127_v13 = vld [vmem:[#allocation5_spill] sm:$0xff] }
 0x253   : > { %v1982_v6 = vpop.f32.mrf.mxu1  ;;  %v1415_v40 = vadd.f32 %v1904_v27, %v1270_v29  ;;  %v1290_v27 = vadd.f32 %v1836_v59, %v1145_v16  ;;  %v1016_v26 = vpop.permute.xlu0 %1015  ;;  %v3135_v16 = vld [vmem:[#allocation13_spill] sm:$0xff]  ;;  %v3138_v59 = vld [vmem:[#allocation14_spill] sm:$0xff] }
 0x254   : > { %v1555_v51 = vadd.f32 %v1981_v28, %v1410_v24  ;;  %v1906_v25 = vpop.f32.mrf.mxu0  ;;  %v1155_v50 = vadd.f32 %v1762_v1, %v1011_v8  ;;  %v3140_v9 = vld [vmem:[#allocation17_spill] sm:$0xff] }
 0x255   : > { %v1983_v38 = vpop.f32.mrf.mxu1  ;;  %v1907_v37 = vadd.f32 %v1906_v25, %v1905_v0  ;;  %v3128_v25 = vld [vmem:[#allocation7_spill] sm:$0xff]  ;;  %v1851_v62 = vadd.f32 %v3140_v9, %v3139_v63 }
 0x256   : > { %1613 = vst.msk [vmem:[%s3016_s24 + $0x28] sm:$0xff] %vm179_vm0, %v1555_v51  ;;  %v1984_v39 = vadd.f32 %v1983_v38, %v1982_v6  ;;  %v1908_v22 = vpop.f32.mrf.mxu0  ;;  %v1765_v38 = vadd.f32 %v3128_v25, %v3127_v13 }
 0x257   : > { %v1985_v32 = vpop.f32.mrf.mxu1  ;;  %v1420_v14 = vadd.f32 %v1907_v37, %v1275_v53 }
 0x258   : > { %v1560_v3 = vadd.f32 %v1984_v39, %v1415_v40  ;;  %v1909_v34 = vpop.f32.mrf.mxu0  ;;  %v3129_v40 = vld [vmem:[#allocation4_spill] sm:$0xff] }
 0x259   : > { %v1986_v33 = vpop.f32.mrf.mxu1  ;;  %v1910_v17 = vadd.f32 %v1909_v34, %v1908_v22  ;;  %v1842_v37 = vadd.f32 %v3130_v10, %v3129_v40  ;;  %v3131_v34 = vld [vmem:[#allocation9_spill] sm:$0xff] }
 0x25a   : > { %1614 = vst.msk [vmem:[%s3016_s24 + $0x30] sm:$0xff] %vm179_vm0, %v1560_v3  ;;  %v1987_v5 = vadd.f32 %v1986_v33, %v1985_v32  ;;  %v1911_v18 = vpop.f32.mrf.mxu0  ;;  %v1768_v33 = vadd.f32 %v3132_v31, %v3131_v34 }
 0x25b   : > { %v1988_v41 = vpop.f32.mrf.mxu1  ;;  %v1425_v19 = vadd.f32 %v1910_v17, %v1280_v43  ;;  %v1300_v17 = vadd.f32 %v1842_v37, %v1155_v50  ;;  %v1021_v43 = vpop.permute.xlu1 %1020 }
 0x25c   : > { %v1565_v58 = vadd.f32 %v1987_v5, %v1420_v14  ;;  %v1912_v44 = vpop.f32.mrf.mxu0  ;;  %v3133_v5 = vld [vmem:[#allocation8_spill] sm:$0xff] }
 0x25d   : > { %v1989_v12 = vpop.f32.mrf.mxu1  ;;  %v1913_v20 = vadd.f32 %v1912_v44, %v1911_v18  ;;  %v3134_v18 = vld [vmem:[#allocation10_spill] sm:$0xff] }
 0x25e   : > { %1615 = vst.msk [vmem:[%s3016_s24 + $0x38] sm:$0xff] %vm179_vm0, %v1565_v58  ;;  %v1990_v21 = vadd.f32 %v1989_v12, %v1988_v41  ;;  %v1914_v15 = vpop.f32.mrf.mxu0  ;;  %v1845_v42 = vadd.f32 %v3134_v18, %v3133_v5  ;;  %v1160_v41 = vadd.f32 %v1765_v38, %v1016_v26 }
 0x25f   : > { %v1991_v23 = vpop.f32.mrf.mxu1  ;;  %v1430_v45 = vadd.f32 %v1913_v20, %v1285_v60  ;;  %v1165_v20 = vadd.f32 %v1768_v33, %v1021_v43 }
 0x260   : > { %v1570_v61 = vadd.f32 %v1990_v21, %v1425_v19  ;;  %v1915_v7 = vpop.f32.mrf.mxu0 }
 0x261   : > { %v1992_v47 = vpop.f32.mrf.mxu1  ;;  %v1916_v2 = vadd.f32 %v1915_v7, %v1914_v15  ;;  %v1305_v15 = vadd.f32 %v1845_v42, %v1160_v41 }
 0x262   : > { %1616 = vst.msk [vmem:[%s3016_s24 + $0x40] sm:$0xff] %vm179_vm0, %v1570_v61  ;;  %v1993_v35 = vadd.f32 %v1992_v47, %v1991_v23  ;;  %v1917_v36 = vpop.f32.mrf.mxu0  ;;  %v3136_v23 = vld [vmem:[#allocation15_spill] sm:$0xff]  ;;  %v1848_v61 = vadd.f32 %v3138_v59, %v3137_v4  ;;  %v1026_v47 = vpop.permute.xlu0 %1025 }
 0x263   : > { %v1994_v24 = vpop.f32.mrf.mxu1  ;;  %v1435_v6 = vadd.f32 %v1916_v2, %v1290_v27  ;;  %v1771_v60 = vadd.f32 %v3136_v23, %v3135_v16 }
 0x264   : > { %v1575_v28 = vadd.f32 %v1993_v35, %v1430_v45  ;;  %v1918_v0 = vpop.f32.mrf.mxu0  ;;  %v1310_v27 = vadd.f32 %v1848_v61, %v1165_v20 }
 0x265   : > { %v1995_v30 = vpop.f32.mrf.mxu1  ;;  %v1919_v29 = vadd.f32 %v1918_v0, %v1917_v36  ;;  %v1170_v8 = vadd.f32 %v1771_v60, %v1026_v47 }
 0x266   : > { %1617 = vst.msk [vmem:[%s3016_s24 + $0x48] sm:$0xff] %vm179_vm0, %v1575_v28  ;;  %v1996_v49 = vadd.f32 %v1995_v30, %v1994_v24  ;;  %v1920_v48 = vpop.f32.mrf.mxu0 }
 0x267   : > { %v1997_v51 = vpop.f32.mrf.mxu1  ;;  %v1440_v53 = vadd.f32 %v1919_v29, %v1295_v11  ;;  %v1315_v50 = vadd.f32 %v1851_v62, %v1170_v8 }
 0x268   : > { %v1580_v39 = vadd.f32 %v1996_v49, %v1435_v6  ;;  %v1921_v22 = vpop.f32.mrf.mxu0 }
 0x269   : > { %v1998_v32 = vpop.f32.mrf.mxu1  ;;  %v1922_v54 = vadd.f32 %v1921_v22, %v1920_v48 }
 0x26a   : > { %1618 = vst.msk [vmem:[%s3016_s24 + $0x50] sm:$0xff] %vm179_vm0, %v1580_v39  ;;  %v1999_v52 = vadd.f32 %v1998_v32, %v1997_v51  ;;  %v1923_v3 = vpop.f32.mrf.mxu0 }
 0x26b   : > { %v2000_v14 = vpop.f32.mrf.mxu1  ;;  %v1445_v58 = vadd.f32 %v1922_v54, %v1300_v17 }
 0x26c   : > { %v1585_v56 = vadd.f32 %v1999_v52, %v1440_v53  ;;  %v1924_v55 = vpop.f32.mrf.mxu0 }
 0x26d   : > { %v2001_v57 = vpop.f32.mrf.mxu1  ;;  %v1925_v44 = vadd.f32 %v1924_v55, %v1923_v3 }
 0x26e   : > { %1619 = vst.msk [vmem:[%s3016_s24 + $0x58] sm:$0xff] %vm179_vm0, %v1585_v56  ;;  %v2002_v12 = vadd.f32 %v2001_v57, %v2000_v14  ;;  %v1926_v19 = vpop.f32.mrf.mxu0 }
 0x26f   : > { %v2003_v21 = vpop.f32.mrf.mxu1  ;;  %v1450_v2 = vadd.f32 %v1925_v44, %v1305_v15 }
 0x270   : > { %v1590_v7 = vadd.f32 %v2002_v12, %v1445_v58  ;;  %v1927_v46 = vpop.f32.mrf.mxu0 }
 0x271   : > { %v2004_v45 = vpop.f32.mrf.mxu1  ;;  %v1928_v35 = vadd.f32 %v1927_v46, %v1926_v19 }
 0x272   : > { %1620 = vst.msk [vmem:[%s3016_s24 + $0x60] sm:$0xff] %vm179_vm0, %v1590_v7  ;;  %v2005_v36 = vadd.f32 %v2004_v45, %v2003_v21  ;;  %v1929_v1 = vpop.f32.mrf.mxu0 }
 0x273   : > { %v2006_v24 = vpop.f32.mrf.mxu1  ;;  %v1455_v6 = vadd.f32 %v1928_v35, %v1310_v27 }
 0x274   : > { %v1595_v28 = vadd.f32 %v2005_v36, %v1450_v2  ;;  %v1930_v0 = vpop.f32.mrf.mxu0 }
 0x275   : > { %v2007_v30 = vpop.f32.mrf.mxu1  ;;  %v1931_v29 = vadd.f32 %v1930_v0, %v1929_v1 }
 0x276   : > { %1621 = vst.msk [vmem:[%s3016_s24 + $0x68] sm:$0xff] %vm179_vm0, %v1595_v28  ;;  %v2008_v49 = vadd.f32 %v2007_v30, %v2006_v24 }
 0x277   : > { %v2009_v48 = vpop.f32.mrf.mxu1  ;;  %v1460_v13 = vadd.f32 %v1931_v29, %v1315_v50 }
 0x278   : > { %v1600_v51 = vadd.f32 %v2008_v49, %v1455_v6 }
 0x279   : > { %v2010_v11 = vpop.f32.mrf.mxu1 }
 0x27a   : > { %1622 = vst.msk [vmem:[%s3016_s24 + $0x70] sm:$0xff] %vm179_vm0, %v1600_v51  ;;  %v2011_v25 = vadd.f32 %v2010_v11, %v2009_v48 }
 0x27c   : > { %v1605_v38 = vadd.f32 %v2011_v25, %v1460_v13 }
 0x27e   : > { %1623 = vst.msk [vmem:[%s3016_s24 + $0x78] sm:$0xff] %vm179_vm0, %v1605_v38 }
 0x27f PF: > { %s13_s12 = sadd.s32 1, %s2044_s12  }
 0x280   : > { %p10_p4 = scmp.ge.s32.totalorder %s13_s12, 4  }
 0x282   :  { %12 = sbr.rel (!%p10_p4) target bundleno = 1 (0x1), region = 62 }

</bundles_post_ra>
